<compile_context>
chip_gen: v7x
topology: tpu7x:2x2x1
jax: 0.10.0
libtpu: 0.0.40
codegen_flags: <defaults>
</compile_context>

<pallas_src>
import math
from collections import OrderedDict

import jax
import jax.numpy as jnp
from jax.experimental import pallas as pl
from jax.experimental.pallas import tpu as pltpu

# ----- module hyper-parameters (small, consistent with the module) -----------
N_NODES = 4
EMBED_DIM = 16
HIDDEN_DIM = 32
OUT_DIM = 10
N_HIDDEN_LAYER = 3  # -> MLP is Linear, (ReLU, Linear) x 3

# target-network parameter shapes produced by the hypernetwork heads
HEADS = [
    ("conv1.weight", (6, 3, 5, 5)),
    ("conv1.bias", (6,)),
    ("conv2.weight", (16, 6, 5, 5)),
    ("conv2.bias", (16,)),
    ("fc1.weight", (120, 16 * 5 * 5)),
    ("fc1.bias", (120,)),
    ("fc2.weight", (84, 120)),
    ("fc2.bias", (84,)),
    ("fc3.weight", (OUT_DIM, 84)),
    ("fc3.bias", (OUT_DIM,)),
]
HEAD_SIZES = [int(math.prod(s)) for _, s in HEADS]
TOTAL_OUT = sum(HEAD_SIZES)  # 62006

TILE_N = 32768                               # lane-dim tile (multiple of 128)
N_TILES = pl.cdiv(TOTAL_OUT, TILE_N)         # 2 grid steps (>=2 for v7x TCs)
TOTAL_PAD = N_TILES * TILE_N                 # head matrix stored pre-padded


# ----- Pallas kernel ----------------------------------------------------------
def fused_kernel(emd_ref, w0_ref, b0_ref, w1_ref, b1_ref, w2_ref, b2_ref,
                 w3_ref, b3_ref, hw_ref, hb_ref, out_ref):
    # Tiny MLP recomputed per tile (cheap; avoids a second pallas_call and
    # stays correct under dimension_semantics=("parallel",)).
    f = jnp.dot(emd_ref[...], w0_ref[...],
                preferred_element_type=jnp.float32) + b0_ref[...]
    for w_ref, b_ref in ((w1_ref, b1_ref), (w2_ref, b2_ref), (w3_ref, b3_ref)):
        f = jnp.maximum(f, 0.0)
        f = jnp.dot(f, w_ref[...],
                    preferred_element_type=jnp.float32) + b_ref[...]
    # Fused heads, one lane tile per grid step: bf16 x bf16 -> f32 on the MXU.
    out_ref[...] = (jnp.dot(f.astype(hw_ref.dtype), hw_ref[...],
                            preferred_element_type=jnp.float32)
                    + hb_ref[...])


# ----- forward ----------------------------------------------------------------
def hypernet_forward(idx, params):
    """idx: int32 array of shape (1,). Returns OrderedDict of target-net params."""
    emd = params["emb"][idx]  # (1, EMBED_DIM) embedding lookup (glue)

    full = lambda shape: pl.BlockSpec(shape, lambda j: (0, 0))

    hw_bytes = HIDDEN_DIM * TOTAL_PAD * 2    # bf16 head weights (dominant stream)
    hb_bytes = TOTAL_PAD * 4
    out_bytes = TOTAL_PAD * 4
    mlp_bytes = 4 * (EMBED_DIM * HIDDEN_DIM + 3 * HIDDEN_DIM * HIDDEN_DIM
                     + 4 * HIDDEN_DIM + EMBED_DIM)
    cost = pl.CostEstimate(
        flops=2 * HIDDEN_DIM * TOTAL_PAD
              + 2 * N_TILES * (EMBED_DIM + 3 * HIDDEN_DIM) * HIDDEN_DIM,
        transcendentals=0,
        bytes_accessed=hw_bytes + hb_bytes + out_bytes + mlp_bytes,
    )

    out = pl.pallas_call(
        fused_kernel,
        out_shape=jax.ShapeDtypeStruct((1, TOTAL_PAD), jnp.float32),
        grid_spec=pltpu.PrefetchScalarGridSpec(
            num_scalar_prefetch=0,
            grid=(N_TILES,),
            in_specs=[
                full((1, EMBED_DIM)),
                full((EMBED_DIM, HIDDEN_DIM)), full((1, HIDDEN_DIM)),
                full((HIDDEN_DIM, HIDDEN_DIM)), full((1, HIDDEN_DIM)),
                full((HIDDEN_DIM, HIDDEN_DIM)), full((1, HIDDEN_DIM)),
                full((HIDDEN_DIM, HIDDEN_DIM)), full((1, HIDDEN_DIM)),
                pl.BlockSpec((HIDDEN_DIM, TILE_N), lambda j: (0, j)),
                pl.BlockSpec((1, TILE_N), lambda j: (0, j)),
            ],
            out_specs=pl.BlockSpec((1, TILE_N), lambda j: (0, j)),
        ),
        compiler_params=pltpu.CompilerParams(
            dimension_semantics=("parallel",)),
        cost_estimate=cost,
    )(emd, params["w0"], params["b0"], params["w1"], params["b1"],
      params["w2"], params["b2"], params["w3"], params["b3"],
      params["head_w"], params["head_b"])

    flat = out[0, :TOTAL_OUT]

    # split + view into the OrderedDict of target-network parameters (glue).
    # TODO(synk): if a consumer can take the flat (1, TOTAL_OUT) buffer, skip
    # this split to save ~10 tiny slice/reshape launches.
    weights = OrderedDict()
    off = 0
    for (name, shape), sz in zip(HEADS, HEAD_SIZES):
        weights[name] = flat[off:off + sz].reshape(shape)
        off += sz
    return weights


# ----- deterministic parameter init ------------------------------------------
def init_params(key):
    ks = jax.random.split(key, 16)
    s = 0.05
    # heads are fused along the output axis and stored PRE-PADDED to TOTAL_PAD
    # (padding columns are zero and sliced off after the kernel).
    head_w = jax.random.normal(ks[9], (HIDDEN_DIM, TOTAL_OUT), jnp.float32) * s
    head_b = jax.random.normal(ks[10], (1, TOTAL_OUT), jnp.float32) * s
    head_w = jnp.pad(head_w, ((0, 0), (0, TOTAL_PAD - TOTAL_OUT)))
    head_b = jnp.pad(head_b, ((0, 0), (0, TOTAL_PAD - TOTAL_OUT)))
    params = {
        "emb": jax.random.normal(ks[0], (N_NODES, EMBED_DIM), jnp.float32) * s,
        "w0": jax.random.normal(ks[1], (EMBED_DIM, HIDDEN_DIM), jnp.float32) * s,
        "b0": jax.random.normal(ks[2], (1, HIDDEN_DIM), jnp.float32) * s,
        "w1": jax.random.normal(ks[3], (HIDDEN_DIM, HIDDEN_DIM), jnp.float32) * s,
        "b1": jax.random.normal(ks[4], (1, HIDDEN_DIM), jnp.float32) * s,
        "w2": jax.random.normal(ks[5], (HIDDEN_DIM, HIDDEN_DIM), jnp.float32) * s,
        "b2": jax.random.normal(ks[6], (1, HIDDEN_DIM), jnp.float32) * s,
        "w3": jax.random.normal(ks[7], (HIDDEN_DIM, HIDDEN_DIM), jnp.float32) * s,
        "b3": jax.random.normal(ks[8], (1, HIDDEN_DIM), jnp.float32) * s,
        "head_w": head_w.astype(jnp.bfloat16),  # (HIDDEN_DIM, TOTAL_PAD) bf16
        "head_b": head_b,                        # (1, TOTAL_PAD) f32
    }
    return params


# ----- pure-JAX reference for verification ------------------------------------
def reference_forward(idx, params):
    emd = params["emb"][idx]
    f = emd @ params["w0"] + params["b0"]
    for w, b in (("w1", "b1"), ("w2", "b2"), ("w3", "b3")):
        f = jnp.maximum(f, 0.0)
        f = f @ params[w] + params[b]
    # match the kernel's bf16 quantization of both operands of the head matmul
    hw = params["head_w"].astype(jnp.float32)[:, :TOTAL_OUT]
    f_q = f.astype(jnp.bfloat16).astype(jnp.float32)
    flat = (f_q @ hw + params["head_b"][:, :TOTAL_OUT])[0]
    weights = OrderedDict()
    off = 0
    for (name, shape), sz in zip(HEADS, HEAD_SIZES):
        weights[name] = flat[off:off + sz].reshape(shape)
        off += sz
    return weights


if __name__ == "__main__":
    key = jax.random.PRNGKey(0)
    params = init_params(key)
    idx = jnp.array([1], dtype=jnp.int32)  # single node index, like torch.tensor([1])

    fwd = jax.jit(hypernet_forward)
    out = fwd(idx, params)
    jax.block_until_ready(out)

    ref = reference_forward(idx, params)
    for name in out:
        assert out[name].shape == ref[name].shape, name
        assert jnp.allclose(out[name], ref[name], atol=1e-4, rtol=5e-3), name

    print("KERNEL_OK")
</pallas_src>

<mosaic_0001>
module attributes {stable_mosaic.version = 11 : i64} {
  func.func @fused_kernel(%arg0: i32, %arg1: memref<1x16xf32, #tpu.memory_space<vmem>>, %arg2: memref<16x32xf32, #tpu.memory_space<vmem>>, %arg3: memref<1x32xf32, #tpu.memory_space<vmem>>, %arg4: memref<32x32xf32, #tpu.memory_space<vmem>>, %arg5: memref<1x32xf32, #tpu.memory_space<vmem>>, %arg6: memref<32x32xf32, #tpu.memory_space<vmem>>, %arg7: memref<1x32xf32, #tpu.memory_space<vmem>>, %arg8: memref<32x32xf32, #tpu.memory_space<vmem>>, %arg9: memref<1x32xf32, #tpu.memory_space<vmem>>, %arg10: memref<32x32768xbf16, #tpu.memory_space<vmem>>, %arg11: memref<1x32768xf32, #tpu.memory_space<vmem>>, %arg12: memref<1x32768xf32, #tpu.memory_space<vmem>>) attributes {dimension_semantics = [#tpu.dimension_semantics<parallel>], iteration_bounds = array<i64: 2>, scalar_prefetch = 0 : i64, scratch_operands = 0 : i64, tpu.core_type = #tpu.core_type<tc>, window_params = [{pipeline_mode = #tpu.pipeline_mode<synchronous>, transform_indices = @transform_0, window_bounds = array<i64: 1, 16>}, {pipeline_mode = #tpu.pipeline_mode<synchronous>, transform_indices = @transform_1, window_bounds = array<i64: 16, 32>}, {pipeline_mode = #tpu.pipeline_mode<synchronous>, transform_indices = @transform_2, window_bounds = array<i64: 1, 32>}, {pipeline_mode = #tpu.pipeline_mode<synchronous>, transform_indices = @transform_3, window_bounds = array<i64: 32, 32>}, {pipeline_mode = #tpu.pipeline_mode<synchronous>, transform_indices = @transform_4, window_bounds = array<i64: 1, 32>}, {pipeline_mode = #tpu.pipeline_mode<synchronous>, transform_indices = @transform_5, window_bounds = array<i64: 32, 32>}, {pipeline_mode = #tpu.pipeline_mode<synchronous>, transform_indices = @transform_6, window_bounds = array<i64: 1, 32>}, {pipeline_mode = #tpu.pipeline_mode<synchronous>, transform_indices = @transform_7, window_bounds = array<i64: 32, 32>}, {pipeline_mode = #tpu.pipeline_mode<synchronous>, transform_indices = @transform_8, window_bounds = array<i64: 1, 32>}, {transform_indices = @transform_9, window_bounds = array<i64: 32, 32768>}, {transform_indices = @transform_10, window_bounds = array<i64: 1, 32768>}, {transform_indices = @transform_11, window_bounds = array<i64: 1, 32768>}]} {
    %c0 = arith.constant 0 : index
    %c0_0 = arith.constant 0 : index
    %0 = vector.load %arg1[%c0, %c0_0] : memref<1x16xf32, #tpu.memory_space<vmem>>, vector<1x16xf32>
    %c0_1 = arith.constant 0 : index
    %c0_2 = arith.constant 0 : index
    %1 = vector.load %arg2[%c0_1, %c0_2] : memref<16x32xf32, #tpu.memory_space<vmem>>, vector<16x32xf32>
    %cst = arith.constant dense<0.000000e+00> : vector<1x32xf32>
    %2 = tpu.matmul %0, %1, %cst {dimension_numbers = #tpu.dot_dimension_numbers<[1], [0], [0], [1], [0, 0, 1, 1], [], []>} : vector<1x16xf32>, vector<16x32xf32>, vector<1x32xf32> -> vector<1x32xf32>
    %c0_3 = arith.constant 0 : index
    %c0_4 = arith.constant 0 : index
    %3 = vector.load %arg3[%c0_3, %c0_4] : memref<1x32xf32, #tpu.memory_space<vmem>>, vector<1x32xf32>
    %4 = arith.addf %2, %3 : vector<1x32xf32>
    %cst_5 = arith.constant 0.000000e+00 : f32
    %5 = vector.broadcast %cst_5 : f32 to vector<1x32xf32>
    %6 = arith.maximumf %4, %5 : vector<1x32xf32>
    %c0_6 = arith.constant 0 : index
    %c0_7 = arith.constant 0 : index
    %7 = vector.load %arg4[%c0_6, %c0_7] : memref<32x32xf32, #tpu.memory_space<vmem>>, vector<32x32xf32>
    %cst_8 = arith.constant dense<0.000000e+00> : vector<1x32xf32>
    %8 = tpu.matmul %6, %7, %cst_8 {dimension_numbers = #tpu.dot_dimension_numbers<[1], [0], [0], [1], [0, 0, 1, 1], [], []>} : vector<1x32xf32>, vector<32x32xf32>, vector<1x32xf32> -> vector<1x32xf32>
    %c0_9 = arith.constant 0 : index
    %c0_10 = arith.constant 0 : index
    %9 = vector.load %arg5[%c0_9, %c0_10] : memref<1x32xf32, #tpu.memory_space<vmem>>, vector<1x32xf32>
    %10 = arith.addf %8, %9 : vector<1x32xf32>
    %cst_11 = arith.constant 0.000000e+00 : f32
    %11 = vector.broadcast %cst_11 : f32 to vector<1x32xf32>
    %12 = arith.maximumf %10, %11 : vector<1x32xf32>
    %c0_12 = arith.constant 0 : index
    %c0_13 = arith.constant 0 : index
    %13 = vector.load %arg6[%c0_12, %c0_13] : memref<32x32xf32, #tpu.memory_space<vmem>>, vector<32x32xf32>
    %cst_14 = arith.constant dense<0.000000e+00> : vector<1x32xf32>
    %14 = tpu.matmul %12, %13, %cst_14 {dimension_numbers = #tpu.dot_dimension_numbers<[1], [0], [0], [1], [0, 0, 1, 1], [], []>} : vector<1x32xf32>, vector<32x32xf32>, vector<1x32xf32> -> vector<1x32xf32>
    %c0_15 = arith.constant 0 : index
    %c0_16 = arith.constant 0 : index
    %15 = vector.load %arg7[%c0_15, %c0_16] : memref<1x32xf32, #tpu.memory_space<vmem>>, vector<1x32xf32>
    %16 = arith.addf %14, %15 : vector<1x32xf32>
    %cst_17 = arith.constant 0.000000e+00 : f32
    %17 = vector.broadcast %cst_17 : f32 to vector<1x32xf32>
    %18 = arith.maximumf %16, %17 : vector<1x32xf32>
    %c0_18 = arith.constant 0 : index
    %c0_19 = arith.constant 0 : index
    %19 = vector.load %arg8[%c0_18, %c0_19] : memref<32x32xf32, #tpu.memory_space<vmem>>, vector<32x32xf32>
    %cst_20 = arith.constant dense<0.000000e+00> : vector<1x32xf32>
    %20 = tpu.matmul %18, %19, %cst_20 {dimension_numbers = #tpu.dot_dimension_numbers<[1], [0], [0], [1], [0, 0, 1, 1], [], []>} : vector<1x32xf32>, vector<32x32xf32>, vector<1x32xf32> -> vector<1x32xf32>
    %c0_21 = arith.constant 0 : index
    %c0_22 = arith.constant 0 : index
    %21 = vector.load %arg9[%c0_21, %c0_22] : memref<1x32xf32, #tpu.memory_space<vmem>>, vector<1x32xf32>
    %22 = arith.addf %20, %21 : vector<1x32xf32>
    %23 = arith.truncf %22 : vector<1x32xf32> to vector<1x32xbf16>
    %c0_23 = arith.constant 0 : index
    %c0_24 = arith.constant 0 : index
    %24 = vector.load %arg10[%c0_23, %c0_24] : memref<32x32768xbf16, #tpu.memory_space<vmem>>, vector<32x32768xbf16>
    %cst_25 = arith.constant dense<0.000000e+00> : vector<1x32768xf32>
    %25 = tpu.matmul %23, %24, %cst_25 {dimension_numbers = #tpu.dot_dimension_numbers<[1], [0], [0], [1], [0, 0, 1, 1], [], []>} : vector<1x32xbf16>, vector<32x32768xbf16>, vector<1x32768xf32> -> vector<1x32768xf32>
    %c0_26 = arith.constant 0 : index
    %c0_27 = arith.constant 0 : index
    %26 = vector.load %arg11[%c0_26, %c0_27] : memref<1x32768xf32, #tpu.memory_space<vmem>>, vector<1x32768xf32>
    %27 = arith.addf %25, %26 : vector<1x32768xf32>
    %c0_28 = arith.constant 0 : index
    %c0_29 = arith.constant 0 : index
    %28 = vector.load %arg12[%c0_28, %c0_29] : memref<1x32768xf32, #tpu.memory_space<vmem>>, vector<1x32768xf32>
    tpu.vector_store %arg12[%c0_28, %c0_29], %27 {strides = array<i32>} : memref<1x32768xf32, #tpu.memory_space<vmem>>, vector<1x32768xf32>,
    return
  }
  func.func @transform_0(%arg0: i32) -> (i32, i32) {
    %c0_i32 = arith.constant 0 : i32
    %c0_i32_0 = arith.constant 0 : i32
    %c0_i32_1 = arith.constant 0 : i32
    return %c0_i32, %c0_i32_0 : i32, i32
  }
  func.func @transform_1(%arg0: i32) -> (i32, i32) {
    %c0_i32 = arith.constant 0 : i32
    %c0_i32_0 = arith.constant 0 : i32
    %c0_i32_1 = arith.constant 0 : i32
    return %c0_i32, %c0_i32_0 : i32, i32
  }
  func.func @transform_2(%arg0: i32) -> (i32, i32) {
    %c0_i32 = arith.constant 0 : i32
    %c0_i32_0 = arith.constant 0 : i32
    %c0_i32_1 = arith.constant 0 : i32
    return %c0_i32, %c0_i32_0 : i32, i32
  }
  func.func @transform_3(%arg0: i32) -> (i32, i32) {
    %c0_i32 = arith.constant 0 : i32
    %c0_i32_0 = arith.constant 0 : i32
    %c0_i32_1 = arith.constant 0 : i32
    return %c0_i32, %c0_i32_0 : i32, i32
  }
  func.func @transform_4(%arg0: i32) -> (i32, i32) {
    %c0_i32 = arith.constant 0 : i32
    %c0_i32_0 = arith.constant 0 : i32
    %c0_i32_1 = arith.constant 0 : i32
    return %c0_i32, %c0_i32_0 : i32, i32
  }
  func.func @transform_5(%arg0: i32) -> (i32, i32) {
    %c0_i32 = arith.constant 0 : i32
    %c0_i32_0 = arith.constant 0 : i32
    %c0_i32_1 = arith.constant 0 : i32
    return %c0_i32, %c0_i32_0 : i32, i32
  }
  func.func @transform_6(%arg0: i32) -> (i32, i32) {
    %c0_i32 = arith.constant 0 : i32
    %c0_i32_0 = arith.constant 0 : i32
    %c0_i32_1 = arith.constant 0 : i32
    return %c0_i32, %c0_i32_0 : i32, i32
  }
  func.func @transform_7(%arg0: i32) -> (i32, i32) {
    %c0_i32 = arith.constant 0 : i32
    %c0_i32_0 = arith.constant 0 : i32
    %c0_i32_1 = arith.constant 0 : i32
    return %c0_i32, %c0_i32_0 : i32, i32
  }
  func.func @transform_8(%arg0: i32) -> (i32, i32) {
    %c0_i32 = arith.constant 0 : i32
    %c0_i32_0 = arith.constant 0 : i32
    %c0_i32_1 = arith.constant 0 : i32
    return %c0_i32, %c0_i32_0 : i32, i32
  }
  func.func @transform_9(%arg0: i32) -> (i32, i32) {
    %c0_i32 = arith.constant 0 : i32
    %c0_i32_0 = arith.constant 0 : i32
    return %c0_i32, %arg0 : i32, i32
  }
  func.func @transform_10(%arg0: i32) -> (i32, i32) {
    %c0_i32 = arith.constant 0 : i32
    %c0_i32_0 = arith.constant 0 : i32
    return %c0_i32, %arg0 : i32, i32
  }
  func.func @transform_11(%arg0: i32) -> (i32, i32) {
    %c0_i32 = arith.constant 0 : i32
    %c0_i32_0 = arith.constant 0 : i32
    return %c0_i32, %arg0 : i32, i32
  }
}

</mosaic_0001>

<bundles_post_ra>
// kernel: hypernet_forward.1
= control target key start
LH: loop header
LB: loop body
LE: loop exit
PB: predicated region body
PF: predicated region fallthrough
CT: control target
= control target key end

     0   :  { %s16744_s0 = inlined_call_operand.vmem [shape: f32[1,16], index: 0, kind: input, shape index: {}]   ;;  %s16745_s1 = inlined_call_operand.hbm [shape: f32[16,32], index: 1, kind: input, shape index: {}]   ;;  %s16746_s2 = inlined_call_operand.hbm [shape: f32[1,32], index: 2, kind: input, shape index: {}]   ;;  %s16747_s3 = inlined_call_operand.hbm [shape: f32[32,32], index: 3, kind: input, shape index: {}]   ;;  %s16748_s4 = inlined_call_operand.hbm [shape: f32[1,32], index: 4, kind: input, shape index: {}]   ;;  %s16749_s5 = inlined_call_operand.hbm [shape: f32[32,32], index: 5, kind: input, shape index: {}]   ;;  %s16750_s6 = inlined_call_operand.hbm [shape: f32[1,32], index: 6, kind: input, shape index: {}]   ;;  %s16751_s7 = inlined_call_operand.hbm [shape: f32[32,32], index: 7, kind: input, shape index: {}]   ;;  %s16752_s8 = inlined_call_operand.hbm [shape: f32[1,32], index: 8, kind: input, shape index: {}]   ;;  %s16753_s9 = inlined_call_operand.hbm [shape: bf16[32,65536], index: 9, kind: input, shape index: {}]   ;;  %s16754_s10 = inlined_call_operand.hbm [shape: f32[1,65536], index: 10, kind: input, shape index: {}]   ;;  %s16755_s11 = inlined_call_operand.vmem [shape: f32[1,65536], index: 11, kind: output, shape index: {}]  }
   0x1   :  { %16770 = sst [smem:[#allocation24_spill]] %s16744_s0 }
   0x2   :  { %16771 = sst [smem:[#allocation25_spill]] %s16745_s1 }
   0x3   :  { %16772 = sst [smem:[#allocation26_spill]] %s16746_s2 }
   0x4   :  { %16773 = sst [smem:[#allocation27_spill]] %s16748_s4 }
   0x5   :  { %16774 = sst [smem:[#allocation28_spill]] %s16750_s6 }
   0x6   :  { %16775 = sst [smem:[#allocation29_spill]] %s16753_s9 }
   0x7   :  { %16776 = sst [smem:[#allocation30_spill]] %s16755_s11 }
   0x8   :  { %16 = vsyncpa [#allocation3], 0 }
   0x9   :  { %17 = vsyncpa [#allocation5], 0 }
   0xa   :  { %18 = vsyncpa [#allocation8], 0 }
   0xb   :  { %19 = vsyncpa [#allocation11], 0 }
   0xc   :  { %20 = vsyncpa [#allocation14], 0  ;;  %s13891_s17 = smov 0   ;;  %s13893_s18 = smov 0  }
   0xd   :  { %s13895_s19 = smov 0   ;;  %s13897_s20 = smov 0  }
   0xe LB: > { %s13811_s21 = smov [#allocation2]   ;;  %s13912_s23 = sadd.s32 4294967295, %s13809_s20   ;;  %s13809_s20 = sphi %s13897_s20, %s16815_s20   ;;  %s13805_s19 = sphi %s13895_s19, %s16814_s19   ;;  %s13801_s18 = sphi %s13893_s18, %s16813_s18   ;;  %s13797_s17 = sphi %s13891_s17, %s16812_s17  }
   0xf   : > { %s313_s22 = sshll.u32 %s13811_s21, 4  ;;  %p12581_p0 = scmp.ge.s32.totalorder %s13809_s20, 1  ;;  %s13917_s22 = int_to_ptr.vmem [resolvable:$true] %s313_s22 }
  0x10   : > { %p16757_p1 = scmp.eq.s32.totalorder %s13912_s23, 0  ;;  %p298_p2 = scmp.lt.s32.totalorder %s13809_s20, 3 }
  0x11   : > { %s13812_s25 = smov [#allocation4]   ;;  %s13813_s28 = smov [#allocation7]  }
  0x12   : > { %p13919_p3 = pnand %p12581_p0, %p298_p2  ;;  %s327_s26 = sshll.u32 %s13812_s25, 4  ;;  %s13931_s26 = int_to_ptr.vmem [resolvable:$true] %s327_s26 }
  0x13   : > { %s351_s29 = sshll.u32 %s13813_s28, 4  ;;  %s16780_s1 = sld [smem:[#allocation25_spill]]  ;;  %s13933_s29 = int_to_ptr.vmem [resolvable:$true] %s351_s29 }
  0x14   : > { %s16777_s24 = scalar_select %p13919_p3, 1, 0 }
  0x15   : > { %p13372_p4 = pneg %p13919_p3 }
  0x16   : > { %16778 = sst [smem:[#allocation23_spill]] %s16777_s24 }
  0x17   : > { %p13927_p5 = pnand %p13372_p4, %p16757_p1 }
  0x19   : > { %s16779_s27 = scalar_select %p13927_p5, 1, 0 }
  0x1a   : > { %s13471_s13 = scalar_lea.hbm %s16780_s1, 256  ;;  %p13943_p7 = pneg %p13927_p5 }
  0x1b   : > { %p13472_p6 = scmp.ne.s32.totalorder %s16780_s1, %s13471_s13  ;;  %p13478_p10 = scmp.lt.u32.totalorder %s13471_s13, %s16780_s1 }
  0x1d   : > { %p13474_p8 = pnand %p13943_p7, %p13472_p6 }
  0x1f   : > { %p13475_p9 = pneg %p13474_p8 }
  0x21   : > { %p13480_p11 = pnand %p13478_p10, %p13475_p9 }
  0x23   : > { %13483 = shalt.err (!%p13480_p11)
}
  0x24   : > { %s13484_s28 = scalar_lea.vmem %s13917_s22, 256  ;;  %p13492_p2 = scmp.lt.s32.totalorder %s13917_s22, %s13917_s22 }
  0x25   : > { %p13485_p12 = scmp.ne.s32.totalorder %s13917_s22, %s13484_s28  ;;  %p13493_p4 = scmp.lt.s32.totalorder %s13484_s28, %s13484_s28 }
  0x27   : > { %p13487_p13 = pnand %p13485_p12, %p13943_p7  ;;  %p13494_p6 = por %p13493_p4, %p13492_p2 }
  0x29   : > { %p13488_p0 = pneg %p13487_p13 }
  0x2b   : > { %p13495_p8 = pnand %p13494_p6, %p13488_p0 }
  0x2d   : > { %13498 = shalt.err (!%p13495_p8)
}
  0x2e   : > { %s16760_s30 = smov 128   ;;  %s16765_s12 = smov 8  }
  0x2f   : > { %13375 = dma.hbm_to_vmem [thread:$0]  (!%p13927_p5), %s16780_s1, 256, %s13917_s22, [#allocation3], %s16760_s30, %s16760_s30, %s16765_s12  }
  0x30   : > { %s16782_s2 = sld [smem:[#allocation26_spill]] }
  0x36   : > { %s13499_s25 = scalar_lea.hbm %s16782_s2, 16 }
  0x37   : > { %p13500_p9 = scmp.ne.s32.totalorder %s16782_s2, %s13499_s25  ;;  %p13506_p12 = scmp.lt.u32.totalorder %s13499_s25, %s16782_s2 }
  0x39   : > { %p13502_p10 = pnand %p13500_p9, %p13943_p7 }
  0x3b   : > { %p13503_p11 = pneg %p13502_p10 }
  0x3d   : > { %p13508_p13 = pnand %p13506_p12, %p13503_p11 }
  0x3f   : > { %13511 = shalt.err (!%p13508_p13)
}
  0x40   : > { %s13512_s22 = scalar_lea.vmem %s13931_s26, 16  ;;  %s13519_s11 = scalar_lea.vmem %s13931_s26, 32 }
  0x41   : > { %p13513_p0 = scmp.ne.s32.totalorder %s13931_s26, %s13512_s22  ;;  %p13520_p6 = scmp.lt.s32.totalorder %s13931_s26, %s13931_s26 }
  0x42   : > { %p13521_p8 = scmp.lt.s32.totalorder %s13519_s11, %s13512_s22 }
  0x43   : > { %p13515_p2 = pnand %p13513_p0, %p13943_p7 }
  0x44   : > { %p13522_p9 = por %p13521_p8, %p13520_p6 }
  0x45   : > { %p13516_p4 = pneg %p13515_p2 }
  0x47   : > { %p13523_p10 = pnand %p13522_p9, %p13516_p4 }
  0x49   : > { %13526 = shalt.err (!%p13523_p10)
}
  0x4a   : > { %13378 = dma.hbm_to_vmem [thread:$0]  (!%p13927_p5), %s16782_s2, 16, %s13931_s26, [#allocation5]  }
  0x4b   : > { %s16783_s4 = sld [smem:[#allocation27_spill]] }
  0x51   : > { %s13527_s15 = scalar_lea.hbm %s16783_s4, 16 }
  0x52   : > { %p13528_p11 = scmp.ne.s32.totalorder %s16783_s4, %s13527_s15  ;;  %p13534_p0 = scmp.lt.u32.totalorder %s13527_s15, %s16783_s4 }
  0x54   : > { %p13530_p12 = pnand %p13528_p11, %p13943_p7 }
  0x56   : > { %p13531_p13 = pneg %p13530_p12 }
  0x58   : > { %p13536_p2 = pnand %p13534_p0, %p13531_p13 }
  0x5a   : > { %13539 = shalt.err (!%p13536_p2)
}
  0x5b   : > { %s13540_s26 = scalar_lea.vmem %s13933_s29, 16  ;;  %s13547_s11 = scalar_lea.vmem %s13933_s29, 32 }
  0x5c   : > { %p13541_p4 = scmp.ne.s32.totalorder %s13933_s29, %s13540_s26  ;;  %p13548_p9 = scmp.lt.s32.totalorder %s13933_s29, %s13933_s29 }
  0x5d   : > { %p13549_p10 = scmp.lt.s32.totalorder %s13547_s11, %s13540_s26 }
  0x5e   : > { %p13543_p6 = pnand %p13541_p4, %p13943_p7 }
  0x5f   : > { %p13550_p11 = por %p13549_p10, %p13548_p9 }
  0x60   : > { %p13544_p8 = pneg %p13543_p6 }
  0x62   : > { %p13551_p12 = pnand %p13550_p11, %p13544_p8 }
  0x64   : > { %13554 = shalt.err (!%p13551_p12)
}
  0x65   : > { %13384 = dma.hbm_to_vmem [thread:$0]  (!%p13927_p5), %s16783_s4, 16, %s13933_s29, [#allocation8]  }
  0x66   : > { %s13816_s13 = smov [#allocation10]   ;;  %s16784_s6 = sld [smem:[#allocation28_spill]] }
  0x67   : > { %s375_s14 = sshll.u32 %s13816_s13, 4  ;;  %s376_s14 = int_to_ptr.vmem [resolvable:$true] %s375_s14 }
  0x6c   : > { %s13555_s25 = scalar_lea.hbm %s16784_s6, 16 }
  0x6d   : > { %p13556_p13 = scmp.ne.s32.totalorder %s16784_s6, %s13555_s25  ;;  %p13562_p4 = scmp.lt.u32.totalorder %s13555_s25, %s16784_s6 }
  0x6f   : > { %p13558_p0 = pnand %p13556_p13, %p13943_p7 }
  0x71   : > { %p13559_p2 = pneg %p13558_p0 }
  0x73   : > { %p13564_p6 = pnand %p13562_p4, %p13559_p2 }
  0x75   : > { %13567 = shalt.err (!%p13564_p6)
}
  0x76   : > { %s13568_s29 = scalar_lea.vmem %s376_s14, 16  ;;  %s13575_s0 = scalar_lea.vmem %s376_s14, 32 }
  0x77   : > { %p13569_p8 = scmp.ne.s32.totalorder %s376_s14, %s13568_s29  ;;  %p13576_p11 = scmp.lt.s32.totalorder %s376_s14, %s376_s14 }
  0x78   : > { %p13577_p12 = scmp.lt.s32.totalorder %s13575_s0, %s13568_s29 }
  0x79   : > { %p13571_p9 = pnand %p13569_p8, %p13943_p7 }
  0x7a   : > { %p13578_p1 = por %p13577_p12, %p13576_p11 }
  0x7b   : > { %p13572_p10 = pneg %p13571_p9 }
  0x7d   : > { %p13579_p3 = pnand %p13578_p1, %p13572_p10 }
  0x7f   : > { %13582 = shalt.err (!%p13579_p3)
}
  0x80   : > { %13390 = dma.hbm_to_vmem [thread:$0]  (!%p13927_p5), %s16784_s6, 16, %s376_s14, [#allocation11]  }
  0x81   : > { %s14034_s15 = sadd.s32 1, %s13809_s20   ;;  %s222_s21 = sadd.s32 1, %s13805_s19 }
  0x82   : > { %s219_s25 = ssub.s32 %s13809_s20, %s14034_s15  ;;  %p229_p1 = scmp.ne.s32.totalorder %s13805_s19, %s13801_s18 }
  0x83   : > { %p220_p3 = scmp.eq.s32.totalorder %s219_s25, 0  ;;  %p230_p13 = scmp.eq.s32.totalorder %s13809_s20, 0 }
  0x84   : > { %p235_p0 = scmp.ne.s32.totalorder %s13801_s18, %s13797_s17  ;;  %p13412_p2 = scmp.lt.s32.totalorder %s13809_s20, 2 }
  0x85   : > { %s14046_s28 = scalar_select %p220_p3, %s13805_s19, %s222_s21  }
  0x86   : > { %p231_p4 = por %p230_p13, %p229_p1  ;;  %p16785_p6 = scmp.eq.s32.totalorder %s13912_s23, 0 }
  0x87   : > { %s410_s26 = sand.u32 1, %s13809_s20   ;;  %s16759_s14 = sand.u32 1, %s13805_s19  }
  0x88   : > { %p14050_p8 = por %p16785_p6, %p235_p0  ;;  %s12591_s11 = sshll.u32 %s16759_s14, 12 }
  0x89   : > { %s13255_s29 = sshll.u32 %s13809_s20, 14  ;;  %s16787_s9 = sld [smem:[#allocation29_spill]] }
  0x8a   : > { %s16786_s22 = scalar_select %p14050_p8, 1, 0 }
  0x8b   : > { %s414_s17 = scalar_lea.vmem [#allocation15], %s12591_s11  ;;  %p14066_p9 = pnand %p13412_p2, %p231_p4 }
  0x8c   : > { %s421_s21 = sshll.u32 %s414_s17, 4  ;;  %s14070_s14 = scalar_lea.sflag [#allocation3], %s410_s26  ;;  %s14064_s21 = int_to_ptr.vmem [resolvable:$true] %s421_s21 }
  0x8d   : > { %s16788_s25 = scalar_select %p14066_p9, 1, 0 }
  0x8e   : > { %p16767_p11 = pneg %p14066_p9 }
  0x8f   : > { %s14062_s13 = scalar_lea.hbm %s16787_s9, %s13255_s29  ;;  %s13588_s0 = scalar_lea.hbm %s16787_s9, 131072 }
  0x90   : > { %s13583_s30 = scalar_lea.hbm %s14062_s13, 65536  ;;  %p13589_p3 = scmp.lt.u32.totalorder %s14062_s13, %s16787_s9 }
  0x91   : > { %p13584_p10 = scmp.ne.s32.totalorder %s14062_s13, %s13583_s30  ;;  %p13590_p13 = scmp.lt.u32.totalorder %s13588_s0, %s13583_s30 }
  0x92   : > { %p13592_p2 = scmp.lt.u32.totalorder %s13583_s30, %s14062_s13 }
  0x93   : > { %p13586_p12 = pnand %p16767_p11, %p13584_p10  ;;  %p13591_p0 = por %p13590_p13, %p13589_p3 }
  0x95   : > { %p13587_p1 = pneg %p13586_p12  ;;  %p13593_p4 = por %p13592_p2, %p13591_p0 }
  0x97   : > { %p13594_p6 = pnand %p13593_p4, %p13587_p1 }
  0x99   : > { %13597 = shalt.err (!%p13594_p6)
}
  0x9a   : > { %s13598_s26 = scalar_lea.vmem %s14064_s21, 65536  ;;  %s13817_s11 = smov [#allocation15]  }
  0x9b   : > { %p13599_p10 = scmp.ne.s32.totalorder %s14064_s21, %s13598_s26  ;;  %s13603_s29 = sshll.u32 %s13817_s11, 4  ;;  %s13604_s29 = int_to_ptr.vmem [resolvable:$false] %s13603_s29 }
  0x9c   : > { %s13605_s24 = scalar_lea.vmem %s13604_s29, 131072  ;;  %p13606_p5 = scmp.lt.s32.totalorder %s14064_s21, %s13604_s29 }
  0x9d   : > { %p13601_p12 = pnand %p13599_p10, %p16767_p11  ;;  %p13607_p3 = scmp.lt.s32.totalorder %s13605_s24, %s13598_s26 }
  0x9f   : > { %p13602_p8 = pneg %p13601_p12  ;;  %p13608_p13 = por %p13607_p3, %p13606_p5 }
  0xa1   : > { %p13609_p0 = pnand %p13608_p13, %p13602_p8 }
  0xa3   : > { %13612 = shalt.err (!%p13609_p0)
}
  0xa4   : > { %s13818_s30 = smov 32768   ;;  %s13819_s0 = smov 16384  }
  0xa5   : > { %s13820_s17 = smov 1024   ;;  %s13821_s12 = smov [#allocation6]  }
  0xa6   : > { %13400 = dma.hbm_to_vmem [thread:$0]  (!%p14066_p9), %s14062_s13, 65536, %s14064_s21, %s14070_s14, %s13818_s30, %s13819_s0, %s13820_s17  }
  0xa7   : > { %s337_s1 = sshll.u32 %s13821_s12, 4  ;;  %s13822_s11 = smov [#allocation9]   ;;  %s338_s1 = int_to_ptr.vmem [resolvable:$true] %s337_s1 }
  0xa8   : > { %s361_s2 = sshll.u32 %s13822_s11, 4  ;;  %s13613_s24 = scalar_lea.hbm %s16747_s3, 512  ;;  %s14098_s2 = int_to_ptr.vmem [resolvable:$true] %s361_s2 }
  0xa9   : > { %p13614_p5 = scmp.ne.s32.totalorder %s16747_s3, %s13613_s24  ;;  %p13620_p2 = scmp.lt.u32.totalorder %s13613_s24, %s16747_s3 }
  0xab   : > { %p13616_p8 = pnand %p13614_p5, %p13943_p7 }
  0xad   : > { %p13617_p1 = pneg %p13616_p8 }
  0xaf   : > { %p13622_p4 = pnand %p13620_p2, %p13617_p1 }
  0xb1   : > { %13625 = shalt.err (!%p13622_p4)
}
  0xb2   : > { %s13626_s12 = scalar_lea.vmem %s338_s1, 512  ;;  %p13634_p3 = scmp.lt.s32.totalorder %s338_s1, %s338_s1 }
  0xb3   : > { %p13627_p6 = scmp.ne.s32.totalorder %s338_s1, %s13626_s12  ;;  %p13635_p13 = scmp.lt.s32.totalorder %s13626_s12, %s13626_s12 }
  0xb5   : > { %p13629_p10 = pnand %p13627_p6, %p13943_p7  ;;  %p13636_p0 = por %p13635_p13, %p13634_p3 }
  0xb7   : > { %p13630_p12 = pneg %p13629_p10 }
  0xb9   : > { %p13637_p11 = pnand %p13636_p0, %p13630_p12 }
  0xbb   : > { %13640 = shalt.err (!%p13637_p11)
}
  0xbc   : > { %p16789_p5 = scmp.ne.s32.totalorder %s16779_s27, 0  ;;  %s16790_s4 = smov 8  }
  0xbd   : > { %s16791_s6 = smov 128   ;;  %s13641_s17 = scalar_lea.hbm %s16749_s5, 512 }
  0xbe   : > { %13381 = dma.hbm_to_vmem [thread:$0]  (!%p16789_p5), %s16747_s3, 512, %s338_s1, [#allocation5], %s16791_s6, %s16791_s6, %s16790_s4  }
  0xbf   : > { %p13642_p8 = scmp.ne.s32.totalorder %s16749_s5, %s13641_s17  ;;  %p13648_p2 = scmp.lt.u32.totalorder %s13641_s17, %s16749_s5 }
  0xc1   : > { %p13644_p11 = pnand %p13642_p8, %p13943_p7 }
  0xc3   : > { %p13645_p1 = pneg %p13644_p11 }
  0xc5   : > { %p13650_p4 = pnand %p13648_p2, %p13645_p1 }
  0xc7   : > { %13653 = shalt.err (!%p13650_p4)
}
  0xc8   : > { %s13654_s1 = scalar_lea.vmem %s14098_s2, 512  ;;  %p13662_p3 = scmp.lt.s32.totalorder %s14098_s2, %s14098_s2 }
  0xc9   : > { %p13655_p6 = scmp.ne.s32.totalorder %s14098_s2, %s13654_s1  ;;  %p13663_p13 = scmp.lt.s32.totalorder %s13654_s1, %s13654_s1 }
  0xcb   : > { %p13657_p10 = pnand %p13655_p6, %p13943_p7  ;;  %p13664_p0 = por %p13663_p13, %p13662_p3 }
  0xcd   : > { %p13658_p12 = pneg %p13657_p10 }
  0xcf   : > { %p13665_p8 = pnand %p13664_p0, %p13658_p12 }
  0xd1   : > { %13668 = shalt.err (!%p13665_p8)
}
  0xd2   : > { %13387 = dma.hbm_to_vmem [thread:$0]  (!%p16789_p5), %s16749_s5, 512, %s14098_s2, [#allocation8], %s16791_s6, %s16791_s6, %s16790_s4  }
  0xd3   : > { %s13823_s9 = smov [#allocation12]   ;;  %s13824_s30 = smov [#allocation13]  }
  0xd4   : > { %s385_s21 = sshll.u32 %s13823_s9, 4  ;;  %s399_s0 = sshll.u32 %s13824_s30, 4  ;;  %s386_s21 = int_to_ptr.vmem [resolvable:$true] %s385_s21  ;;  %s14147_s0 = int_to_ptr.vmem [resolvable:$true] %s399_s0 }
  0xd5   : > { %s13669_s26 = scalar_lea.hbm %s16751_s7, 512 }
  0xd6   : > { %p13670_p11 = scmp.ne.s32.totalorder %s16751_s7, %s13669_s26  ;;  %p13676_p4 = scmp.lt.u32.totalorder %s13669_s26, %s16751_s7 }
  0xd8   : > { %p13672_p1 = pnand %p13670_p11, %p13943_p7 }
  0xda   : > { %p13673_p2 = pneg %p13672_p1 }
  0xdc   : > { %p13678_p6 = pnand %p13676_p4, %p13673_p2 }
  0xde   : > { %13681 = shalt.err (!%p13678_p6)
}
  0xdf   : > { %s13682_s13 = scalar_lea.vmem %s386_s21, 512  ;;  %p13690_p13 = scmp.lt.s32.totalorder %s386_s21, %s386_s21 }
  0xe0   : > { %p13683_p10 = scmp.ne.s32.totalorder %s386_s21, %s13682_s13  ;;  %p13691_p0 = scmp.lt.s32.totalorder %s13682_s13, %s13682_s13 }
  0xe2   : > { %p13685_p12 = pnand %p13683_p10, %p13943_p7  ;;  %p13692_p8 = por %p13691_p0, %p13690_p13 }
  0xe4   : > { %p13686_p3 = pneg %p13685_p12 }
  0xe6   : > { %p13693_p9 = pnand %p13692_p8, %p13686_p3 }
  0xe8   : > { %13696 = shalt.err (!%p13693_p9)
}
  0xe9   : > { %13393 = dma.hbm_to_vmem [thread:$0]  (!%p16789_p5), %s16751_s7, 512, %s386_s21, [#allocation11], %s16791_s6, %s16791_s6, %s16790_s4  }
  0xea   : > { %s13697_s11 = scalar_lea.hbm %s16752_s8, 16 }
  0xeb   : > { %p13698_p11 = scmp.ne.s32.totalorder %s16752_s8, %s13697_s11  ;;  %p13704_p2 = scmp.lt.u32.totalorder %s13697_s11, %s16752_s8 }
  0xed   : > { %p13700_p9 = pnand %p13698_p11, %p13943_p7 }
  0xef   : > { %p13701_p1 = pneg %p13700_p9 }
  0xf1   : > { %p13706_p4 = pnand %p13704_p2, %p13701_p1 }
  0xf3   : > { %13709 = shalt.err (!%p13706_p4)
}
  0xf4   : > { %s13710_s4 = scalar_lea.vmem %s14147_s0, 16  ;;  %s13717_s6 = scalar_lea.vmem %s14147_s0, 32 }
  0xf5   : > { %p13711_p6 = scmp.ne.s32.totalorder %s14147_s0, %s13710_s4  ;;  %p13718_p3 = scmp.lt.s32.totalorder %s14147_s0, %s14147_s0 }
  0xf6   : > { %p13719_p13 = scmp.lt.s32.totalorder %s13717_s6, %s13710_s4 }
  0xf7   : > { %p13713_p10 = pnand %p13711_p6, %p13943_p7 }
  0xf8   : > { %p13720_p0 = por %p13719_p13, %p13718_p3 }
  0xf9   : > { %p13714_p12 = pneg %p13713_p10 }
  0xfb   : > { %p13721_p8 = pnand %p13720_p0, %p13714_p12 }
  0xfd   : > { %13724 = shalt.err (!%p13721_p8)
}
  0xfe   : > { %13396 = dma.hbm_to_vmem [thread:$0]  (!%p16789_p5), %s16752_s8, 16, %s14147_s0, [#allocation14]  }
  0xff   : > { %s16792_s16 = sand.u32 1, %s13805_s19   ;;  %s13256_s12 = sshll.u32 %s13809_s20, 12 }
 0x100   : > { %s12594_s13 = sshll.u32 %s16792_s16, 8  ;;  %s14200_s17 = scalar_lea.hbm %s16754_s10, %s13256_s12 }
 0x101   : > { %s435_s27 = scalar_lea.vmem [#allocation16], %s12594_s13  ;;  %s13725_s26 = scalar_lea.hbm %s14200_s17, 4096 }
 0x102   : > { %s443_s11 = sshll.u32 %s435_s27, 4  ;;  %p13726_p7 = scmp.ne.s32.totalorder %s14200_s17, %s13725_s26  ;;  %s444_s11 = int_to_ptr.vmem [resolvable:$true] %s443_s11 }
 0x103   : > { %p16793_p11 = scmp.ne.s32.totalorder %s16788_s25, 0  ;;  %s13730_s29 = scalar_lea.hbm %s16754_s10, 8192 }
 0x104   : > { %p13731_p2 = scmp.lt.u32.totalorder %s14200_s17, %s16754_s10  ;;  %p13732_p4 = scmp.lt.u32.totalorder %s13730_s29, %s13725_s26 }
 0x105   : > { %p16794_p9 = pneg %p16793_p11  ;;  %p13734_p10 = scmp.lt.u32.totalorder %s13725_s26, %s14200_s17 }
 0x106   : > { %p13733_p6 = por %p13732_p4, %p13731_p2 }
 0x107   : > { %p13728_p5 = pnand %p13726_p7, %p16794_p9 }
 0x108   : > { %p13735_p12 = por %p13734_p10, %p13733_p6 }
 0x109   : > { %p13729_p1 = pneg %p13728_p5 }
 0x10b   : > { %p13736_p3 = pnand %p13735_p12, %p13729_p1 }
 0x10d   : > { %13739 = shalt.err (!%p13736_p3)
}
 0x10e   : > { %s13740_s4 = scalar_lea.vmem %s444_s11, 4096  ;;  %p16795_p0 = pmov %p16794_p9 }
 0x10f   : > { %p13741_p13 = scmp.ne.s32.totalorder %s444_s11, %s13740_s4  ;;  %s13825_s6 = smov [#allocation16]  }
 0x110   : > { %s13745_s21 = sshll.u32 %s13825_s6, 4  ;;  %s13746_s21 = int_to_ptr.vmem [resolvable:$false] %s13745_s21 }
 0x111   : > { %p13743_p8 = pnand %p13741_p13, %p16795_p0  ;;  %s13747_s2 = scalar_lea.vmem %s13746_s21, 8192 }
 0x112   : > { %p13748_p9 = scmp.lt.s32.totalorder %s444_s11, %s13746_s21  ;;  %p13749_p5 = scmp.lt.s32.totalorder %s13747_s2, %s13740_s4 }
 0x113   : > { %p13744_p7 = pneg %p13743_p8 }
 0x114   : > { %p13750_p2 = por %p13749_p5, %p13748_p9 }
 0x116   : > { %p13751_p4 = pnand %p13750_p2, %p13744_p7 }
 0x118   : > { %13754 = shalt.err (!%p13751_p4)
}
 0x119   : > { %13403 = dma.hbm_to_vmem [thread:$0]  (!%p16793_p11), %s14200_s17, 4096, %s444_s11, %s14070_s14  }
 0x11a   : > { %s16796_s16 = sld [smem:[#allocation23_spill]] }
 0x120   : > { %p16797_p1 = scmp.ne.s32.totalorder %s16796_s16, 0 }
 0x121   : > { %p16798_p6 = scmp.eq.s32.totalorder (!%p16797_p1), %s13912_s23, 0 }
 0x122   : > { %452 = sbr.rel (%p16797_p1) target bundleno = 1918 (0x77e), region = 64 }
 0x129   : > { %13772 = dma.done.wait (%p16798_p6), [#allocation3], 256   ;;  %p16799_p10 = pmov %p16798_p6 }
 0x12a   : > { %p16800_p12 = pmov %p16798_p6 }
 0x12b   : > { %13774 = vsyncadd (%p16799_p10), [#allocation3], 4294967040 }
 0x12c   : > { %13776 = dma.done.wait (%p16800_p12), [#allocation5], 528   ;;  %p16801_p3 = pmov %p16798_p6 }
 0x12e   : > { %13778 = vsyncadd (%p16801_p3), [#allocation5], 4294966768  ;;  %p16802_p13 = pmov %p16801_p3 }
 0x12f   : > { %p16803_p11 = pmov %p16801_p3 }
 0x130   : > { %13780 = dma.done.wait (%p16802_p13), [#allocation8], 528  }
 0x131   : > { %13782 = vsyncadd (%p16803_p11), [#allocation8], 4294966768  ;;  %p16804_p0 = pmov %p16801_p3 }
 0x133   : > { %13784 = dma.done.wait (%p16804_p0), [#allocation11], 528   ;;  %p16805_p8 = pmov %p16804_p0 }
 0x134   : > { %p16806_p7 = pmov %p16804_p0 }
 0x135   : > { %13786 = vsyncadd (%p16805_p8), [#allocation11], 4294966768 }
 0x136   : > { %13788 = dma.done.wait (%p16806_p7), [#allocation14], 16   ;;  %p16807_p9 = pmov %p16804_p0 }
 0x137   : > { %s486_s14 = sand.u32 1, %s13912_s23   ;;  %s488_s25 = sand.u32 1, %s13801_s18  }
 0x138   : > { %13790 = vsyncadd (%p16807_p9), [#allocation14], 4294967280  ;;  %s12606_s13 = sshll.u32 %s488_s25, 12  ;;  %s487_s12 = scalar_lea.sflag [#allocation3], %s486_s14 }
 0x139   : > { %s14248_s9 = scalar_lea.vmem [#allocation15], %s12606_s13  ;;  %p16808_p5 = scmp.ne.s32.totalorder %s16786_s22, 0 }
 0x13b   : > { %13792 = dma.done.wait (%p16808_p5), %s487_s12, 69632  }
 0x13c   : > { %13794 = vsyncadd (%p16808_p5), %s487_s12, 4294897664  ;;  %v13826_v0 = vmov 0.0|0.0   ;;  %vm13827_vm0 = vmmov 0   ;;  %v13828_v1 = vmov 0.0   ;;  %v551_v2 = vld [vmem:[#allocation2] sm:$0xff]  ;;  %v552_v3 = vld [vmem:[#allocation2 + $0x8] sm:$0xff] }
 0x13d   : > { %13315 = vmatprep.subr.bf16.mxu0 %v13826_v0  ;;  %13279 = vmatprep.mubr.msk.f32.mxu0 %vm13827_vm0, %v13828_v1  ;;  %v13316_v4 = vpack.c.bf16 %v552_v3, %v551_v2  ;;  %v629_v5 = vld [vmem:[#allocation6] sm:$0xff]  ;;  %v630_v6 = vld [vmem:[#allocation6 + $0x8] sm:$0xff]  ;;  %s16809_s22 = sld [smem:[#allocation24_spill]]  ;;  %vm554_vm1 = vcmask 130048   ;;  %v631_v9 = vld [vmem:[#allocation6 + $0x10] sm:$0xff]  ;;  %vm634_vm2 = vcmask 261120  }
 0x13e   : > { %13318 = vmatprep.subr.bf16.mxu1 %v13826_v0  ;;  %13290 = vmatprep.mubr.msk.f32.mxu1 %vm13827_vm0, %v13828_v1  ;;  %v13319_v7 = vpack.c.bf16 %v630_v6, %v629_v5  ;;  %v632_v10 = vld [vmem:[#allocation6 + $0x18] sm:$0xff]  ;;  %v709_v12 = vld [vmem:[#allocation9] sm:$0xff]  ;;  %v710_v13 = vld [vmem:[#allocation9 + $0x8] sm:$0xff]  ;;  %v13829_v61 = vmov 0   ;;  %s12607_s27 = sshll.u32 %s488_s25, 8  ;;  %s12608_s26 = sshll.u32 %s13912_s23, 8 }
 0x13f   : > { %13317 = vmatpush3.bf16.msra.mxu0 %v13316_v4  ;;  %v13322_v11 = vpack.c.bf16 %v632_v10, %v631_v9  ;;  %v13325_v14 = vpack.c.bf16 %v710_v13, %v709_v12  ;;  %v553_v15 = vld [vmem:[#allocation4] sm:$0x1]  ;;  %v711_v20 = vld [vmem:[#allocation9 + $0x10] sm:$0xff]  ;;  %v788_v23 = vld [vmem:[#allocation12] sm:$0xff]  ;;  %s14658_s11 = scalar_lea.vmem [#allocation16], %s12607_s27  ;;  %p14778_p2 = scmp.lt.s32.totalorder %s12608_s26, 511 }
 0x140   : > { %13320 = vmatpush3.bf16.msra.mxu1 %v13319_v7  ;;  %13324 = vmatprep.subr.bf16.mxu0 %v13826_v0  ;;  %v712_v21 = vld [vmem:[#allocation9 + $0x18] sm:$0xff]  ;;  %v789_v24 = vld [vmem:[#allocation12 + $0x8] sm:$0xff]  ;;  %v713_v42 = vld [vmem:[#allocation10] sm:$0x1]  ;;  %s16811_s29 = sld [smem:[#allocation30_spill]] }
 0x141   : > { %13321 = vmatprep.subr.bf16.mxu1 %v13826_v0  ;;  %v13328_v22 = vpack.c.bf16 %v712_v21, %v711_v20  ;;  %v13331_v25 = vpack.c.bf16 %v789_v24, %v788_v23  ;;  %v633_v26 = vld [vmem:[#allocation7] sm:$0x1]  ;;  %v790_v31 = vld [vmem:[#allocation12 + $0x10] sm:$0xff]  ;;  %v867_v34 = vld [vmem:[%s14248_s9] sm:$0xff]  ;;  %s16817_s26 = smov (!%p14778_p2, %s12608_s26), 511 }
 0x142   : > { %v791_v32 = vld [vmem:[#allocation12 + $0x18] sm:$0xff]  ;;  %v995_v35 = vld [vmem:[%s14248_s9 + $0x400] sm:$0xff]  ;;  %v868_v36 = vld [vmem:[%s14248_s9 + $0x8] sm:$0xff] }
 0x143   : > { %v550_v8 = vld [vmem:[%s16809_s22] sm:$0x1]  ;;  %v13334_v33 = vpack.c.bf16 %v791_v32, %v790_v31  ;;  %v12613_v37 = vcombine.low %v867_v34, %v995_v35  ;;  %v12614_v38 = vcombine.high %v867_v34, %v995_v35  ;;  %v1123_v47 = vld [vmem:[%s14248_s9 + $0x800] sm:$0xff]  ;;  %v869_v55 = vld [vmem:[%s14248_s9 + $0x10] sm:$0xff] }
 0x144   : > { %13280 = vmatmul.mubr.msk.f32.vlgmr.msra.gmra.mrb[0].mxu0 %vm554_vm1, %v550_v8  ;;  %13323 = vmatpush3.bf16.msra.mxu1 %v13322_v11  ;;  %v996_v39 = vld [vmem:[%s14248_s9 + $0x408] sm:$0xff]  ;;  %v1251_v48 = vld [vmem:[%s14248_s9 + $0xc00] sm:$0xff]  ;;  %v997_v56 = vld [vmem:[%s14248_s9 + $0x410] sm:$0xff] }
 0x145   : > { %13301 = vmatprep.mubr.msk.f32.mxu0 %vm13827_vm0, %v13828_v1  ;;  %13330 = vmatprep.subr.bf16.mxu1 %v13826_v0  ;;  %v12615_v40 = vcombine.low %v868_v36, %v996_v39  ;;  %v12616_v41 = vcombine.high %v868_v36, %v996_v39  ;;  %v1124_v49 = vld [vmem:[%s14248_s9 + $0x808] sm:$0xff]  ;;  %v12870_v50 = vcombine.high %v1123_v47, %v1251_v48  ;;  %v870_v57 = vld [vmem:[%s14248_s9 + $0x18] sm:$0xff]  ;;  %v1253_v3 = vld [vmem:[%s14248_s9 + $0xc10] sm:$0xff] }
 0x146   : > { %13326 = vmatpush3.bf16.msra.mxu0 %v13325_v14  ;;  %v1252_v51 = vld [vmem:[%s14248_s9 + $0xc08] sm:$0xff]  ;;  %v12869_v52 = vcombine.low %v1123_v47, %v1251_v48  ;;  %v12617_v58 = vcombine.low %v869_v55, %v997_v56  ;;  %v12618_v59 = vcombine.high %v869_v55, %v997_v56  ;;  %v998_v60 = vld [vmem:[%s14248_s9 + $0x418] sm:$0xff]  ;;  %v871_v11 = vld [vmem:[%s14248_s9 + $0x20] sm:$0xff]  ;;  %s14847_s24 = scalar_lea.vmem %s16811_s29, %s16817_s26 }
 0x147   : > { %13327 = vmatprep.subr.bf16.mxu0 %v13826_v0  ;;  %v12871_v53 = vcombine.low %v1124_v49, %v1252_v51  ;;  %v12872_v54 = vcombine.high %v1124_v49, %v1252_v51  ;;  %v12619_v62 = vcombine.low %v870_v57, %v998_v60  ;;  %v12620_v63 = vcombine.high %v870_v57, %v998_v60  ;;  %v1126_v4 = vld [vmem:[%s14248_s9 + $0x818] sm:$0xff]  ;;  %v999_v12 = vld [vmem:[%s14248_s9 + $0x420] sm:$0xff]  ;;  %v872_v13 = vld [vmem:[%s14248_s9 + $0x28] sm:$0xff] }
 0x148   : > { %v1254_v5 = vld [vmem:[%s14248_s9 + $0xc18] sm:$0xff]  ;;  %v1000_v14 = vld [vmem:[%s14248_s9 + $0x428] sm:$0xff]  ;;  %v1255_v20 = vld [vmem:[%s14248_s9 + $0xc20] sm:$0xff]  ;;  %v12621_v23 = vcombine.low %v871_v11, %v999_v12 }
 0x149   : > { %v12876_v10 = vcombine.high %v1126_v4, %v1254_v5  ;;  %v1128_v21 = vld [vmem:[%s14248_s9 + $0x828] sm:$0xff]  ;;  %v12623_v24 = vcombine.low %v872_v13, %v1000_v14  ;;  %v1129_v35 = vld [vmem:[%s14248_s9 + $0x830] sm:$0xff]  ;;  %v1131_v51 = vld [vmem:[%s14248_s9 + $0x840] sm:$0xff] }
 0x14a   : > { %13329 = vmatpush3.bf16.msra.mxu0 %v13328_v22  ;;  %v1256_v22 = vld [vmem:[%s14248_s9 + $0xc28] sm:$0xff]  ;;  %v1257_v36 = vld [vmem:[%s14248_s9 + $0xc30] sm:$0xff] }
 0x14b   : > { %5286 = vmatprep.subr.bf16.mxu0 %v12614_v38  ;;  %v12879_v32 = vcombine.low %v1128_v21, %v1256_v22  ;;  %v1258_v38 = vld [vmem:[%s14248_s9 + $0xc38] sm:$0xff]  ;;  %v12881_v47 = vcombine.low %v1129_v35, %v1257_v36  ;;  %v1005_v60 = vld [vmem:[%s14248_s9 + $0x450] sm:$0xff] }
 0x217   : > { %v624_v16 = vpop.f32.mrb[0].mxu0 }
 0x218   : > { %v625_v17 = vadd.f32 %v624_v16, %v553_v15  ;;  %v13281_v18 = vpop.f32.mrb[1].mxu0  ;;  %v12875_v16 = vcombine.low %v1126_v4, %v1254_v5  ;;  %v1133_v4 = vld [vmem:[%s14248_s9 + $0x850] sm:$0xff] }
 0x219   : > { %v12624_v18 = vcombine.high %v872_v13, %v1000_v14  ;;  %v1261_v5 = vld [vmem:[%s14248_s9 + $0xc50] sm:$0xff]  ;;  %v879_v13 = vld [vmem:[%s14248_s9 + $0x60] sm:$0xff] }
 0x21a   : > { %v628_v19 = vmax.f32 %v625_v17, 0.0  ;;  %v12622_v17 = vcombine.high %v871_v11, %v999_v12  ;;  %v12890_v11 = vcombine.high %v1133_v4, %v1261_v5  ;;  %v1007_v14 = vld [vmem:[%s14248_s9 + $0x460] sm:$0xff] }
 0x21c   : > { %13291 = vmatmul.mubr.msk.f32.vlgmr.msra.gmra.mrb[0].mxu1 %vm634_vm2, %v628_v19  ;;  %v1127_v19 = vld [vmem:[%s14248_s9 + $0x820] sm:$0xff] }
 0x21d   : > { %13312 = vmatprep.mubr.msk.f32.mxu1 %vm13827_vm0, %v13828_v1  ;;  %13332 = vmatpush3.bf16.msra.mxu1 %v13331_v25  ;;  %v1125_v1 = vld [vmem:[%s14248_s9 + $0x810] sm:$0xff]  ;;  %v12878_v25 = vcombine.high %v1127_v19, %v1255_v20  ;;  %v12877_v31 = vcombine.low %v1127_v19, %v1255_v20  ;;  %v12638_v19 = vcombine.high %v879_v13, %v1007_v14 }
 0x21e   : > { %13333 = vmatprep.subr.bf16.mxu1 %v13826_v0  ;;  %v792_v0 = vld [vmem:[#allocation13] sm:$0x1]  ;;  %v12874_v9 = vcombine.high %v1125_v1, %v1253_v3  ;;  %v12873_v15 = vcombine.low %v1125_v1, %v1253_v3 }
 0x221   : > { %13335 = vmatpush3.bf16.msra.mxu1 %v13334_v33 }
 0x222   : > { %5327 = vmatprep.subr.bf16.mxu1 %v12616_v41  ;;  %v12882_v41 = vcombine.high %v1129_v35, %v1257_v36 }
 0x2ef   : > { %v704_v27 = vpop.f32.mrb[0].mxu1 }
 0x2f0   : > { %v705_v28 = vadd.f32 %v704_v27, %v633_v26  ;;  %v13292_v29 = vpop.f32.mrb[1].mxu1  ;;  %v12880_v26 = vcombine.high %v1128_v21, %v1256_v22  ;;  %v873_v27 = vld [vmem:[%s14248_s9 + $0x30] sm:$0xff]  ;;  %v1135_v21 = vld [vmem:[%s14248_s9 + $0x860] sm:$0xff] }
 0x2f1   : > { %v874_v29 = vld [vmem:[%s14248_s9 + $0x38] sm:$0xff]  ;;  %v1263_v22 = vld [vmem:[%s14248_s9 + $0xc60] sm:$0xff] }
 0x2f2   : > { %v708_v30 = vmax.f32 %v705_v28, 0.0  ;;  %v1001_v28 = vld [vmem:[%s14248_s9 + $0x430] sm:$0xff] }
 0x2f3   : > { %v12626_v33 = vcombine.high %v873_v27, %v1001_v28  ;;  %v12625_v39 = vcombine.low %v873_v27, %v1001_v28  ;;  %v12894_v27 = vcombine.high %v1135_v21, %v1263_v22 }
 0x2f4   : > { %13302 = vmatmul.mubr.msk.f32.vlgmr.msra.gmra.mrb[2].mxu0 %vm634_vm2, %v708_v30  ;;  %v1002_v30 = vld [vmem:[%s14248_s9 + $0x438] sm:$0xff] }
 0x2f5   : > { %5287 = vmatpush1.bf16.msra.mxu0 %v12613_v37  ;;  %5318 = vmatprep.mubr.bf16.mxu0 %v13829_v61  ;;  %v12628_v34 = vcombine.high %v874_v29, %v1002_v30  ;;  %v1130_v37 = vld [vmem:[%s14248_s9 + $0x838] sm:$0xff] }
 0x2f6   : > { %5288 = vmatprep.subr.bf16.mxu0 %v12870_v50  ;;  %v12883_v48 = vcombine.low %v1130_v37, %v1258_v38 }
 0x2f9   : > { %5289 = vmatpush1.bf16.msra.mxu0 %v12869_v52  ;;  %v1259_v52 = vld [vmem:[%s14248_s9 + $0xc40] sm:$0xff] }
 0x2fa   : > { %5368 = vmatprep.subr.bf16.mxu0 %v12618_v59  ;;  %v12886_v57 = vcombine.high %v1131_v51, %v1259_v52  ;;  %v877_v59 = vld [vmem:[%s14248_s9 + $0x50] sm:$0xff] }
 0x3c7   : > { %v783_v43 = vpop.f32.mrb[2].mxu0 }
 0x3c8   : > { %v784_v44 = vadd.f32 %v783_v43, %v713_v42  ;;  %v13303_v45 = vpop.f32.mrb[3].mxu0  ;;  %v12884_v42 = vcombine.high %v1130_v37, %v1258_v38  ;;  %v875_v43 = vld [vmem:[%s14248_s9 + $0x40] sm:$0xff]  ;;  %v1137_v37 = vld [vmem:[%s14248_s9 + $0x870] sm:$0xff] }
 0x3c9   : > { %v876_v45 = vld [vmem:[%s14248_s9 + $0x48] sm:$0xff]  ;;  %v1265_v38 = vld [vmem:[%s14248_s9 + $0xc70] sm:$0xff] }
 0x3ca   : > { %v787_v46 = vmax.f32 %v784_v44, 0.0  ;;  %v1003_v44 = vld [vmem:[%s14248_s9 + $0x440] sm:$0xff] }
 0x3cb   : > { %v12630_v49 = vcombine.high %v875_v43, %v1003_v44  ;;  %v12629_v55 = vcombine.low %v875_v43, %v1003_v44  ;;  %v12898_v43 = vcombine.high %v1137_v37, %v1265_v38 }
 0x3cc   : > { %13313 = vmatmul.mubr.msk.f32.vlgmr.msra.gmra.mrb[2].mxu1 %vm634_vm2, %v787_v46  ;;  %v1004_v46 = vld [vmem:[%s14248_s9 + $0x448] sm:$0xff] }
 0x3cd   : > { %5328 = vmatpush1.bf16.msra.mxu1 %v12615_v40  ;;  %5359 = vmatprep.mubr.bf16.mxu1 %v13829_v61  ;;  %v12627_v40 = vcombine.low %v874_v29, %v1002_v30  ;;  %v12632_v50 = vcombine.high %v876_v45, %v1004_v46  ;;  %v12631_v56 = vcombine.low %v876_v45, %v1004_v46  ;;  %v881_v29 = vld [vmem:[%s14248_s9 + $0x70] sm:$0xff]  ;;  %v883_v45 = vld [vmem:[%s14248_s9 + $0x80] sm:$0xff] }
 0x3ce   : > { %5329 = vmatprep.subr.bf16.mxu1 %v12872_v54  ;;  %v1260_v54 = vld [vmem:[%s14248_s9 + $0xc48] sm:$0xff]  ;;  %v1009_v30 = vld [vmem:[%s14248_s9 + $0x470] sm:$0xff]  ;;  %v1011_v46 = vld [vmem:[%s14248_s9 + $0x480] sm:$0xff] }
 0x3cf   : > { %v12642_v35 = vcombine.high %v881_v29, %v1009_v30 }
 0x3d1   : > { %5330 = vmatpush1.bf16.msra.mxu1 %v12871_v53  ;;  %v1132_v53 = vld [vmem:[%s14248_s9 + $0x848] sm:$0xff] }
 0x3d2   : > { %5409 = vmatprep.subr.bf16.mxu1 %v12620_v63  ;;  %v1006_v63 = vld [vmem:[%s14248_s9 + $0x458] sm:$0xff]  ;;  %v12887_v1 = vcombine.low %v1132_v53, %v1260_v54 }
 0x49f   : > { %v862_v2 = vpop.f32.mrb[2].mxu1 }
 0x4a0   : > { %v863_v6 = vadd.f32 %v862_v2, %v792_v0  ;;  %v13314_v7 = vpop.f32.mrb[3].mxu1  ;;  %v12885_v0 = vcombine.low %v1131_v51, %v1259_v52  ;;  %v12634_v2 = vcombine.high %v877_v59, %v1005_v60  ;;  %v12646_v51 = vcombine.high %v883_v45, %v1011_v46 }
 0x4a1   : > { %v1262_v7 = vld [vmem:[%s14248_s9 + $0xc58] sm:$0xff] }
 0x4a2   : > { %v14282_v8 = vpack.c.bf16 %v863_v6, %v863_v6  ;;  %v1134_v6 = vld [vmem:[%s14248_s9 + $0x858] sm:$0xff] }
 0x4a3   : > { %v12892_v12 = vcombine.high %v1134_v6, %v1262_v7 }
 0x4a4   : > { %13125 = vmatmul.mubr.msk.bf16.vlgmr.msra.gmra.mrb[4].mxu0 %vm634_vm2, %v14282_v8  ;;  %13126 = vmatmul.mubr.msk.bf16.vlgmr.msra.gmra.mrb[4].mxu1 %vm634_vm2, %v14282_v8 }
 0x4a5   : > { %5369 = vmatpush1.bf16.msra.mxu0 %v12617_v58  ;;  %5410 = vmatpush1.bf16.msra.mxu1 %v12619_v62  ;;  %v12888_v58 = vcombine.high %v1132_v53, %v1260_v54  ;;  %v878_v62 = vld [vmem:[%s14248_s9 + $0x58] sm:$0xff]  ;;  %v1139_v53 = vld [vmem:[%s14248_s9 + $0x880] sm:$0xff] }
 0x4a6   : > { %5370 = vmatprep.subr.bf16.mxu0 %v12874_v9  ;;  %5411 = vmatprep.subr.bf16.mxu1 %v12876_v10  ;;  %v12636_v3 = vcombine.high %v878_v62, %v1006_v63  ;;  %v12633_v9 = vcombine.low %v877_v59, %v1005_v60  ;;  %v12635_v10 = vcombine.low %v878_v62, %v1006_v63  ;;  %v1267_v54 = vld [vmem:[%s14248_s9 + $0xc80] sm:$0xff]  ;;  %v885_v62 = vld [vmem:[%s14248_s9 + $0x90] sm:$0xff] }
 0x4a7   : > { %5400 = vmatprep.mubr.bf16.mxu0 %v13829_v61  ;;  %5441 = vmatprep.mubr.bf16.mxu1 %v13829_v61  ;;  %v12902_v59 = vcombine.high %v1139_v53, %v1267_v54  ;;  %v1013_v63 = vld [vmem:[%s14248_s9 + $0x490] sm:$0xff] }
 0x4a9   : > { %5371 = vmatpush1.bf16.msra.mxu0 %v12873_v15  ;;  %5412 = vmatpush1.bf16.msra.mxu1 %v12875_v16  ;;  %v880_v15 = vld [vmem:[%s14248_s9 + $0x68] sm:$0xff] }
 0x4aa   : > { %5450 = vmatprep.subr.bf16.mxu0 %v12622_v17  ;;  %5491 = vmatprep.subr.bf16.mxu1 %v12624_v18  ;;  %v1008_v16 = vld [vmem:[%s14248_s9 + $0x468] sm:$0xff]  ;;  %v12889_v17 = vcombine.low %v1133_v4, %v1261_v5  ;;  %v12891_v18 = vcombine.low %v1134_v6, %v1262_v7  ;;  %v12650_v4 = vcombine.high %v885_v62, %v1013_v63  ;;  %v1141_v6 = vld [vmem:[%s14248_s9 + $0x890] sm:$0xff] }
 0x4ab   : > { %v12640_v20 = vcombine.high %v880_v15, %v1008_v16  ;;  %v1269_v7 = vld [vmem:[%s14248_s9 + $0xc90] sm:$0xff] }
 0x4ac   : > { %13127 = vmatmul.mubr.msk.bf16.vlgmr.msra.gmra.mrb[8].mxu0 %vm634_vm2, %v14282_v8  ;;  %13128 = vmatmul.mubr.msk.bf16.vlgmr.msra.gmra.mrb[8].mxu1 %vm634_vm2, %v14282_v8 }
 0x4ad   : > { %5451 = vmatpush1.bf16.msra.mxu0 %v12621_v23  ;;  %5492 = vmatpush1.bf16.msra.mxu1 %v12623_v24  ;;  %v1136_v23 = vld [vmem:[%s14248_s9 + $0x868] sm:$0xff] }
 0x4ae   : > { %5452 = vmatprep.subr.bf16.mxu0 %v12878_v25  ;;  %5493 = vmatprep.subr.bf16.mxu1 %v12880_v26  ;;  %v1264_v24 = vld [vmem:[%s14248_s9 + $0xc68] sm:$0xff]  ;;  %v12637_v25 = vcombine.low %v879_v13, %v1007_v14  ;;  %v12639_v26 = vcombine.low %v880_v15, %v1008_v16  ;;  %v12906_v13 = vcombine.high %v1141_v6, %v1269_v7  ;;  %v887_v15 = vld [vmem:[%s14248_s9 + $0xa0] sm:$0xff] }
 0x4af   : > { %5482 = vmatprep.mubr.bf16.mxu0 %v13829_v61  ;;  %5523 = vmatprep.mubr.bf16.mxu1 %v13829_v61  ;;  %v12896_v28 = vcombine.high %v1136_v23, %v1264_v24  ;;  %v1015_v16 = vld [vmem:[%s14248_s9 + $0x4a0] sm:$0xff] }
 0x4b1   : > { %5453 = vmatpush1.bf16.msra.mxu0 %v12877_v31  ;;  %5494 = vmatpush1.bf16.msra.mxu1 %v12879_v32  ;;  %v882_v31 = vld [vmem:[%s14248_s9 + $0x78] sm:$0xff] }
 0x4b2   : > { %5532 = vmatprep.subr.bf16.mxu0 %v12626_v33  ;;  %5573 = vmatprep.subr.bf16.mxu1 %v12628_v34  ;;  %v1010_v32 = vld [vmem:[%s14248_s9 + $0x478] sm:$0xff]  ;;  %v12893_v33 = vcombine.low %v1135_v21, %v1263_v22  ;;  %v12895_v34 = vcombine.low %v1136_v23, %v1264_v24  ;;  %v12654_v21 = vcombine.high %v887_v15, %v1015_v16  ;;  %v1143_v23 = vld [vmem:[%s14248_s9 + $0x8a0] sm:$0xff] }
 0x4b3   : > { %v12644_v36 = vcombine.high %v882_v31, %v1010_v32  ;;  %v1271_v24 = vld [vmem:[%s14248_s9 + $0xca0] sm:$0xff] }
 0x4b4   : > { %13129 = vmatmul.mubr.msk.bf16.vlgmr.msra.gmra.mrb[12].mxu0 %vm634_vm2, %v14282_v8  ;;  %13130 = vmatmul.mubr.msk.bf16.vlgmr.msra.gmra.mrb[12].mxu1 %vm634_vm2, %v14282_v8 }
 0x4b5   : > { %5533 = vmatpush1.bf16.msra.mxu0 %v12625_v39  ;;  %5574 = vmatpush1.bf16.msra.mxu1 %v12627_v40  ;;  %v1138_v39 = vld [vmem:[%s14248_s9 + $0x878] sm:$0xff] }
 0x4b6   : > { %5534 = vmatprep.subr.bf16.mxu0 %v12882_v41  ;;  %5575 = vmatprep.subr.bf16.mxu1 %v12884_v42  ;;  %v1266_v40 = vld [vmem:[%s14248_s9 + $0xc78] sm:$0xff]  ;;  %v12641_v41 = vcombine.low %v881_v29, %v1009_v30  ;;  %v12643_v42 = vcombine.low %v882_v31, %v1010_v32  ;;  %v12910_v29 = vcombine.high %v1143_v23, %v1271_v24  ;;  %v889_v31 = vld [vmem:[%s14248_s9 + $0xb0] sm:$0xff] }
 0x4b7   : > { %5564 = vmatprep.mubr.bf16.mxu0 %v13829_v61  ;;  %5605 = vmatprep.mubr.bf16.mxu1 %v13829_v61  ;;  %v12900_v44 = vcombine.high %v1138_v39, %v1266_v40  ;;  %v1017_v32 = vld [vmem:[%s14248_s9 + $0x4b0] sm:$0xff] }
 0x4b9   : > { %5535 = vmatpush1.bf16.msra.mxu0 %v12881_v47  ;;  %5576 = vmatpush1.bf16.msra.mxu1 %v12883_v48  ;;  %v884_v47 = vld [vmem:[%s14248_s9 + $0x88] sm:$0xff] }
 0x4ba   : > { %5614 = vmatprep.subr.bf16.mxu0 %v12630_v49  ;;  %5655 = vmatprep.subr.bf16.mxu1 %v12632_v50  ;;  %v1012_v48 = vld [vmem:[%s14248_s9 + $0x488] sm:$0xff]  ;;  %v12897_v49 = vcombine.low %v1137_v37, %v1265_v38  ;;  %v12899_v50 = vcombine.low %v1138_v39, %v1266_v40  ;;  %v12658_v37 = vcombine.high %v889_v31, %v1017_v32  ;;  %v1145_v39 = vld [vmem:[%s14248_s9 + $0x8b0] sm:$0xff] }
 0x4bb   : > { %v12648_v52 = vcombine.high %v884_v47, %v1012_v48  ;;  %v1273_v40 = vld [vmem:[%s14248_s9 + $0xcb0] sm:$0xff] }
 0x4bc   : > { %13131 = vmatmul.mubr.msk.bf16.vlgmr.msra.gmra.mrb[16].mxu0 %vm634_vm2, %v14282_v8  ;;  %13132 = vmatmul.mubr.msk.bf16.vlgmr.msra.gmra.mrb[16].mxu1 %vm634_vm2, %v14282_v8 }
 0x4bd   : > { %5615 = vmatpush1.bf16.msra.mxu0 %v12629_v55  ;;  %5656 = vmatpush1.bf16.msra.mxu1 %v12631_v56  ;;  %v1140_v55 = vld [vmem:[%s14248_s9 + $0x888] sm:$0xff] }
 0x4be   : > { %5616 = vmatprep.subr.bf16.mxu0 %v12886_v57  ;;  %5657 = vmatprep.subr.bf16.mxu1 %v12888_v58  ;;  %v1268_v56 = vld [vmem:[%s14248_s9 + $0xc88] sm:$0xff]  ;;  %v12645_v57 = vcombine.low %v883_v45, %v1011_v46  ;;  %v12647_v58 = vcombine.low %v884_v47, %v1012_v48  ;;  %v12914_v45 = vcombine.high %v1145_v39, %v1273_v40  ;;  %v891_v47 = vld [vmem:[%s14248_s9 + $0xc0] sm:$0xff] }
 0x4bf   : > { %5646 = vmatprep.mubr.bf16.mxu0 %v13829_v61  ;;  %5687 = vmatprep.mubr.bf16.mxu1 %v13829_v61  ;;  %v12904_v60 = vcombine.high %v1140_v55, %v1268_v56  ;;  %v1019_v48 = vld [vmem:[%s14248_s9 + $0x4c0] sm:$0xff] }
 0x4c1   : > { %5617 = vmatpush1.bf16.msra.mxu0 %v12885_v0  ;;  %5658 = vmatpush1.bf16.msra.mxu1 %v12887_v1  ;;  %v886_v0 = vld [vmem:[%s14248_s9 + $0x98] sm:$0xff] }
 0x4c2   : > { %5696 = vmatprep.subr.bf16.mxu0 %v12634_v2  ;;  %5737 = vmatprep.subr.bf16.mxu1 %v12636_v3  ;;  %v1014_v1 = vld [vmem:[%s14248_s9 + $0x498] sm:$0xff]  ;;  %v12901_v2 = vcombine.low %v1139_v53, %v1267_v54  ;;  %v12903_v3 = vcombine.low %v1140_v55, %v1268_v56  ;;  %v12662_v53 = vcombine.high %v891_v47, %v1019_v48  ;;  %v1147_v55 = vld [vmem:[%s14248_s9 + $0x8c0] sm:$0xff] }
 0x4c3   : > { %v12652_v5 = vcombine.high %v886_v0, %v1014_v1  ;;  %v1275_v56 = vld [vmem:[%s14248_s9 + $0xcc0] sm:$0xff] }
 0x4c4   : > { %13133 = vmatmul.mubr.msk.bf16.vlgmr.msra.gmra.mrb[20].mxu0 %vm634_vm2, %v14282_v8  ;;  %13134 = vmatmul.mubr.msk.bf16.vlgmr.msra.gmra.mrb[20].mxu1 %vm634_vm2, %v14282_v8 }
 0x4c5   : > { %5697 = vmatpush1.bf16.msra.mxu0 %v12633_v9  ;;  %5738 = vmatpush1.bf16.msra.mxu1 %v12635_v10  ;;  %v1142_v9 = vld [vmem:[%s14248_s9 + $0x898] sm:$0xff] }
 0x4c6   : > { %5698 = vmatprep.subr.bf16.mxu0 %v12890_v11  ;;  %5739 = vmatprep.subr.bf16.mxu1 %v12892_v12  ;;  %v1270_v10 = vld [vmem:[%s14248_s9 + $0xc98] sm:$0xff]  ;;  %v12649_v11 = vcombine.low %v885_v62, %v1013_v63  ;;  %v12651_v12 = vcombine.low %v886_v0, %v1014_v1  ;;  %v12918_v62 = vcombine.high %v1147_v55, %v1275_v56  ;;  %v893_v0 = vld [vmem:[%s14248_s9 + $0xd0] sm:$0xff] }
 0x4c7   : > { %5728 = vmatprep.mubr.bf16.mxu0 %v13829_v61  ;;  %5769 = vmatprep.mubr.bf16.mxu1 %v13829_v61  ;;  %v12908_v14 = vcombine.high %v1142_v9, %v1270_v10  ;;  %v1021_v1 = vld [vmem:[%s14248_s9 + $0x4d0] sm:$0xff] }
 0x4c9   : > { %5699 = vmatpush1.bf16.msra.mxu0 %v12889_v17  ;;  %5740 = vmatpush1.bf16.msra.mxu1 %v12891_v18  ;;  %v888_v17 = vld [vmem:[%s14248_s9 + $0xa8] sm:$0xff] }
 0x4ca   : > { %5778 = vmatprep.subr.bf16.mxu0 %v12638_v19  ;;  %5819 = vmatprep.subr.bf16.mxu1 %v12640_v20  ;;  %v1016_v18 = vld [vmem:[%s14248_s9 + $0x4a8] sm:$0xff]  ;;  %v12905_v19 = vcombine.low %v1141_v6, %v1269_v7  ;;  %v12907_v20 = vcombine.low %v1142_v9, %v1270_v10  ;;  %v12666_v6 = vcombine.high %v893_v0, %v1021_v1  ;;  %v1149_v9 = vld [vmem:[%s14248_s9 + $0x8d0] sm:$0xff] }
 0x4cb   : > { %v12656_v22 = vcombine.high %v888_v17, %v1016_v18  ;;  %v1277_v10 = vld [vmem:[%s14248_s9 + $0xcd0] sm:$0xff] }
 0x4cc   : > { %13135 = vmatmul.mubr.msk.bf16.vlgmr.msra.gmra.mrb[24].mxu0 %vm634_vm2, %v14282_v8  ;;  %13136 = vmatmul.mubr.msk.bf16.vlgmr.msra.gmra.mrb[24].mxu1 %vm634_vm2, %v14282_v8 }
 0x4cd   : > { %5779 = vmatpush1.bf16.msra.mxu0 %v12637_v25  ;;  %5820 = vmatpush1.bf16.msra.mxu1 %v12639_v26  ;;  %v1144_v25 = vld [vmem:[%s14248_s9 + $0x8a8] sm:$0xff] }
 0x4ce   : > { %5780 = vmatprep.subr.bf16.mxu0 %v12894_v27  ;;  %5821 = vmatprep.subr.bf16.mxu1 %v12896_v28  ;;  %v1272_v26 = vld [vmem:[%s14248_s9 + $0xca8] sm:$0xff]  ;;  %v12653_v27 = vcombine.low %v887_v15, %v1015_v16  ;;  %v12655_v28 = vcombine.low %v888_v17, %v1016_v18  ;;  %v12922_v15 = vcombine.high %v1149_v9, %v1277_v10  ;;  %v895_v17 = vld [vmem:[%s14248_s9 + $0xe0] sm:$0xff] }
 0x4cf   : > { %5810 = vmatprep.mubr.bf16.mxu0 %v13829_v61  ;;  %5851 = vmatprep.mubr.bf16.mxu1 %v13829_v61  ;;  %v12912_v30 = vcombine.high %v1144_v25, %v1272_v26  ;;  %v1023_v18 = vld [vmem:[%s14248_s9 + $0x4e0] sm:$0xff] }
 0x4d1   : > { %5781 = vmatpush1.bf16.msra.mxu0 %v12893_v33  ;;  %5822 = vmatpush1.bf16.msra.mxu1 %v12895_v34  ;;  %v890_v33 = vld [vmem:[%s14248_s9 + $0xb8] sm:$0xff] }
 0x4d2   : > { %5860 = vmatprep.subr.bf16.mxu0 %v12642_v35  ;;  %5901 = vmatprep.subr.bf16.mxu1 %v12644_v36  ;;  %v1018_v34 = vld [vmem:[%s14248_s9 + $0x4b8] sm:$0xff]  ;;  %v12909_v35 = vcombine.low %v1143_v23, %v1271_v24  ;;  %v12911_v36 = vcombine.low %v1144_v25, %v1272_v26  ;;  %v12670_v23 = vcombine.high %v895_v17, %v1023_v18  ;;  %v1151_v25 = vld [vmem:[%s14248_s9 + $0x8e0] sm:$0xff] }
 0x4d3   : > { %v12660_v38 = vcombine.high %v890_v33, %v1018_v34  ;;  %v1279_v26 = vld [vmem:[%s14248_s9 + $0xce0] sm:$0xff] }
 0x4d4   : > { %13137 = vmatmul.mubr.msk.bf16.vlgmr.msra.gmra.mrb[28].mxu0 %vm634_vm2, %v14282_v8  ;;  %13138 = vmatmul.mubr.msk.bf16.vlgmr.msra.gmra.mrb[28].mxu1 %vm634_vm2, %v14282_v8 }
 0x4d5   : > { %5861 = vmatpush1.bf16.msra.mxu0 %v12641_v41  ;;  %5902 = vmatpush1.bf16.msra.mxu1 %v12643_v42  ;;  %v1146_v41 = vld [vmem:[%s14248_s9 + $0x8b8] sm:$0xff] }
 0x4d6   : > { %5862 = vmatprep.subr.bf16.mxu0 %v12898_v43  ;;  %5903 = vmatprep.subr.bf16.mxu1 %v12900_v44  ;;  %v1274_v42 = vld [vmem:[%s14248_s9 + $0xcb8] sm:$0xff]  ;;  %v12657_v43 = vcombine.low %v889_v31, %v1017_v32  ;;  %v12659_v44 = vcombine.low %v890_v33, %v1018_v34  ;;  %v12926_v31 = vcombine.high %v1151_v25, %v1279_v26  ;;  %v897_v33 = vld [vmem:[%s14248_s9 + $0xf0] sm:$0xff] }
 0x4d7   : > { %5892 = vmatprep.mubr.bf16.mxu0 %v13829_v61  ;;  %5933 = vmatprep.mubr.bf16.mxu1 %v13829_v61  ;;  %v12916_v46 = vcombine.high %v1146_v41, %v1274_v42  ;;  %v1025_v34 = vld [vmem:[%s14248_s9 + $0x4f0] sm:$0xff] }
 0x4d9   : > { %5863 = vmatpush1.bf16.msra.mxu0 %v12897_v49  ;;  %5904 = vmatpush1.bf16.msra.mxu1 %v12899_v50  ;;  %v892_v49 = vld [vmem:[%s14248_s9 + $0xc8] sm:$0xff] }
 0x4da   : > { %5942 = vmatprep.subr.bf16.mxu0 %v12646_v51  ;;  %5983 = vmatprep.subr.bf16.mxu1 %v12648_v52  ;;  %v1020_v50 = vld [vmem:[%s14248_s9 + $0x4c8] sm:$0xff]  ;;  %v12913_v51 = vcombine.low %v1145_v39, %v1273_v40  ;;  %v12915_v52 = vcombine.low %v1146_v41, %v1274_v42  ;;  %v12674_v39 = vcombine.high %v897_v33, %v1025_v34  ;;  %v1153_v41 = vld [vmem:[%s14248_s9 + $0x8f0] sm:$0xff] }
 0x4db   : > { %v12664_v54 = vcombine.high %v892_v49, %v1020_v50  ;;  %v1281_v42 = vld [vmem:[%s14248_s9 + $0xcf0] sm:$0xff] }
 0x4dc   : > { %13139 = vmatmul.mubr.msk.bf16.vlgmr.msra.gmra.mrb[32].mxu0 %vm634_vm2, %v14282_v8  ;;  %13140 = vmatmul.mubr.msk.bf16.vlgmr.msra.gmra.mrb[32].mxu1 %vm634_vm2, %v14282_v8 }
 0x4dd   : > { %5943 = vmatpush1.bf16.msra.mxu0 %v12645_v57  ;;  %5984 = vmatpush1.bf16.msra.mxu1 %v12647_v58  ;;  %v1148_v57 = vld [vmem:[%s14248_s9 + $0x8c8] sm:$0xff] }
 0x4de   : > { %5944 = vmatprep.subr.bf16.mxu0 %v12902_v59  ;;  %5985 = vmatprep.subr.bf16.mxu1 %v12904_v60  ;;  %v1276_v58 = vld [vmem:[%s14248_s9 + $0xcc8] sm:$0xff]  ;;  %v12661_v59 = vcombine.low %v891_v47, %v1019_v48  ;;  %v12663_v60 = vcombine.low %v892_v49, %v1020_v50  ;;  %v12930_v47 = vcombine.high %v1153_v41, %v1281_v42  ;;  %v899_v49 = vld [vmem:[%s14248_s9 + $0x100] sm:$0xff] }
 0x4df   : > { %5974 = vmatprep.mubr.bf16.mxu0 %v13829_v61  ;;  %6015 = vmatprep.mubr.bf16.mxu1 %v13829_v61  ;;  %v12920_v63 = vcombine.high %v1148_v57, %v1276_v58  ;;  %v1027_v50 = vld [vmem:[%s14248_s9 + $0x500] sm:$0xff] }
 0x4e1   : > { %5945 = vmatpush1.bf16.msra.mxu0 %v12901_v2  ;;  %5986 = vmatpush1.bf16.msra.mxu1 %v12903_v3  ;;  %v894_v2 = vld [vmem:[%s14248_s9 + $0xd8] sm:$0xff] }
 0x4e2   : > { %6024 = vmatprep.subr.bf16.mxu0 %v12650_v4  ;;  %6065 = vmatprep.subr.bf16.mxu1 %v12652_v5  ;;  %v1022_v3 = vld [vmem:[%s14248_s9 + $0x4d8] sm:$0xff]  ;;  %v12917_v4 = vcombine.low %v1147_v55, %v1275_v56  ;;  %v12919_v5 = vcombine.low %v1148_v57, %v1276_v58  ;;  %v12678_v55 = vcombine.high %v899_v49, %v1027_v50  ;;  %v1155_v57 = vld [vmem:[%s14248_s9 + $0x900] sm:$0xff] }
 0x4e3   : > { %v12668_v7 = vcombine.high %v894_v2, %v1022_v3  ;;  %v1283_v58 = vld [vmem:[%s14248_s9 + $0xd00] sm:$0xff] }
 0x4e4   : > { %13141 = vmatmul.mubr.msk.bf16.vlgmr.msra.gmra.mrb[36].mxu0 %vm634_vm2, %v14282_v8  ;;  %13142 = vmatmul.mubr.msk.bf16.vlgmr.msra.gmra.mrb[36].mxu1 %vm634_vm2, %v14282_v8 }
 0x4e5   : > { %6025 = vmatpush1.bf16.msra.mxu0 %v12649_v11  ;;  %6066 = vmatpush1.bf16.msra.mxu1 %v12651_v12  ;;  %v1150_v11 = vld [vmem:[%s14248_s9 + $0x8d8] sm:$0xff] }
 0x4e6   : > { %6026 = vmatprep.subr.bf16.mxu0 %v12906_v13  ;;  %6067 = vmatprep.subr.bf16.mxu1 %v12908_v14  ;;  %v1278_v12 = vld [vmem:[%s14248_s9 + $0xcd8] sm:$0xff]  ;;  %v12665_v13 = vcombine.low %v893_v0, %v1021_v1  ;;  %v12667_v14 = vcombine.low %v894_v2, %v1022_v3  ;;  %v12934_v0 = vcombine.high %v1155_v57, %v1283_v58  ;;  %v901_v2 = vld [vmem:[%s14248_s9 + $0x110] sm:$0xff] }
 0x4e7   : > { %6056 = vmatprep.mubr.bf16.mxu0 %v13829_v61  ;;  %6097 = vmatprep.mubr.bf16.mxu1 %v13829_v61  ;;  %v12924_v16 = vcombine.high %v1150_v11, %v1278_v12  ;;  %v1029_v3 = vld [vmem:[%s14248_s9 + $0x510] sm:$0xff] }
 0x4e9   : > { %6027 = vmatpush1.bf16.msra.mxu0 %v12905_v19  ;;  %6068 = vmatpush1.bf16.msra.mxu1 %v12907_v20  ;;  %v896_v19 = vld [vmem:[%s14248_s9 + $0xe8] sm:$0xff] }
 0x4ea   : > { %6106 = vmatprep.subr.bf16.mxu0 %v12654_v21  ;;  %6147 = vmatprep.subr.bf16.mxu1 %v12656_v22  ;;  %v1024_v20 = vld [vmem:[%s14248_s9 + $0x4e8] sm:$0xff]  ;;  %v12921_v21 = vcombine.low %v1149_v9, %v1277_v10  ;;  %v12923_v22 = vcombine.low %v1150_v11, %v1278_v12  ;;  %v12682_v9 = vcombine.high %v901_v2, %v1029_v3  ;;  %v1157_v11 = vld [vmem:[%s14248_s9 + $0x910] sm:$0xff] }
 0x4eb   : > { %v12672_v24 = vcombine.high %v896_v19, %v1024_v20  ;;  %v1285_v12 = vld [vmem:[%s14248_s9 + $0xd10] sm:$0xff] }
 0x4ec   : > { %13143 = vmatmul.mubr.msk.bf16.vlgmr.msra.gmra.mrb[40].mxu0 %vm634_vm2, %v14282_v8  ;;  %13144 = vmatmul.mubr.msk.bf16.vlgmr.msra.gmra.mrb[40].mxu1 %vm634_vm2, %v14282_v8 }
 0x4ed   : > { %6107 = vmatpush1.bf16.msra.mxu0 %v12653_v27  ;;  %6148 = vmatpush1.bf16.msra.mxu1 %v12655_v28  ;;  %v1152_v27 = vld [vmem:[%s14248_s9 + $0x8e8] sm:$0xff] }
 0x4ee   : > { %6108 = vmatprep.subr.bf16.mxu0 %v12910_v29  ;;  %6149 = vmatprep.subr.bf16.mxu1 %v12912_v30  ;;  %v1280_v28 = vld [vmem:[%s14248_s9 + $0xce8] sm:$0xff]  ;;  %v12669_v29 = vcombine.low %v895_v17, %v1023_v18  ;;  %v12671_v30 = vcombine.low %v896_v19, %v1024_v20  ;;  %v12938_v17 = vcombine.high %v1157_v11, %v1285_v12  ;;  %v903_v19 = vld [vmem:[%s14248_s9 + $0x120] sm:$0xff] }
 0x4ef   : > { %6138 = vmatprep.mubr.bf16.mxu0 %v13829_v61  ;;  %6179 = vmatprep.mubr.bf16.mxu1 %v13829_v61  ;;  %v12928_v32 = vcombine.high %v1152_v27, %v1280_v28  ;;  %v1031_v20 = vld [vmem:[%s14248_s9 + $0x520] sm:$0xff] }
 0x4f1   : > { %6109 = vmatpush1.bf16.msra.mxu0 %v12909_v35  ;;  %6150 = vmatpush1.bf16.msra.mxu1 %v12911_v36  ;;  %v898_v35 = vld [vmem:[%s14248_s9 + $0xf8] sm:$0xff] }
 0x4f2   : > { %6188 = vmatprep.subr.bf16.mxu0 %v12658_v37  ;;  %6229 = vmatprep.subr.bf16.mxu1 %v12660_v38  ;;  %v1026_v36 = vld [vmem:[%s14248_s9 + $0x4f8] sm:$0xff]  ;;  %v12925_v37 = vcombine.low %v1151_v25, %v1279_v26  ;;  %v12927_v38 = vcombine.low %v1152_v27, %v1280_v28  ;;  %v12686_v25 = vcombine.high %v903_v19, %v1031_v20  ;;  %v1159_v27 = vld [vmem:[%s14248_s9 + $0x920] sm:$0xff] }
 0x4f3   : > { %v12676_v40 = vcombine.high %v898_v35, %v1026_v36  ;;  %v1287_v28 = vld [vmem:[%s14248_s9 + $0xd20] sm:$0xff] }
 0x4f4   : > { %13145 = vmatmul.mubr.msk.bf16.vlgmr.msra.gmra.mrb[44].mxu0 %vm634_vm2, %v14282_v8  ;;  %13146 = vmatmul.mubr.msk.bf16.vlgmr.msra.gmra.mrb[44].mxu1 %vm634_vm2, %v14282_v8 }
 0x4f5   : > { %6189 = vmatpush1.bf16.msra.mxu0 %v12657_v43  ;;  %6230 = vmatpush1.bf16.msra.mxu1 %v12659_v44  ;;  %v1154_v43 = vld [vmem:[%s14248_s9 + $0x8f8] sm:$0xff] }
 0x4f6   : > { %6190 = vmatprep.subr.bf16.mxu0 %v12914_v45  ;;  %6231 = vmatprep.subr.bf16.mxu1 %v12916_v46  ;;  %v1282_v44 = vld [vmem:[%s14248_s9 + $0xcf8] sm:$0xff]  ;;  %v12673_v45 = vcombine.low %v897_v33, %v1025_v34  ;;  %v12675_v46 = vcombine.low %v898_v35, %v1026_v36  ;;  %v12942_v33 = vcombine.high %v1159_v27, %v1287_v28  ;;  %v905_v35 = vld [vmem:[%s14248_s9 + $0x130] sm:$0xff] }
 0x4f7   : > { %6220 = vmatprep.mubr.bf16.mxu0 %v13829_v61  ;;  %6261 = vmatprep.mubr.bf16.mxu1 %v13829_v61  ;;  %v12932_v48 = vcombine.high %v1154_v43, %v1282_v44  ;;  %v1033_v36 = vld [vmem:[%s14248_s9 + $0x530] sm:$0xff] }
 0x4f9   : > { %6191 = vmatpush1.bf16.msra.mxu0 %v12913_v51  ;;  %6232 = vmatpush1.bf16.msra.mxu1 %v12915_v52  ;;  %v900_v51 = vld [vmem:[%s14248_s9 + $0x108] sm:$0xff] }
 0x4fa   : > { %6270 = vmatprep.subr.bf16.mxu0 %v12662_v53  ;;  %6311 = vmatprep.subr.bf16.mxu1 %v12664_v54  ;;  %v1028_v52 = vld [vmem:[%s14248_s9 + $0x508] sm:$0xff]  ;;  %v12929_v53 = vcombine.low %v1153_v41, %v1281_v42  ;;  %v12931_v54 = vcombine.low %v1154_v43, %v1282_v44  ;;  %v12690_v41 = vcombine.high %v905_v35, %v1033_v36  ;;  %v1161_v43 = vld [vmem:[%s14248_s9 + $0x930] sm:$0xff] }
 0x4fb   : > { %v12680_v56 = vcombine.high %v900_v51, %v1028_v52  ;;  %v1289_v44 = vld [vmem:[%s14248_s9 + $0xd30] sm:$0xff] }
 0x4fc   : > { %13147 = vmatmul.mubr.msk.bf16.vlgmr.msra.gmra.mrb[48].mxu0 %vm634_vm2, %v14282_v8  ;;  %13148 = vmatmul.mubr.msk.bf16.vlgmr.msra.gmra.mrb[48].mxu1 %vm634_vm2, %v14282_v8 }
 0x4fd   : > { %6271 = vmatpush1.bf16.msra.mxu0 %v12661_v59  ;;  %6312 = vmatpush1.bf16.msra.mxu1 %v12663_v60  ;;  %v1156_v59 = vld [vmem:[%s14248_s9 + $0x908] sm:$0xff] }
 0x4fe   : > { %6272 = vmatprep.subr.bf16.mxu0 %v12918_v62  ;;  %6313 = vmatprep.subr.bf16.mxu1 %v12920_v63  ;;  %v1284_v60 = vld [vmem:[%s14248_s9 + $0xd08] sm:$0xff]  ;;  %v12677_v62 = vcombine.low %v899_v49, %v1027_v50  ;;  %v12679_v63 = vcombine.low %v900_v51, %v1028_v52  ;;  %v12946_v49 = vcombine.high %v1161_v43, %v1289_v44  ;;  %v907_v51 = vld [vmem:[%s14248_s9 + $0x140] sm:$0xff] }
 0x4ff   : > { %6302 = vmatprep.mubr.bf16.mxu0 %v13829_v61  ;;  %6343 = vmatprep.mubr.bf16.mxu1 %v13829_v61  ;;  %v12936_v1 = vcombine.high %v1156_v59, %v1284_v60  ;;  %v1035_v52 = vld [vmem:[%s14248_s9 + $0x540] sm:$0xff] }
 0x501   : > { %6273 = vmatpush1.bf16.msra.mxu0 %v12917_v4  ;;  %6314 = vmatpush1.bf16.msra.mxu1 %v12919_v5  ;;  %v902_v4 = vld [vmem:[%s14248_s9 + $0x118] sm:$0xff] }
 0x502   : > { %6352 = vmatprep.subr.bf16.mxu0 %v12666_v6  ;;  %6393 = vmatprep.subr.bf16.mxu1 %v12668_v7  ;;  %v1030_v5 = vld [vmem:[%s14248_s9 + $0x518] sm:$0xff]  ;;  %v12933_v6 = vcombine.low %v1155_v57, %v1283_v58  ;;  %v12935_v7 = vcombine.low %v1156_v59, %v1284_v60  ;;  %v12694_v57 = vcombine.high %v907_v51, %v1035_v52  ;;  %v1163_v59 = vld [vmem:[%s14248_s9 + $0x940] sm:$0xff] }
 0x503   : > { %v12684_v10 = vcombine.high %v902_v4, %v1030_v5  ;;  %v1291_v60 = vld [vmem:[%s14248_s9 + $0xd40] sm:$0xff] }
 0x504   : > { %13149 = vmatmul.mubr.msk.bf16.vlgmr.msra.gmra.mrb[52].mxu0 %vm634_vm2, %v14282_v8  ;;  %13150 = vmatmul.mubr.msk.bf16.vlgmr.msra.gmra.mrb[52].mxu1 %vm634_vm2, %v14282_v8 }
 0x505   : > { %6353 = vmatpush1.bf16.msra.mxu0 %v12665_v13  ;;  %6394 = vmatpush1.bf16.msra.mxu1 %v12667_v14  ;;  %v1158_v13 = vld [vmem:[%s14248_s9 + $0x918] sm:$0xff] }
 0x506   : > { %6354 = vmatprep.subr.bf16.mxu0 %v12922_v15  ;;  %6395 = vmatprep.subr.bf16.mxu1 %v12924_v16  ;;  %v1286_v14 = vld [vmem:[%s14248_s9 + $0xd18] sm:$0xff]  ;;  %v12681_v15 = vcombine.low %v901_v2, %v1029_v3  ;;  %v12683_v16 = vcombine.low %v902_v4, %v1030_v5  ;;  %v12950_v2 = vcombine.high %v1163_v59, %v1291_v60  ;;  %v909_v4 = vld [vmem:[%s14248_s9 + $0x150] sm:$0xff] }
 0x507   : > { %6384 = vmatprep.mubr.bf16.mxu0 %v13829_v61  ;;  %6425 = vmatprep.mubr.bf16.mxu1 %v13829_v61  ;;  %v12940_v18 = vcombine.high %v1158_v13, %v1286_v14  ;;  %v1037_v5 = vld [vmem:[%s14248_s9 + $0x550] sm:$0xff] }
 0x509   : > { %6355 = vmatpush1.bf16.msra.mxu0 %v12921_v21  ;;  %6396 = vmatpush1.bf16.msra.mxu1 %v12923_v22  ;;  %v904_v21 = vld [vmem:[%s14248_s9 + $0x128] sm:$0xff] }
 0x50a   : > { %6434 = vmatprep.subr.bf16.mxu0 %v12670_v23  ;;  %6475 = vmatprep.subr.bf16.mxu1 %v12672_v24  ;;  %v1032_v22 = vld [vmem:[%s14248_s9 + $0x528] sm:$0xff]  ;;  %v12937_v23 = vcombine.low %v1157_v11, %v1285_v12  ;;  %v12939_v24 = vcombine.low %v1158_v13, %v1286_v14  ;;  %v12698_v11 = vcombine.high %v909_v4, %v1037_v5  ;;  %v1165_v13 = vld [vmem:[%s14248_s9 + $0x950] sm:$0xff] }
 0x50b   : > { %v12688_v26 = vcombine.high %v904_v21, %v1032_v22  ;;  %v1293_v14 = vld [vmem:[%s14248_s9 + $0xd50] sm:$0xff] }
 0x50c   : > { %13151 = vmatmul.mubr.msk.bf16.vlgmr.msra.gmra.mrb[56].mxu0 %vm634_vm2, %v14282_v8  ;;  %13152 = vmatmul.mubr.msk.bf16.vlgmr.msra.gmra.mrb[56].mxu1 %vm634_vm2, %v14282_v8 }
 0x50d   : > { %6435 = vmatpush1.bf16.msra.mxu0 %v12669_v29  ;;  %6476 = vmatpush1.bf16.msra.mxu1 %v12671_v30  ;;  %v1160_v29 = vld [vmem:[%s14248_s9 + $0x928] sm:$0xff] }
 0x50e   : > { %6436 = vmatprep.subr.bf16.mxu0 %v12926_v31  ;;  %6477 = vmatprep.subr.bf16.mxu1 %v12928_v32  ;;  %v1288_v30 = vld [vmem:[%s14248_s9 + $0xd28] sm:$0xff]  ;;  %v12685_v31 = vcombine.low %v903_v19, %v1031_v20  ;;  %v12687_v32 = vcombine.low %v904_v21, %v1032_v22  ;;  %v12954_v19 = vcombine.high %v1165_v13, %v1293_v14  ;;  %v911_v21 = vld [vmem:[%s14248_s9 + $0x160] sm:$0xff] }
 0x50f   : > { %6466 = vmatprep.mubr.bf16.mxu0 %v13829_v61  ;;  %6507 = vmatprep.mubr.bf16.mxu1 %v13829_v61  ;;  %v12944_v34 = vcombine.high %v1160_v29, %v1288_v30  ;;  %v1039_v22 = vld [vmem:[%s14248_s9 + $0x560] sm:$0xff] }
 0x511   : > { %6437 = vmatpush1.bf16.msra.mxu0 %v12925_v37  ;;  %6478 = vmatpush1.bf16.msra.mxu1 %v12927_v38  ;;  %v906_v37 = vld [vmem:[%s14248_s9 + $0x138] sm:$0xff] }
 0x512   : > { %6516 = vmatprep.subr.bf16.mxu0 %v12674_v39  ;;  %6557 = vmatprep.subr.bf16.mxu1 %v12676_v40  ;;  %v1034_v38 = vld [vmem:[%s14248_s9 + $0x538] sm:$0xff]  ;;  %v12941_v39 = vcombine.low %v1159_v27, %v1287_v28  ;;  %v12943_v40 = vcombine.low %v1160_v29, %v1288_v30  ;;  %v12702_v27 = vcombine.high %v911_v21, %v1039_v22  ;;  %v1167_v29 = vld [vmem:[%s14248_s9 + $0x960] sm:$0xff] }
 0x513   : > { %v12692_v42 = vcombine.high %v906_v37, %v1034_v38  ;;  %v1295_v30 = vld [vmem:[%s14248_s9 + $0xd60] sm:$0xff] }
 0x514   : > { %13153 = vmatmul.mubr.msk.bf16.vlgmr.msra.gmra.mrb[60].mxu0 %vm634_vm2, %v14282_v8  ;;  %13154 = vmatmul.mubr.msk.bf16.vlgmr.msra.gmra.mrb[60].mxu1 %vm634_vm2, %v14282_v8 }
 0x515   : > { %6517 = vmatpush1.bf16.msra.mxu0 %v12673_v45  ;;  %6558 = vmatpush1.bf16.msra.mxu1 %v12675_v46  ;;  %v1162_v45 = vld [vmem:[%s14248_s9 + $0x938] sm:$0xff] }
 0x516   : > { %6518 = vmatprep.subr.bf16.mxu0 %v12930_v47  ;;  %6559 = vmatprep.subr.bf16.mxu1 %v12932_v48  ;;  %v1290_v46 = vld [vmem:[%s14248_s9 + $0xd38] sm:$0xff]  ;;  %v12689_v47 = vcombine.low %v905_v35, %v1033_v36  ;;  %v12691_v48 = vcombine.low %v906_v37, %v1034_v38  ;;  %v12958_v35 = vcombine.high %v1167_v29, %v1295_v30  ;;  %v913_v37 = vld [vmem:[%s14248_s9 + $0x170] sm:$0xff] }
 0x517   : > { %6548 = vmatprep.mubr.bf16.mxu0 %v13829_v61  ;;  %6589 = vmatprep.mubr.bf16.mxu1 %v13829_v61  ;;  %v12948_v50 = vcombine.high %v1162_v45, %v1290_v46  ;;  %v1041_v38 = vld [vmem:[%s14248_s9 + $0x570] sm:$0xff] }
 0x519   : > { %6519 = vmatpush1.bf16.msra.mxu0 %v12929_v53  ;;  %6560 = vmatpush1.bf16.msra.mxu1 %v12931_v54  ;;  %v908_v53 = vld [vmem:[%s14248_s9 + $0x148] sm:$0xff] }
 0x51a   : > { %6598 = vmatprep.subr.bf16.mxu0 %v12678_v55  ;;  %6639 = vmatprep.subr.bf16.mxu1 %v12680_v56  ;;  %v1036_v54 = vld [vmem:[%s14248_s9 + $0x548] sm:$0xff]  ;;  %v12945_v55 = vcombine.low %v1161_v43, %v1289_v44  ;;  %v12947_v56 = vcombine.low %v1162_v45, %v1290_v46  ;;  %v12706_v43 = vcombine.high %v913_v37, %v1041_v38  ;;  %v1169_v45 = vld [vmem:[%s14248_s9 + $0x970] sm:$0xff] }
 0x51b   : > { %v12696_v58 = vcombine.high %v908_v53, %v1036_v54  ;;  %v1297_v46 = vld [vmem:[%s14248_s9 + $0xd70] sm:$0xff] }
 0x51c   : > { %13155 = vmatmul.mubr.msk.bf16.vlgmr.msra.gmra.mrb[64].mxu0 %vm634_vm2, %v14282_v8  ;;  %13156 = vmatmul.mubr.msk.bf16.vlgmr.msra.gmra.mrb[64].mxu1 %vm634_vm2, %v14282_v8 }
 0x51d   : > { %6599 = vmatpush1.bf16.msra.mxu0 %v12677_v62  ;;  %6640 = vmatpush1.bf16.msra.mxu1 %v12679_v63  ;;  %v1164_v62 = vld [vmem:[%s14248_s9 + $0x948] sm:$0xff] }
 0x51e   : > { %6600 = vmatprep.subr.bf16.mxu0 %v12934_v0  ;;  %6641 = vmatprep.subr.bf16.mxu1 %v12936_v1  ;;  %v1292_v63 = vld [vmem:[%s14248_s9 + $0xd48] sm:$0xff]  ;;  %v12693_v0 = vcombine.low %v907_v51, %v1035_v52  ;;  %v12695_v1 = vcombine.low %v908_v53, %v1036_v54  ;;  %v12962_v51 = vcombine.high %v1169_v45, %v1297_v46  ;;  %v915_v53 = vld [vmem:[%s14248_s9 + $0x180] sm:$0xff] }
 0x51f   : > { %6630 = vmatprep.mubr.bf16.mxu0 %v13829_v61  ;;  %6671 = vmatprep.mubr.bf16.mxu1 %v13829_v61  ;;  %v12952_v3 = vcombine.high %v1164_v62, %v1292_v63  ;;  %v1043_v54 = vld [vmem:[%s14248_s9 + $0x580] sm:$0xff] }
 0x521   : > { %6601 = vmatpush1.bf16.msra.mxu0 %v12933_v6  ;;  %6642 = vmatpush1.bf16.msra.mxu1 %v12935_v7  ;;  %v910_v6 = vld [vmem:[%s14248_s9 + $0x158] sm:$0xff] }
 0x522   : > { %6680 = vmatprep.subr.bf16.mxu0 %v12682_v9  ;;  %6721 = vmatprep.subr.bf16.mxu1 %v12684_v10  ;;  %v1038_v7 = vld [vmem:[%s14248_s9 + $0x558] sm:$0xff]  ;;  %v12949_v9 = vcombine.low %v1163_v59, %v1291_v60  ;;  %v12951_v10 = vcombine.low %v1164_v62, %v1292_v63  ;;  %v12710_v59 = vcombine.high %v915_v53, %v1043_v54  ;;  %v1171_v62 = vld [vmem:[%s14248_s9 + $0x980] sm:$0xff] }
 0x523   : > { %v12700_v12 = vcombine.high %v910_v6, %v1038_v7  ;;  %v1299_v63 = vld [vmem:[%s14248_s9 + $0xd80] sm:$0xff] }
 0x524   : > { %13157 = vmatmul.mubr.msk.bf16.vlgmr.msra.gmra.mrb[68].mxu0 %vm634_vm2, %v14282_v8  ;;  %13158 = vmatmul.mubr.msk.bf16.vlgmr.msra.gmra.mrb[68].mxu1 %vm634_vm2, %v14282_v8 }
 0x525   : > { %6681 = vmatpush1.bf16.msra.mxu0 %v12681_v15  ;;  %6722 = vmatpush1.bf16.msra.mxu1 %v12683_v16  ;;  %v1166_v15 = vld [vmem:[%s14248_s9 + $0x958] sm:$0xff] }
 0x526   : > { %6682 = vmatprep.subr.bf16.mxu0 %v12938_v17  ;;  %6723 = vmatprep.subr.bf16.mxu1 %v12940_v18  ;;  %v1294_v16 = vld [vmem:[%s14248_s9 + $0xd58] sm:$0xff]  ;;  %v12697_v17 = vcombine.low %v909_v4, %v1037_v5  ;;  %v12699_v18 = vcombine.low %v910_v6, %v1038_v7  ;;  %v12966_v4 = vcombine.high %v1171_v62, %v1299_v63  ;;  %v917_v6 = vld [vmem:[%s14248_s9 + $0x190] sm:$0xff] }
 0x527   : > { %6712 = vmatprep.mubr.bf16.mxu0 %v13829_v61  ;;  %6753 = vmatprep.mubr.bf16.mxu1 %v13829_v61  ;;  %v12956_v20 = vcombine.high %v1166_v15, %v1294_v16  ;;  %v1045_v7 = vld [vmem:[%s14248_s9 + $0x590] sm:$0xff] }
 0x529   : > { %6683 = vmatpush1.bf16.msra.mxu0 %v12937_v23  ;;  %6724 = vmatpush1.bf16.msra.mxu1 %v12939_v24  ;;  %v912_v23 = vld [vmem:[%s14248_s9 + $0x168] sm:$0xff] }
 0x52a   : > { %6762 = vmatprep.subr.bf16.mxu0 %v12686_v25  ;;  %6803 = vmatprep.subr.bf16.mxu1 %v12688_v26  ;;  %v1040_v24 = vld [vmem:[%s14248_s9 + $0x568] sm:$0xff]  ;;  %v12953_v25 = vcombine.low %v1165_v13, %v1293_v14  ;;  %v12955_v26 = vcombine.low %v1166_v15, %v1294_v16  ;;  %v12714_v13 = vcombine.high %v917_v6, %v1045_v7  ;;  %v1173_v15 = vld [vmem:[%s14248_s9 + $0x990] sm:$0xff] }
 0x52b   : > { %v12704_v28 = vcombine.high %v912_v23, %v1040_v24  ;;  %v1301_v16 = vld [vmem:[%s14248_s9 + $0xd90] sm:$0xff] }
 0x52c   : > { %13159 = vmatmul.mubr.msk.bf16.vlgmr.msra.gmra.mrb[72].mxu0 %vm634_vm2, %v14282_v8  ;;  %13160 = vmatmul.mubr.msk.bf16.vlgmr.msra.gmra.mrb[72].mxu1 %vm634_vm2, %v14282_v8 }
 0x52d   : > { %6763 = vmatpush1.bf16.msra.mxu0 %v12685_v31  ;;  %6804 = vmatpush1.bf16.msra.mxu1 %v12687_v32  ;;  %v1168_v31 = vld [vmem:[%s14248_s9 + $0x968] sm:$0xff] }
 0x52e   : > { %6764 = vmatprep.subr.bf16.mxu0 %v12942_v33  ;;  %6805 = vmatprep.subr.bf16.mxu1 %v12944_v34  ;;  %v1296_v32 = vld [vmem:[%s14248_s9 + $0xd68] sm:$0xff]  ;;  %v12701_v33 = vcombine.low %v911_v21, %v1039_v22  ;;  %v12703_v34 = vcombine.low %v912_v23, %v1040_v24  ;;  %v12970_v21 = vcombine.high %v1173_v15, %v1301_v16  ;;  %v919_v23 = vld [vmem:[%s14248_s9 + $0x1a0] sm:$0xff] }
 0x52f   : > { %6794 = vmatprep.mubr.bf16.mxu0 %v13829_v61  ;;  %6835 = vmatprep.mubr.bf16.mxu1 %v13829_v61  ;;  %v12960_v36 = vcombine.high %v1168_v31, %v1296_v32  ;;  %v1047_v24 = vld [vmem:[%s14248_s9 + $0x5a0] sm:$0xff] }
 0x531   : > { %6765 = vmatpush1.bf16.msra.mxu0 %v12941_v39  ;;  %6806 = vmatpush1.bf16.msra.mxu1 %v12943_v40  ;;  %v914_v39 = vld [vmem:[%s14248_s9 + $0x178] sm:$0xff] }
 0x532   : > { %6844 = vmatprep.subr.bf16.mxu0 %v12690_v41  ;;  %6885 = vmatprep.subr.bf16.mxu1 %v12692_v42  ;;  %v1042_v40 = vld [vmem:[%s14248_s9 + $0x578] sm:$0xff]  ;;  %v12957_v41 = vcombine.low %v1167_v29, %v1295_v30  ;;  %v12959_v42 = vcombine.low %v1168_v31, %v1296_v32  ;;  %v12718_v29 = vcombine.high %v919_v23, %v1047_v24  ;;  %v1175_v31 = vld [vmem:[%s14248_s9 + $0x9a0] sm:$0xff] }
 0x533   : > { %v12708_v44 = vcombine.high %v914_v39, %v1042_v40  ;;  %v1303_v32 = vld [vmem:[%s14248_s9 + $0xda0] sm:$0xff] }
 0x534   : > { %13161 = vmatmul.mubr.msk.bf16.vlgmr.msra.gmra.mrb[76].mxu0 %vm634_vm2, %v14282_v8  ;;  %13162 = vmatmul.mubr.msk.bf16.vlgmr.msra.gmra.mrb[76].mxu1 %vm634_vm2, %v14282_v8 }
 0x535   : > { %6845 = vmatpush1.bf16.msra.mxu0 %v12689_v47  ;;  %6886 = vmatpush1.bf16.msra.mxu1 %v12691_v48  ;;  %v1170_v47 = vld [vmem:[%s14248_s9 + $0x978] sm:$0xff] }
 0x536   : > { %6846 = vmatprep.subr.bf16.mxu0 %v12946_v49  ;;  %6887 = vmatprep.subr.bf16.mxu1 %v12948_v50  ;;  %v1298_v48 = vld [vmem:[%s14248_s9 + $0xd78] sm:$0xff]  ;;  %v12705_v49 = vcombine.low %v913_v37, %v1041_v38  ;;  %v12707_v50 = vcombine.low %v914_v39, %v1042_v40  ;;  %v12974_v38 = vcombine.high %v1175_v31, %v1303_v32  ;;  %v921_v40 = vld [vmem:[%s14248_s9 + $0x1b0] sm:$0xff] }
 0x537   : > { %6876 = vmatprep.mubr.bf16.mxu0 %v13829_v61  ;;  %6917 = vmatprep.mubr.bf16.mxu1 %v13829_v61  ;;  %v12964_v52 = vcombine.high %v1170_v47, %v1298_v48 }
 0x539   : > { %6847 = vmatpush1.bf16.msra.mxu0 %v12945_v55  ;;  %6888 = vmatpush1.bf16.msra.mxu1 %v12947_v56  ;;  %v916_v55 = vld [vmem:[%s14248_s9 + $0x188] sm:$0xff] }
 0x53a   : > { %6926 = vmatprep.subr.bf16.mxu0 %v12694_v57  ;;  %6967 = vmatprep.subr.bf16.mxu1 %v12696_v58  ;;  %v1044_v56 = vld [vmem:[%s14248_s9 + $0x588] sm:$0xff]  ;;  %v12961_v57 = vcombine.low %v1169_v45, %v1297_v46  ;;  %v12963_v58 = vcombine.low %v1170_v47, %v1298_v48  ;;  %v12973_v45 = vcombine.low %v1175_v31, %v1303_v32 }
 0x53b   : > { %v12712_v60 = vcombine.high %v916_v55, %v1044_v56 }
 0x53c   : > { %13163 = vmatmul.mubr.msk.bf16.vlgmr.msra.gmra.mrb[80].mxu0 %vm634_vm2, %v14282_v8  ;;  %13164 = vmatmul.mubr.msk.bf16.vlgmr.msra.gmra.mrb[80].mxu1 %vm634_vm2, %v14282_v8 }
 0x53d   : > { %6927 = vmatpush1.bf16.msra.mxu0 %v12693_v0  ;;  %6968 = vmatpush1.bf16.msra.mxu1 %v12695_v1  ;;  %v1172_v0 = vld [vmem:[%s14248_s9 + $0x988] sm:$0xff] }
 0x53e   : > { %6928 = vmatprep.subr.bf16.mxu0 %v12950_v2  ;;  %6969 = vmatprep.subr.bf16.mxu1 %v12952_v3  ;;  %v1300_v1 = vld [vmem:[%s14248_s9 + $0xd88] sm:$0xff]  ;;  %v12709_v2 = vcombine.low %v915_v53, %v1043_v54  ;;  %v12711_v3 = vcombine.low %v916_v55, %v1044_v56  ;;  %v13830_v53 = vmov 1966171168  }
 0x53f   : > { %6958 = vmatprep.mubr.bf16.mxu0 %v13829_v61  ;;  %6999 = vmatprep.mubr.bf16.mxu1 %v13829_v61  ;;  %v12968_v5 = vcombine.high %v1172_v0, %v1300_v1  ;;  %v10795_v54 = vunpack.c.l.s4 %v13830_v53 }
 0x541   : > { %6929 = vmatpush1.bf16.msra.mxu0 %v12949_v9  ;;  %6970 = vmatpush1.bf16.msra.mxu1 %v12951_v10  ;;  %v918_v9 = vld [vmem:[%s14248_s9 + $0x198] sm:$0xff] }
 0x542   : > { %7008 = vmatprep.subr.bf16.mxu0 %v12698_v11  ;;  %7049 = vmatprep.subr.bf16.mxu1 %v12700_v12  ;;  %v1046_v10 = vld [vmem:[%s14248_s9 + $0x598] sm:$0xff]  ;;  %v12965_v11 = vcombine.low %v1171_v62, %v1299_v63  ;;  %v12967_v12 = vcombine.low %v1172_v0, %v1300_v1  ;;  %v14670_v1 = vld [vmem:[%s14248_s9 + $0x1c0] sm:$0xff] }
 0x543   : > { %v12716_v14 = vcombine.high %v918_v9, %v1046_v10 }
 0x544   : > { %13165 = vmatmul.mubr.msk.bf16.vlgmr.msra.gmra.mrb[84].mxu0 %vm634_vm2, %v14282_v8  ;;  %13166 = vmatmul.mubr.msk.bf16.vlgmr.msra.gmra.mrb[84].mxu1 %vm634_vm2, %v14282_v8 }
 0x545   : > { %7009 = vmatpush1.bf16.msra.mxu0 %v12697_v17  ;;  %7050 = vmatpush1.bf16.msra.mxu1 %v12699_v18  ;;  %v1174_v17 = vld [vmem:[%s14248_s9 + $0x998] sm:$0xff] }
 0x546   : > { %7010 = vmatprep.subr.bf16.mxu0 %v12954_v19  ;;  %7051 = vmatprep.subr.bf16.mxu1 %v12956_v20  ;;  %v1302_v18 = vld [vmem:[%s14248_s9 + $0xd98] sm:$0xff]  ;;  %v12713_v19 = vcombine.low %v917_v6, %v1045_v7  ;;  %v12715_v20 = vcombine.low %v918_v9, %v1046_v10 }
 0x547   : > { %7040 = vmatprep.mubr.bf16.mxu0 %v13829_v61  ;;  %7081 = vmatprep.mubr.bf16.mxu1 %v13829_v61  ;;  %v12972_v22 = vcombine.high %v1174_v17, %v1302_v18 }
 0x549   : > { %7011 = vmatpush1.bf16.msra.mxu0 %v12953_v25  ;;  %7052 = vmatpush1.bf16.msra.mxu1 %v12955_v26  ;;  %v920_v25 = vld [vmem:[%s14248_s9 + $0x1a8] sm:$0xff] }
 0x54a   : > { %7090 = vmatprep.subr.bf16.mxu0 %v12702_v27  ;;  %7131 = vmatprep.subr.bf16.mxu1 %v12704_v28  ;;  %v1048_v26 = vld [vmem:[%s14248_s9 + $0x5a8] sm:$0xff]  ;;  %v12969_v27 = vcombine.low %v1173_v15, %v1301_v16  ;;  %v12971_v28 = vcombine.low %v1174_v17, %v1302_v18  ;;  %v14698_v16 = vld [vmem:[%s14248_s9 + $0x9c0] sm:$0xff] }
 0x54b   : > { %v12720_v30 = vcombine.high %v920_v25, %v1048_v26  ;;  %v12719_v37 = vcombine.low %v920_v25, %v1048_v26 }
 0x54c   : > { %13167 = vmatmul.mubr.msk.bf16.vlgmr.msra.gmra.mrb[88].mxu0 %vm634_vm2, %v14282_v8  ;;  %13168 = vmatmul.mubr.msk.bf16.vlgmr.msra.gmra.mrb[88].mxu1 %vm634_vm2, %v14282_v8 }
 0x54d   : > { %7091 = vmatpush1.bf16.msra.mxu0 %v12701_v33  ;;  %7132 = vmatpush1.bf16.msra.mxu1 %v12703_v34  ;;  %v1176_v33 = vld [vmem:[%s14248_s9 + $0x9a8] sm:$0xff] }
 0x54e   : > { %7092 = vmatprep.subr.bf16.mxu0 %v12958_v35  ;;  %7133 = vmatprep.subr.bf16.mxu1 %v12960_v36  ;;  %v1304_v34 = vld [vmem:[%s14248_s9 + $0xda8] sm:$0xff]  ;;  %v4003_v35 = vlaneseq  ;;  %v12717_v36 = vcombine.low %v919_v23, %v1047_v24 }
 0x54f   : > { %7122 = vmatprep.mubr.bf16.mxu0 %v13829_v61  ;;  %7163 = vmatprep.mubr.bf16.mxu1 %v13829_v61  ;;  %v12976_v39 = vcombine.high %v1176_v33, %v1304_v34  ;;  %v12975_v46 = vcombine.low %v1176_v33, %v1304_v34  ;;  %v1308_v23 = vld [vmem:[%s14248_s9 + $0xdc8] sm:$0xff] }
 0x551   : > { %7093 = vmatpush1.bf16.msra.mxu0 %v12957_v41  ;;  %7134 = vmatpush1.bf16.msra.mxu1 %v12959_v42  ;;  %v1049_v41 = vld [vmem:[%s14248_s9 + $0x5b0] sm:$0xff]  ;;  %v922_v42 = vld [vmem:[%s14248_s9 + $0x1b8] sm:$0xff] }
 0x552   : > { %7172 = vmatprep.subr.bf16.mxu0 %v12706_v43  ;;  %7213 = vmatprep.subr.bf16.mxu1 %v12708_v44  ;;  %v1050_v43 = vld [vmem:[%s14248_s9 + $0x5b8] sm:$0xff]  ;;  %v14644_v44 = vshrl.u32 %v4003_v35, 7  ;;  %v12722_v47 = vcombine.high %v921_v40, %v1049_v41 }
 0x553   : > { %v12724_v48 = vcombine.high %v922_v42, %v1050_v43 }
 0x554   : > { %13169 = vmatmul.mubr.msk.bf16.vlgmr.msra.gmra.mrb[92].mxu0 %vm634_vm2, %v14282_v8  ;;  %13170 = vmatmul.mubr.msk.bf16.vlgmr.msra.gmra.mrb[92].mxu1 %vm634_vm2, %v14282_v8  ;;  %v14653_v55 = vsub.s32 0, %v14644_v44  ;;  %v14656_v56 = vsub.s32 2, %v14644_v44  ;;  %v14667_v62 = vsub.s32 3, %v14644_v44  ;;  %v14695_v15 = vsub.s32 4, %v14644_v44 }
 0x555   : > { %7173 = vmatpush1.bf16.msra.mxu0 %v12705_v49  ;;  %7214 = vmatpush1.bf16.msra.mxu1 %v12707_v50  ;;  %v1177_v49 = vld [vmem:[%s14248_s9 + $0x9b0] sm:$0xff]  ;;  %v14722_v35 = vsub.s32 7, %v14644_v44 }
 0x556   : > { %7174 = vmatprep.subr.bf16.mxu0 %v12962_v51  ;;  %7215 = vmatprep.subr.bf16.mxu1 %v12964_v52  ;;  %v1305_v50 = vld [vmem:[%s14248_s9 + $0xdb0] sm:$0xff]  ;;  %v1178_v51 = vld [vmem:[%s14248_s9 + $0x9b8] sm:$0xff] }
 0x557   : > { %7204 = vmatprep.mubr.bf16.mxu0 %v13829_v61  ;;  %7245 = vmatprep.mubr.bf16.mxu1 %v13829_v61  ;;  %v1306_v52 = vld [vmem:[%s14248_s9 + $0xdb8] sm:$0xff]  ;;  %v12978_v63 = vcombine.high %v1177_v49, %v1305_v50  ;;  %v12977_v9 = vcombine.low %v1177_v49, %v1305_v50 }
 0x558   : > { %v12980_v0 = vcombine.high %v1178_v51, %v1306_v52  ;;  %v12979_v10 = vcombine.low %v1178_v51, %v1306_v52 }
 0x559   : > { %7175 = vmatpush1.bf16.msra.mxu0 %v12961_v57  ;;  %7216 = vmatpush1.bf16.msra.mxu1 %v12963_v58  ;;  %v12721_v57 = vcombine.low %v921_v40, %v1049_v41  ;;  %v12723_v58 = vcombine.low %v922_v42, %v1050_v43  ;;  %v14728_v40 = vld [vmem:[%s14248_s9 + $0x1d0] sm:$0xff] }
 0x55a   : > { %7254 = vmatprep.subr.bf16.mxu0 %v12710_v59  ;;  %7295 = vmatprep.subr.bf16.mxu1 %v12712_v60  ;;  %v14661_v59 = vld [vmem:[%s14658_s11] sm:$0xff]  ;;  %v14664_v60 = vsub.s32 1, %v14644_v44 }
 0x55b   : > { %v4006_v6 = vrot.slane %v14661_v59, %v14653_v55  ;;  %v4014_v7 = vrot.slane %v14661_v59, %v14656_v56  ;;  %v4022_v43 = vrot.slane %v14661_v59, %v14695_v15  ;;  %v4034_v53 = vrot.slane %v14661_v59, %v14722_v35 }
 0x55c   : > { %13171 = vmatmul.mubr.msk.bf16.vlgmr.msra.gmra.mrb[96].mxu0 %vm634_vm2, %v14282_v8  ;;  %13172 = vmatmul.mubr.msk.bf16.vlgmr.msra.gmra.mrb[96].mxu1 %vm634_vm2, %v14282_v8 }
 0x55d   : > { %7255 = vmatpush1.bf16.msra.mxu0 %v12709_v2  ;;  %7296 = vmatpush1.bf16.msra.mxu1 %v12711_v3  ;;  %v10796_v2 = vunpack.c.0.s8 %v10795_v54  ;;  %v14673_v3 = vld [vmem:[%s14248_s9 + $0x5c0] sm:$0xff] }
 0x55e   : > { %7256 = vmatprep.subr.bf16.mxu0 %v12966_v4  ;;  %7297 = vmatprep.subr.bf16.mxu1 %v12968_v5  ;;  %v14676_v4 = vld [vmem:[%s14248_s9 + $0x1c8] sm:$0xff] }
 0x55f   : > { %7286 = vmatprep.mubr.bf16.mxu0 %v13829_v61  ;;  %7327 = vmatprep.mubr.bf16.mxu1 %v13829_v61  ;;  %v1052_v5 = vld [vmem:[%s14248_s9 + $0x5c8] sm:$0xff] }
 0x560   : > { %v12727_v34 = vcombine.low %v14676_v4, %v1052_v5 }
 0x561   : > { %7257 = vmatpush1.bf16.msra.mxu0 %v12965_v11  ;;  %7298 = vmatpush1.bf16.msra.mxu1 %v12967_v12  ;;  %v4010_v11 = vrot.slane %v14661_v59, %v14664_v60  ;;  %v4018_v12 = vrot.slane %v14661_v59, %v14667_v62 }
 0x562   : > { %7336 = vmatprep.subr.bf16.mxu0 %v12714_v13  ;;  %7377 = vmatprep.subr.bf16.mxu1 %v12716_v14  ;;  %v12726_v13 = vcombine.high %v14670_v1, %v14673_v3  ;;  %v12728_v14 = vcombine.high %v14676_v4, %v1052_v5 }
 0x564   : > { %13173 = vmatmul.mubr.msk.bf16.vlgmr.msra.gmra.mrb[100].mxu0 %vm634_vm2, %v14282_v8  ;;  %13174 = vmatmul.mubr.msk.bf16.vlgmr.msra.gmra.mrb[100].mxu1 %vm634_vm2, %v14282_v8 }
 0x565   : > { %7337 = vmatpush1.bf16.msra.mxu0 %v12713_v19  ;;  %7378 = vmatpush1.bf16.msra.mxu1 %v12715_v20  ;;  %v14701_v19 = vsub.s32 %v10796_v2, %v14644_v44  ;;  %v14706_v20 = vsub.s32 6, %v14644_v44  ;;  %v14764_v2 = vld [vmem:[%s14248_s9 + $0xdd0] sm:$0xff] }
 0x566   : > { %7338 = vmatprep.subr.bf16.mxu0 %v12970_v21  ;;  %7379 = vmatprep.subr.bf16.mxu1 %v12972_v22  ;;  %v14709_v21 = vld [vmem:[%s14248_s9 + $0xdc0] sm:$0xff]  ;;  %v14712_v22 = vld [vmem:[%s14248_s9 + $0x9c8] sm:$0xff] }
 0x567   : > { %7368 = vmatprep.mubr.bf16.mxu0 %v13829_v61  ;;  %7409 = vmatprep.mubr.bf16.mxu1 %v13829_v61  ;;  %v12983_v49 = vcombine.low %v14712_v22, %v1308_v23 }
 0x569   : > { %7339 = vmatpush1.bf16.msra.mxu0 %v12969_v27  ;;  %7380 = vmatpush1.bf16.msra.mxu1 %v12971_v28  ;;  %v12725_v28 = vcombine.low %v14670_v1, %v14673_v3  ;;  %v14770_v3 = vld [vmem:[%s14248_s9 + $0xdd8] sm:$0xff] }
 0x56a   : > { %7418 = vmatprep.subr.bf16.mxu0 %v12718_v29  ;;  %7459 = vmatprep.subr.bf16.mxu1 %v12720_v30  ;;  %v14718_v29 = vsub.s32 5, %v14644_v44  ;;  %v4030_v44 = vrot.slane %v14661_v59, %v14706_v20 }
 0x56c   : > { %13175 = vmatmul.mubr.msk.bf16.vlgmr.msra.gmra.mrb[104].mxu0 %vm634_vm2, %v14282_v8  ;;  %13176 = vmatmul.mubr.msk.bf16.vlgmr.msra.gmra.mrb[104].mxu1 %vm634_vm2, %v14282_v8  ;;  %v4026_v50 = vrot.slane %v14661_v59, %v14718_v29  ;;  %v14767_v59 = vld [vmem:[%s14248_s9 + $0x9d8] sm:$0xff] }
 0x56d   : > { %7419 = vmatpush1.bf16.msra.mxu0 %v12717_v36  ;;  %7460 = vmatpush1.bf16.msra.mxu1 %v12719_v37 }
 0x56e   : > { %7420 = vmatprep.subr.bf16.mxu0 %v12974_v38  ;;  %7461 = vmatprep.subr.bf16.mxu1 %v12976_v39  ;;  %v12982_v38 = vcombine.high %v14698_v16, %v14709_v21  ;;  %v12984_v39 = vcombine.high %v14712_v22, %v1308_v23  ;;  %v12988_v22 = vcombine.high %v14767_v59, %v14770_v3  ;;  %v14787_v23 = vld [vmem:[%s14248_s9 + $0x1e0] sm:$0xff] }
 0x56f   : > { %7450 = vmatprep.mubr.bf16.mxu0 %v13829_v61  ;;  %7491 = vmatprep.mubr.bf16.mxu1 %v13829_v61 }
 0x571   : > { %7421 = vmatpush1.bf16.msra.mxu0 %v12973_v45  ;;  %7462 = vmatpush1.bf16.msra.mxu1 %v12975_v46  ;;  %v1053_v45 = vld [vmem:[%s14248_s9 + $0x5d0] sm:$0xff]  ;;  %v926_v46 = vld [vmem:[%s14248_s9 + $0x1d8] sm:$0xff] }
 0x572   : > { %7500 = vmatprep.subr.bf16.mxu0 %v12722_v47  ;;  %7541 = vmatprep.subr.bf16.mxu1 %v12724_v48  ;;  %v1054_v47 = vld [vmem:[%s14248_s9 + $0x5d8] sm:$0xff]  ;;  %v12981_v48 = vcombine.low %v14698_v16, %v14709_v21  ;;  %v12730_v54 = vcombine.high %v14728_v40, %v1053_v45 }
 0x573   : > { %v12731_v16 = vcombine.low %v926_v46, %v1054_v47 }
 0x574   : > { %13177 = vmatmul.mubr.msk.bf16.vlgmr.msra.gmra.mrb[108].mxu0 %vm634_vm2, %v14282_v8  ;;  %13178 = vmatmul.mubr.msk.bf16.vlgmr.msra.gmra.mrb[108].mxu1 %vm634_vm2, %v14282_v8 }
 0x575   : > { %7501 = vmatpush1.bf16.msra.mxu0 %v12721_v57  ;;  %7542 = vmatpush1.bf16.msra.mxu1 %v12723_v58  ;;  %v12732_v57 = vcombine.high %v926_v46, %v1054_v47  ;;  %v14756_v58 = vld [vmem:[%s14248_s9 + $0x9d0] sm:$0xff]  ;;  %v14832_v46 = vld [vmem:[%s14248_s9 + $0xde0] sm:$0xff]  ;;  %v14835_v47 = vld [vmem:[%s14248_s9 + $0x9e8] sm:$0xff] }
 0x576   : > { %7502 = vmatprep.subr.bf16.mxu0 %v12978_v63  ;;  %7543 = vmatprep.subr.bf16.mxu1 %v12980_v0  ;;  %v12986_v21 = vcombine.high %v14756_v58, %v14764_v2 }
 0x577   : > { %v5320_v17 = vpop.f32.mrb[4].mxu0  ;;  %v5361_v18 = vpop.f32.mrb[4].mxu1  ;;  %7532 = vmatprep.mubr.bf16.mxu0 %v13829_v61  ;;  %7573 = vmatprep.mubr.bf16.mxu1 %v13829_v61 }
 0x578   : > { %v5321_v24 = vadd.f32 %v5320_v17, %v4006_v6  ;;  %v5362_v25 = vadd.f32 %v5361_v18, %v4014_v7  ;;  %v5322_v26 = vpop.f32.mrb[5].mxu0  ;;  %v5363_v27 = vpop.f32.mrb[5].mxu1 }
 0x579   : > { %v5323_v30 = vadd.f32 %v5322_v26, %v4010_v11  ;;  %v5364_v31 = vadd.f32 %v5363_v27, %v4018_v12  ;;  %7503 = vmatpush1.bf16.msra.mxu0 %v12977_v9  ;;  %7544 = vmatpush1.bf16.msra.mxu1 %v12979_v10  ;;  %v5324_v32 = vpop.f32.mrb[6].mxu0  ;;  %v5365_v33 = vpop.f32.mrb[6].mxu1  ;;  %v12729_v9 = vcombine.low %v14728_v40, %v1053_v45  ;;  %v14774_v10 = vld [vmem:[%s14658_s11 + $0x8] sm:$0xff] }
 0x57a   : > { %v5325_v36 = vpop.f32.mrb[7].mxu0  ;;  %v5366_v37 = vpop.f32.mrb[7].mxu1  ;;  %7582 = vmatprep.subr.bf16.mxu0 %v12726_v13  ;;  %7623 = vmatprep.subr.bf16.mxu1 %v12728_v14  ;;  %v4038_v26 = vrot.slane %v14774_v10, %v14653_v55  ;;  %v4046_v27 = vrot.slane %v14774_v10, %v14656_v56  ;;  %v12985_v32 = vcombine.low %v14756_v58, %v14764_v2 }
 0x57b   : > { %v10790_v41 = vcombine.low %v5321_v24, %v5323_v30  ;;  %v10791_v42 = vcombine.low %v5362_v25, %v5364_v31  ;;  %v14797_v30 = vld [vmem:[%s14248_s9 + $0x1e8] sm:$0xff]  ;;  %v12987_v33 = vcombine.low %v14767_v59, %v14770_v3  ;;  %v4054_v3 = vrot.slane %v14774_v10, %v14695_v15 }
 0x57c   : > { %13179 = vmatmul.mubr.msk.bf16.vlgmr.msra.gmra.mrb[112].mxu0 %vm634_vm2, %v14282_v8  ;;  %13180 = vmatmul.mubr.msk.bf16.vlgmr.msra.gmra.mrb[112].mxu1 %vm634_vm2, %v14282_v8  ;;  %v14800_v31 = vld [vmem:[%s14248_s9 + $0x5e8] sm:$0xff] }
 0x57d   : > { %v14747_v51 = vrot.slane %v10790_v41, %v14701_v19  ;;  %v14750_v52 = vrot.slane %v10791_v42, %v14701_v19  ;;  %7583 = vmatpush1.bf16.msra.mxu0 %v12725_v28  ;;  %7624 = vmatpush1.bf16.msra.mxu1 %v12727_v34  ;;  %v14794_v28 = vld [vmem:[%s14248_s9 + $0x5e0] sm:$0xff]  ;;  %v4042_v34 = vrot.slane %v14774_v10, %v14664_v60 }
 0x57e   : > { %7584 = vmatprep.subr.bf16.mxu0 %v12982_v38  ;;  %7625 = vmatprep.subr.bf16.mxu1 %v12984_v39  ;;  %v4050_v38 = vrot.slane %v14774_v10, %v14667_v62  ;;  %v12734_v39 = vcombine.high %v14787_v23, %v14794_v28  ;;  %v12736_v40 = vcombine.high %v14797_v30, %v14800_v31  ;;  %v14825_v41 = vld [vmem:[%s14248_s9 + $0x9e0] sm:$0xff] }
 0x57f   : > { %v10822_v63 = vcombine.low %v14747_v51, %v14750_v52  ;;  %v5402_v0 = vpop.f32.mrb[8].mxu0  ;;  %v5443_v1 = vpop.f32.mrb[8].mxu1  ;;  %7614 = vmatprep.mubr.bf16.mxu0 %v13829_v61  ;;  %7655 = vmatprep.mubr.bf16.mxu1 %v13829_v61  ;;  %v12733_v45 = vcombine.low %v14787_v23, %v14794_v28 }
 0x580   : > { %v5403_v4 = vadd.f32 %v5402_v0, %v4022_v43  ;;  %v5444_v5 = vadd.f32 %v5443_v1, %v4030_v44  ;;  %v5404_v6 = vpop.f32.mrb[9].mxu0  ;;  %v5445_v7 = vpop.f32.mrb[9].mxu1 }
 0x581   : > { %v5405_v11 = vadd.f32 %v5404_v6, %v4026_v50  ;;  %v5446_v12 = vadd.f32 %v5445_v7, %v4034_v53  ;;  %7585 = vmatpush1.bf16.msra.mxu0 %v12981_v48  ;;  %7626 = vmatpush1.bf16.msra.mxu1 %v12983_v49  ;;  %v5406_v13 = vpop.f32.mrb[10].mxu0  ;;  %v5447_v14 = vpop.f32.mrb[10].mxu1  ;;  %v14838_v48 = vld [vmem:[%s14248_s9 + $0xde8] sm:$0xff]  ;;  %v10830_v49 = vrot.slane %v10822_v63, %v14701_v19  ;;  %v14856_v6 = vld [vmem:[%s14248_s9 + $0x1f0] sm:$0xff] }
 0x582   : > { %v5407_v17 = vpop.f32.mrb[11].mxu0  ;;  %v5448_v18 = vpop.f32.mrb[11].mxu1  ;;  %7664 = vmatprep.subr.bf16.mxu0 %v12730_v54  ;;  %7705 = vmatprep.subr.bf16.mxu1 %v12732_v57  ;;  %v12735_v54 = vcombine.low %v14797_v30, %v14800_v31  ;;  %v1057_v13 = vld [vmem:[%s14248_s9 + $0x5f0] sm:$0xff]  ;;  %v930_v14 = vld [vmem:[%s14248_s9 + $0x1f8] sm:$0xff] }
 0x583   : > { %v10792_v24 = vcombine.low %v5403_v4, %v5405_v11  ;;  %v10793_v25 = vcombine.low %v5444_v5, %v5446_v12  ;;  %v12990_v4 = vcombine.high %v14825_v41, %v14832_v46  ;;  %v12992_v5 = vcombine.high %v14835_v47, %v14838_v48 }
 0x584   : > { %13181 = vmatmul.mubr.msk.bf16.vlgmr.msra.gmra.mrb[116].mxu0 %vm634_vm2, %v14282_v8  ;;  %13182 = vmatmul.mubr.msk.bf16.vlgmr.msra.gmra.mrb[116].mxu1 %vm634_vm2, %v14282_v8  ;;  %v4062_v12 = vrot.slane %v14774_v10, %v14706_v20  ;;  %v12989_v17 = vcombine.low %v14825_v41, %v14832_v46  ;;  %v12991_v18 = vcombine.low %v14835_v47, %v14838_v48 }
 0x585   : > { %v10814_v36 = vrot.slane %v10792_v24, %v14701_v19  ;;  %v10821_v37 = vrot.slane %v10793_v25, %v14701_v19  ;;  %7665 = vmatpush1.bf16.msra.mxu0 %v12729_v9  ;;  %7706 = vmatpush1.bf16.msra.mxu1 %v12731_v16  ;;  %v1058_v16 = vld [vmem:[%s14248_s9 + $0x5f8] sm:$0xff]  ;;  %v4066_v24 = vrot.slane %v14774_v10, %v14722_v35 }
 0x586   : > { %7666 = vmatprep.subr.bf16.mxu0 %v12986_v21  ;;  %7707 = vmatprep.subr.bf16.mxu1 %v12988_v22  ;;  %v4058_v21 = vrot.slane %v14774_v10, %v14718_v29  ;;  %v12738_v25 = vcombine.high %v14856_v6, %v1057_v13  ;;  %v14894_v10 = vld [vmem:[%s14248_s9 + $0x9f8] sm:$0xff] }
 0x587   : > { %v10823_v42 = vcombine.low %v10814_v36, %v10821_v37  ;;  %v5484_v43 = vpop.f32.mrb[12].mxu0  ;;  %v5525_v44 = vpop.f32.mrb[12].mxu1  ;;  %7696 = vmatprep.mubr.bf16.mxu0 %v13829_v61  ;;  %7737 = vmatprep.mubr.bf16.mxu1 %v13829_v61 }
 0x588   : > { %v5485_v50 = vadd.f32 %v5484_v43, %v4038_v26  ;;  %v5526_v51 = vadd.f32 %v5525_v44, %v4046_v27  ;;  %v5486_v52 = vpop.f32.mrb[13].mxu0  ;;  %v5527_v53 = vpop.f32.mrb[13].mxu1  ;;  %v12740_v26 = vcombine.high %v930_v14, %v1058_v16  ;;  %v14884_v27 = vld [vmem:[%s14248_s9 + $0x9f0] sm:$0xff] }
 0x589   : > { %v10837_v57 = vrot.slane %v10823_v42, %v14701_v19  ;;  %v5487_v58 = vadd.f32 %v5486_v52, %v4042_v34  ;;  %v5528_v0 = vadd.f32 %v5527_v53, %v4050_v38  ;;  %7667 = vmatpush1.bf16.msra.mxu0 %v12985_v32  ;;  %7708 = vmatpush1.bf16.msra.mxu1 %v12987_v33  ;;  %v5488_v1 = vpop.f32.mrb[14].mxu0  ;;  %v5529_v2 = vpop.f32.mrb[14].mxu1  ;;  %v14891_v32 = vld [vmem:[%s14248_s9 + $0xdf0] sm:$0xff]  ;;  %v1314_v33 = vld [vmem:[%s14248_s9 + $0xdf8] sm:$0xff] }
 0x58a   : > { %v5489_v63 = vpop.f32.mrb[15].mxu0  ;;  %v5530_v59 = vpop.f32.mrb[15].mxu1  ;;  %7746 = vmatprep.subr.bf16.mxu0 %v12734_v39  ;;  %7787 = vmatprep.subr.bf16.mxu1 %v12736_v40  ;;  %v12737_v39 = vcombine.low %v14856_v6, %v1057_v13  ;;  %v14899_v40 = vld [vmem:[%s14658_s11 + $0x10] sm:$0xff]  ;;  %v12994_v48 = vcombine.high %v14884_v27, %v14891_v32  ;;  %v12993_v1 = vcombine.low %v14884_v27, %v14891_v32 }
 0x58b   : > { %v10838_v7 = vcombine.low %v10830_v49, %v10837_v57  ;;  %v10839_v9 = vcombine.low %v5485_v50, %v5487_v58  ;;  %v10840_v11 = vcombine.low %v5526_v51, %v5528_v0  ;;  %v12996_v49 = vcombine.high %v14894_v10, %v1314_v33  ;;  %v14905_v50 = vld [vmem:[%s14248_s9 + $0x200] sm:$0xff]  ;;  %v14915_v58 = vld [vmem:[%s14248_s9 + $0x208] sm:$0xff] }
 0x58c   : > { %13183 = vmatmul.mubr.msk.bf16.vlgmr.msra.gmra.mrb[120].mxu0 %vm634_vm2, %v14282_v8  ;;  %13184 = vmatmul.mubr.msk.bf16.vlgmr.msra.gmra.mrb[120].mxu1 %vm634_vm2, %v14282_v8  ;;  %v4070_v53 = vrot.slane %v14899_v40, %v14653_v55  ;;  %v14912_v57 = vld [vmem:[%s14248_s9 + $0x600] sm:$0xff]  ;;  %v1060_v0 = vld [vmem:[%s14248_s9 + $0x608] sm:$0xff]  ;;  %v12995_v2 = vcombine.low %v14894_v10, %v1314_v33  ;;  %v4074_v63 = vrot.slane %v14899_v40, %v14664_v60 }
 0x58d   : > { %12390 = vst [vmem:[%s14847_s24] sm:$0xff] %v10838_v7  ;;  %v14875_v22 = vrot.slane %v10839_v9, %v14701_v19  ;;  %v14878_v23 = vrot.slane %v10840_v11, %v14701_v19  ;;  %7747 = vmatpush1.bf16.msra.mxu0 %v12733_v45  ;;  %7788 = vmatpush1.bf16.msra.mxu1 %v12735_v54  ;;  %v14935_v7 = vld [vmem:[%s14248_s9 + $0xa00] sm:$0xff] }
 0x58e   : > { %7748 = vmatprep.subr.bf16.mxu0 %v12990_v4  ;;  %7789 = vmatprep.subr.bf16.mxu1 %v12992_v5  ;;  %v12739_v45 = vcombine.low %v930_v14, %v1058_v16  ;;  %v4078_v54 = vrot.slane %v14899_v40, %v14656_v56  ;;  %v4082_v4 = vrot.slane %v14899_v40, %v14667_v62  ;;  %v14942_v14 = vld [vmem:[%s14248_s9 + $0xe00] sm:$0xff]  ;;  %v14945_v16 = vld [vmem:[%s14248_s9 + $0xa08] sm:$0xff] }
 0x58f   : > { %v10871_v28 = vcombine.low %v14875_v22, %v14878_v23  ;;  %v5566_v30 = vpop.f32.mrb[16].mxu0  ;;  %v5607_v31 = vpop.f32.mrb[16].mxu1  ;;  %7778 = vmatprep.mubr.bf16.mxu0 %v13829_v61  ;;  %7819 = vmatprep.mubr.bf16.mxu1 %v13829_v61  ;;  %v12742_v5 = vcombine.high %v14905_v50, %v14912_v57  ;;  %v12744_v6 = vcombine.high %v14915_v58, %v1060_v0 }
 0x590   : > { %v5567_v34 = vadd.f32 %v5566_v30, %v4054_v3  ;;  %v5608_v36 = vadd.f32 %v5607_v31, %v4062_v12  ;;  %v5568_v37 = vpop.f32.mrb[17].mxu0  ;;  %v5609_v38 = vpop.f32.mrb[17].mxu1  ;;  %v12741_v13 = vcombine.low %v14905_v50, %v14912_v57  ;;  %v4086_v33 = vrot.slane %v14899_v40, %v14695_v15 }
 0x591   : > { %v5569_v41 = vadd.f32 %v5568_v37, %v4058_v21  ;;  %v5610_v42 = vadd.f32 %v5609_v38, %v4066_v24  ;;  %7749 = vmatpush1.bf16.msra.mxu0 %v12989_v17  ;;  %7790 = vmatpush1.bf16.msra.mxu1 %v12991_v18  ;;  %v5570_v43 = vpop.f32.mrb[18].mxu0  ;;  %v5611_v44 = vpop.f32.mrb[18].mxu1  ;;  %v1316_v17 = vld [vmem:[%s14248_s9 + $0xe08] sm:$0xff]  ;;  %v10879_v18 = vrot.slane %v10871_v28, %v14701_v19  ;;  %v14957_v37 = vld [vmem:[%s14248_s9 + $0x210] sm:$0xff] }
 0x592   : > { %v5571_v46 = vpop.f32.mrb[19].mxu0  ;;  %v5612_v47 = vpop.f32.mrb[19].mxu1  ;;  %7828 = vmatprep.subr.bf16.mxu0 %v12738_v25  ;;  %7869 = vmatprep.subr.bf16.mxu1 %v12740_v26  ;;  %v12743_v25 = vcombine.low %v14915_v58, %v1060_v0  ;;  %v1061_v43 = vld [vmem:[%s14248_s9 + $0x610] sm:$0xff]  ;;  %v934_v44 = vld [vmem:[%s14248_s9 + $0x218] sm:$0xff] }
 0x593   : > { %v10841_v51 = vcombine.low %v5567_v34, %v5569_v41  ;;  %v10842_v52 = vcombine.low %v5608_v36, %v5610_v42  ;;  %v12998_v34 = vcombine.high %v14935_v7, %v14942_v14  ;;  %v13000_v36 = vcombine.high %v14945_v16, %v1316_v17 }
 0x594   : > { %13185 = vmatmul.mubr.msk.bf16.vlgmr.msra.gmra.mrb[124].mxu0 %vm634_vm2, %v14282_v8  ;;  %13186 = vmatmul.mubr.msk.bf16.vlgmr.msra.gmra.mrb[124].mxu1 %vm634_vm2, %v14282_v8  ;;  %v4094_v42 = vrot.slane %v14899_v40, %v14706_v20  ;;  %v12997_v46 = vcombine.low %v14935_v7, %v14942_v14  ;;  %v12999_v47 = vcombine.low %v14945_v16, %v1316_v17 }
 0x595   : > { %v10863_v59 = vrot.slane %v10841_v51, %v14701_v19  ;;  %v10870_v3 = vrot.slane %v10842_v52, %v14701_v19  ;;  %7829 = vmatpush1.bf16.msra.mxu0 %v12737_v39  ;;  %7870 = vmatpush1.bf16.msra.mxu1 %v12739_v45  ;;  %v1062_v45 = vld [vmem:[%s14248_s9 + $0x618] sm:$0xff]  ;;  %v4098_v51 = vrot.slane %v14899_v40, %v14722_v35 }
 0x596   : > { %7830 = vmatprep.subr.bf16.mxu0 %v12994_v48  ;;  %7871 = vmatprep.subr.bf16.mxu1 %v12996_v49  ;;  %v4090_v48 = vrot.slane %v14899_v40, %v14718_v29  ;;  %v12746_v52 = vcombine.high %v14957_v37, %v1061_v43  ;;  %v14994_v40 = vld [vmem:[%s14248_s9 + $0xa18] sm:$0xff] }
 0x597   : > { %v10872_v9 = vcombine.low %v10863_v59, %v10870_v3  ;;  %v5648_v11 = vpop.f32.mrb[20].mxu0  ;;  %v5689_v12 = vpop.f32.mrb[20].mxu1  ;;  %7860 = vmatprep.mubr.bf16.mxu0 %v13829_v61  ;;  %7901 = vmatprep.mubr.bf16.mxu1 %v13829_v61 }
 0x598   : > { %v5649_v21 = vadd.f32 %v5648_v11, %v4070_v53  ;;  %v5690_v22 = vadd.f32 %v5689_v12, %v4078_v54  ;;  %v5650_v23 = vpop.f32.mrb[21].mxu0  ;;  %v5691_v24 = vpop.f32.mrb[21].mxu1  ;;  %v12748_v53 = vcombine.high %v934_v44, %v1062_v45  ;;  %v14984_v54 = vld [vmem:[%s14248_s9 + $0xa10] sm:$0xff] }
 0x599   : > { %v10886_v26 = vrot.slane %v10872_v9, %v14701_v19  ;;  %v5651_v27 = vadd.f32 %v5650_v23, %v4074_v63  ;;  %v5692_v30 = vadd.f32 %v5691_v24, %v4082_v4  ;;  %7831 = vmatpush1.bf16.msra.mxu0 %v12993_v1  ;;  %7872 = vmatpush1.bf16.msra.mxu1 %v12995_v2  ;;  %v5652_v31 = vpop.f32.mrb[22].mxu0  ;;  %v5693_v32 = vpop.f32.mrb[22].mxu1  ;;  %v14991_v1 = vld [vmem:[%s14248_s9 + $0xe10] sm:$0xff]  ;;  %v1318_v2 = vld [vmem:[%s14248_s9 + $0xe18] sm:$0xff] }
 0x59a   : > { %v5653_v10 = vpop.f32.mrb[23].mxu0  ;;  %v5694_v28 = vpop.f32.mrb[23].mxu1  ;;  %7910 = vmatprep.subr.bf16.mxu0 %v12742_v5  ;;  %7951 = vmatprep.subr.bf16.mxu1 %v12744_v6  ;;  %v12745_v5 = vcombine.low %v14957_v37, %v1061_v43  ;;  %v14999_v6 = vld [vmem:[%s14658_s11 + $0x18] sm:$0xff]  ;;  %v13002_v17 = vcombine.high %v14984_v54, %v14991_v1  ;;  %v13001_v31 = vcombine.low %v14984_v54, %v14991_v1 }
 0x59b   : > { %v10887_v38 = vcombine.low %v10879_v18, %v10886_v26  ;;  %v10888_v39 = vcombine.low %v5649_v21, %v5651_v27  ;;  %v10889_v41 = vcombine.low %v5690_v22, %v5692_v30  ;;  %v13004_v18 = vcombine.high %v14994_v40, %v1318_v2  ;;  %v15005_v21 = vld [vmem:[%s14248_s9 + $0x220] sm:$0xff]  ;;  %v15015_v27 = vld [vmem:[%s14248_s9 + $0x228] sm:$0xff] }
 0x59c   : > { %13187 = vmatmul.mubr.msk.bf16.vlgmr.msra.gmra.mrb[128].mxu0 %vm634_vm2, %v14282_v8  ;;  %13188 = vmatmul.mubr.msk.bf16.vlgmr.msra.gmra.mrb[128].mxu1 %vm634_vm2, %v14282_v8  ;;  %v4102_v24 = vrot.slane %v14999_v6, %v14653_v55  ;;  %v15012_v26 = vld [vmem:[%s14248_s9 + $0x620] sm:$0xff]  ;;  %v1064_v30 = vld [vmem:[%s14248_s9 + $0x628] sm:$0xff]  ;;  %v13003_v32 = vcombine.low %v14994_v40, %v1318_v2  ;;  %v4106_v10 = vrot.slane %v14999_v6, %v14664_v60 }
 0x59d   : > { %12391 = vst [vmem:[%s14847_s24 + $0x8] sm:$0xff] %v10887_v38  ;;  %v14975_v49 = vrot.slane %v10888_v39, %v14701_v19  ;;  %v14978_v50 = vrot.slane %v10889_v41, %v14701_v19  ;;  %7911 = vmatpush1.bf16.msra.mxu0 %v12741_v13  ;;  %7952 = vmatpush1.bf16.msra.mxu1 %v12743_v25  ;;  %v15035_v38 = vld [vmem:[%s14248_s9 + $0xa20] sm:$0xff] }
 0x59e   : > { %7912 = vmatprep.subr.bf16.mxu0 %v12998_v34  ;;  %7953 = vmatprep.subr.bf16.mxu1 %v13000_v36  ;;  %v12747_v13 = vcombine.low %v934_v44, %v1062_v45  ;;  %v4110_v25 = vrot.slane %v14999_v6, %v14656_v56  ;;  %v4114_v34 = vrot.slane %v14999_v6, %v14667_v62  ;;  %v15042_v44 = vld [vmem:[%s14248_s9 + $0xe20] sm:$0xff]  ;;  %v15045_v45 = vld [vmem:[%s14248_s9 + $0xa28] sm:$0xff] }
 0x59f   : > { %v10920_v57 = vcombine.low %v14975_v49, %v14978_v50  ;;  %v5730_v58 = vpop.f32.mrb[24].mxu0  ;;  %v5771_v0 = vpop.f32.mrb[24].mxu1  ;;  %7942 = vmatprep.mubr.bf16.mxu0 %v13829_v61  ;;  %7983 = vmatprep.mubr.bf16.mxu1 %v13829_v61  ;;  %v12750_v36 = vcombine.high %v15005_v21, %v15012_v26  ;;  %v12752_v37 = vcombine.high %v15015_v27, %v1064_v30 }
 0x5a0   : > { %v5731_v63 = vadd.f32 %v5730_v58, %v4086_v33  ;;  %v5772_v59 = vadd.f32 %v5771_v0, %v4094_v42  ;;  %v5732_v3 = vpop.f32.mrb[25].mxu0  ;;  %v5773_v4 = vpop.f32.mrb[25].mxu1  ;;  %v12749_v43 = vcombine.low %v15005_v21, %v15012_v26  ;;  %v4118_v2 = vrot.slane %v14999_v6, %v14695_v15 }
 0x5a1   : > { %v5733_v7 = vadd.f32 %v5732_v3, %v4090_v48  ;;  %v5774_v9 = vadd.f32 %v5773_v4, %v4098_v51  ;;  %7913 = vmatpush1.bf16.msra.mxu0 %v12997_v46  ;;  %7954 = vmatpush1.bf16.msra.mxu1 %v12999_v47  ;;  %v5734_v11 = vpop.f32.mrb[26].mxu0  ;;  %v5775_v12 = vpop.f32.mrb[26].mxu1  ;;  %v1320_v46 = vld [vmem:[%s14248_s9 + $0xe28] sm:$0xff]  ;;  %v10928_v47 = vrot.slane %v10920_v57, %v14701_v19  ;;  %v15057_v3 = vld [vmem:[%s14248_s9 + $0x230] sm:$0xff] }
 0x5a2   : > { %v5735_v14 = vpop.f32.mrb[27].mxu0  ;;  %v5776_v16 = vpop.f32.mrb[27].mxu1  ;;  %7992 = vmatprep.subr.bf16.mxu0 %v12746_v52  ;;  %8033 = vmatprep.subr.bf16.mxu1 %v12748_v53  ;;  %v12751_v52 = vcombine.low %v15015_v27, %v1064_v30  ;;  %v1065_v11 = vld [vmem:[%s14248_s9 + $0x630] sm:$0xff]  ;;  %v938_v12 = vld [vmem:[%s14248_s9 + $0x238] sm:$0xff] }
 0x5a3   : > { %v10890_v22 = vcombine.low %v5731_v63, %v5733_v7  ;;  %v10891_v23 = vcombine.low %v5772_v59, %v5774_v9  ;;  %v13006_v63 = vcombine.high %v15035_v38, %v15042_v44  ;;  %v13008_v59 = vcombine.high %v15045_v45, %v1320_v46 }
 0x5a4   : > { %13189 = vmatmul.mubr.msk.bf16.vlgmr.msra.gmra.mrb[132].mxu0 %vm634_vm2, %v14282_v8  ;;  %13190 = vmatmul.mubr.msk.bf16.vlgmr.msra.gmra.mrb[132].mxu1 %vm634_vm2, %v14282_v8  ;;  %v4126_v9 = vrot.slane %v14999_v6, %v14706_v20  ;;  %v13005_v14 = vcombine.low %v15035_v38, %v15042_v44  ;;  %v13007_v16 = vcombine.low %v15045_v45, %v1320_v46 }
 0x5a5   : > { %v10912_v28 = vrot.slane %v10890_v22, %v14701_v19  ;;  %v10919_v33 = vrot.slane %v10891_v23, %v14701_v19  ;;  %7993 = vmatpush1.bf16.msra.mxu0 %v12745_v5  ;;  %8034 = vmatpush1.bf16.msra.mxu1 %v12747_v13  ;;  %v1066_v13 = vld [vmem:[%s14248_s9 + $0x638] sm:$0xff]  ;;  %v4130_v22 = vrot.slane %v14999_v6, %v14722_v35 }
 0x5a6   : > { %7994 = vmatprep.subr.bf16.mxu0 %v13002_v17  ;;  %8035 = vmatprep.subr.bf16.mxu1 %v13004_v18  ;;  %v4122_v17 = vrot.slane %v14999_v6, %v14718_v29  ;;  %v12754_v23 = vcombine.high %v15057_v3, %v1065_v11  ;;  %v15094_v6 = vld [vmem:[%s14248_s9 + $0xa38] sm:$0xff] }
 0x5a7   : > { %v10921_v39 = vcombine.low %v10912_v28, %v10919_v33  ;;  %v5812_v41 = vpop.f32.mrb[28].mxu0  ;;  %v5853_v42 = vpop.f32.mrb[28].mxu1  ;;  %8024 = vmatprep.mubr.bf16.mxu0 %v13829_v61  ;;  %8065 = vmatprep.mubr.bf16.mxu1 %v13829_v61 }
 0x5a8   : > { %v5813_v48 = vadd.f32 %v5812_v41, %v4102_v24  ;;  %v5854_v49 = vadd.f32 %v5853_v42, %v4110_v25  ;;  %v5814_v50 = vpop.f32.mrb[29].mxu0  ;;  %v5855_v51 = vpop.f32.mrb[29].mxu1  ;;  %v12756_v24 = vcombine.high %v938_v12, %v1066_v13  ;;  %v15084_v25 = vld [vmem:[%s14248_s9 + $0xa30] sm:$0xff] }
 0x5a9   : > { %v10935_v53 = vrot.slane %v10921_v39, %v14701_v19  ;;  %v5815_v54 = vadd.f32 %v5814_v50, %v4106_v10  ;;  %v5856_v58 = vadd.f32 %v5855_v51, %v4114_v34  ;;  %7995 = vmatpush1.bf16.msra.mxu0 %v13001_v31  ;;  %8036 = vmatpush1.bf16.msra.mxu1 %v13003_v32  ;;  %v5816_v0 = vpop.f32.mrb[30].mxu0  ;;  %v5857_v1 = vpop.f32.mrb[30].mxu1  ;;  %v15091_v31 = vld [vmem:[%s14248_s9 + $0xe30] sm:$0xff]  ;;  %v1322_v32 = vld [vmem:[%s14248_s9 + $0xe38] sm:$0xff] }
 0x5aa   : > { %v5817_v40 = vpop.f32.mrb[31].mxu0  ;;  %v5858_v57 = vpop.f32.mrb[31].mxu1  ;;  %8074 = vmatprep.subr.bf16.mxu0 %v12750_v36  ;;  %8115 = vmatprep.subr.bf16.mxu1 %v12752_v37  ;;  %v12753_v36 = vcombine.low %v15057_v3, %v1065_v11  ;;  %v15099_v37 = vld [vmem:[%s14658_s11 + $0x20] sm:$0xff]  ;;  %v13010_v46 = vcombine.high %v15084_v25, %v15091_v31  ;;  %v13009_v0 = vcombine.low %v15084_v25, %v15091_v31 }
 0x5ab   : > { %v10936_v4 = vcombine.low %v10928_v47, %v10935_v53  ;;  %v10937_v5 = vcombine.low %v5813_v48, %v5815_v54  ;;  %v10938_v7 = vcombine.low %v5854_v49, %v5856_v58  ;;  %v13012_v47 = vcombine.high %v15094_v6, %v1322_v32  ;;  %v15105_v48 = vld [vmem:[%s14248_s9 + $0x240] sm:$0xff]  ;;  %v15115_v54 = vld [vmem:[%s14248_s9 + $0x248] sm:$0xff] }
 0x5ac   : > { %13191 = vmatmul.mubr.msk.bf16.vlgmr.msra.gmra.mrb[136].mxu0 %vm634_vm2, %v14282_v8  ;;  %13192 = vmatmul.mubr.msk.bf16.vlgmr.msra.gmra.mrb[136].mxu1 %vm634_vm2, %v14282_v8  ;;  %v4134_v51 = vrot.slane %v15099_v37, %v14653_v55  ;;  %v15112_v53 = vld [vmem:[%s14248_s9 + $0x640] sm:$0xff]  ;;  %v1068_v58 = vld [vmem:[%s14248_s9 + $0x648] sm:$0xff]  ;;  %v13011_v1 = vcombine.low %v15094_v6, %v1322_v32  ;;  %v4138_v40 = vrot.slane %v15099_v37, %v14664_v60 }
 0x5ad   : > { %12392 = vst [vmem:[%s14847_s24 + $0x10] sm:$0xff] %v10936_v4  ;;  %v15075_v18 = vrot.slane %v10937_v5, %v14701_v19  ;;  %v15078_v21 = vrot.slane %v10938_v7, %v14701_v19  ;;  %8075 = vmatpush1.bf16.msra.mxu0 %v12749_v43  ;;  %8116 = vmatpush1.bf16.msra.mxu1 %v12751_v52  ;;  %v15135_v4 = vld [vmem:[%s14248_s9 + $0xa40] sm:$0xff] }
 0x5ae   : > { %8076 = vmatprep.subr.bf16.mxu0 %v13006_v63  ;;  %8117 = vmatprep.subr.bf16.mxu1 %v13008_v59  ;;  %v12755_v43 = vcombine.low %v938_v12, %v1066_v13  ;;  %v4142_v52 = vrot.slane %v15099_v37, %v14656_v56  ;;  %v4146_v63 = vrot.slane %v15099_v37, %v14667_v62  ;;  %v15142_v12 = vld [vmem:[%s14248_s9 + $0xe40] sm:$0xff]  ;;  %v15145_v13 = vld [vmem:[%s14248_s9 + $0xa48] sm:$0xff] }
 0x5af   : > { %v10969_v26 = vcombine.low %v15075_v18, %v15078_v21  ;;  %v5894_v27 = vpop.f32.mrb[32].mxu0  ;;  %v5935_v30 = vpop.f32.mrb[32].mxu1  ;;  %8106 = vmatprep.mubr.bf16.mxu0 %v13829_v61  ;;  %8147 = vmatprep.mubr.bf16.mxu1 %v13829_v61  ;;  %v12758_v59 = vcombine.high %v15105_v48, %v15112_v53  ;;  %v12760_v3 = vcombine.high %v15115_v54, %v1068_v58 }
 0x5b0   : > { %v5895_v10 = vadd.f32 %v5894_v27, %v4118_v2  ;;  %v5936_v28 = vadd.f32 %v5935_v30, %v4126_v9  ;;  %v5896_v33 = vpop.f32.mrb[33].mxu0  ;;  %v5937_v34 = vpop.f32.mrb[33].mxu1  ;;  %v12757_v11 = vcombine.low %v15105_v48, %v15112_v53  ;;  %v4150_v32 = vrot.slane %v15099_v37, %v14695_v15 }
 0x5b1   : > { %v5897_v38 = vadd.f32 %v5896_v33, %v4122_v17  ;;  %v5938_v39 = vadd.f32 %v5937_v34, %v4130_v22  ;;  %8077 = vmatpush1.bf16.msra.mxu0 %v13005_v14  ;;  %8118 = vmatpush1.bf16.msra.mxu1 %v13007_v16  ;;  %v5898_v41 = vpop.f32.mrb[34].mxu0  ;;  %v5939_v42 = vpop.f32.mrb[34].mxu1  ;;  %v1324_v14 = vld [vmem:[%s14248_s9 + $0xe48] sm:$0xff]  ;;  %v10977_v16 = vrot.slane %v10969_v26, %v14701_v19  ;;  %v15157_v33 = vld [vmem:[%s14248_s9 + $0x250] sm:$0xff] }
 0x5b2   : > { %v5899_v44 = vpop.f32.mrb[35].mxu0  ;;  %v5940_v45 = vpop.f32.mrb[35].mxu1  ;;  %8156 = vmatprep.subr.bf16.mxu0 %v12754_v23  ;;  %8197 = vmatprep.subr.bf16.mxu1 %v12756_v24  ;;  %v12759_v23 = vcombine.low %v15115_v54, %v1068_v58  ;;  %v1069_v41 = vld [vmem:[%s14248_s9 + $0x650] sm:$0xff]  ;;  %v942_v42 = vld [vmem:[%s14248_s9 + $0x258] sm:$0xff] }
 0x5b3   : > { %v10939_v49 = vcombine.low %v5895_v10, %v5897_v38  ;;  %v10940_v50 = vcombine.low %v5936_v28, %v5938_v39  ;;  %v13014_v10 = vcombine.high %v15135_v4, %v15142_v12  ;;  %v13016_v28 = vcombine.high %v15145_v13, %v1324_v14 }
 0x5b4   : > { %13193 = vmatmul.mubr.msk.bf16.vlgmr.msra.gmra.mrb[140].mxu0 %vm634_vm2, %v14282_v8  ;;  %13194 = vmatmul.mubr.msk.bf16.vlgmr.msra.gmra.mrb[140].mxu1 %vm634_vm2, %v14282_v8  ;;  %v4158_v39 = vrot.slane %v15099_v37, %v14706_v20  ;;  %v13013_v44 = vcombine.low %v15135_v4, %v15142_v12  ;;  %v13015_v45 = vcombine.low %v15145_v13, %v1324_v14 }
 0x5b5   : > { %v10961_v57 = vrot.slane %v10939_v49, %v14701_v19  ;;  %v10968_v2 = vrot.slane %v10940_v50, %v14701_v19  ;;  %8157 = vmatpush1.bf16.msra.mxu0 %v12753_v36  ;;  %8198 = vmatpush1.bf16.msra.mxu1 %v12755_v43  ;;  %v1070_v43 = vld [vmem:[%s14248_s9 + $0x658] sm:$0xff]  ;;  %v4162_v49 = vrot.slane %v15099_v37, %v14722_v35 }
 0x5b6   : > { %8158 = vmatprep.subr.bf16.mxu0 %v13010_v46  ;;  %8199 = vmatprep.subr.bf16.mxu1 %v13012_v47  ;;  %v4154_v46 = vrot.slane %v15099_v37, %v14718_v29  ;;  %v12762_v50 = vcombine.high %v15157_v33, %v1069_v41  ;;  %v15194_v37 = vld [vmem:[%s14248_s9 + $0xa58] sm:$0xff] }
 0x5b7   : > { %v10970_v5 = vcombine.low %v10961_v57, %v10968_v2  ;;  %v5976_v7 = vpop.f32.mrb[36].mxu0  ;;  %v6017_v9 = vpop.f32.mrb[36].mxu1  ;;  %8188 = vmatprep.mubr.bf16.mxu0 %v13829_v61  ;;  %8229 = vmatprep.mubr.bf16.mxu1 %v13829_v61 }
 0x5b8   : > { %v5977_v17 = vadd.f32 %v5976_v7, %v4134_v51  ;;  %v6018_v18 = vadd.f32 %v6017_v9, %v4142_v52  ;;  %v5978_v21 = vpop.f32.mrb[37].mxu0  ;;  %v6019_v22 = vpop.f32.mrb[37].mxu1  ;;  %v12764_v51 = vcombine.high %v942_v42, %v1070_v43  ;;  %v15184_v52 = vld [vmem:[%s14248_s9 + $0xa50] sm:$0xff] }
 0x5b9   : > { %v10984_v24 = vrot.slane %v10970_v5, %v14701_v19  ;;  %v5979_v25 = vadd.f32 %v5978_v21, %v4138_v40  ;;  %v6020_v27 = vadd.f32 %v6019_v22, %v4146_v63  ;;  %8159 = vmatpush1.bf16.msra.mxu0 %v13009_v0  ;;  %8200 = vmatpush1.bf16.msra.mxu1 %v13011_v1  ;;  %v5980_v30 = vpop.f32.mrb[38].mxu0  ;;  %v6021_v31 = vpop.f32.mrb[38].mxu1  ;;  %v15191_v0 = vld [vmem:[%s14248_s9 + $0xe50] sm:$0xff]  ;;  %v1326_v1 = vld [vmem:[%s14248_s9 + $0xe58] sm:$0xff] }
 0x5ba   : > { %v5981_v6 = vpop.f32.mrb[39].mxu0  ;;  %v6022_v26 = vpop.f32.mrb[39].mxu1  ;;  %8238 = vmatprep.subr.bf16.mxu0 %v12758_v59  ;;  %8279 = vmatprep.subr.bf16.mxu1 %v12760_v3  ;;  %v12761_v59 = vcombine.low %v15157_v33, %v1069_v41  ;;  %v15199_v3 = vld [vmem:[%s14658_s11 + $0x28] sm:$0xff]  ;;  %v13018_v14 = vcombine.high %v15184_v52, %v15191_v0  ;;  %v13017_v30 = vcombine.low %v15184_v52, %v15191_v0 }
 0x5bb   : > { %v10985_v34 = vcombine.low %v10977_v16, %v10984_v24  ;;  %v10986_v36 = vcombine.low %v5977_v17, %v5979_v25  ;;  %v10987_v38 = vcombine.low %v6018_v18, %v6020_v27  ;;  %v13020_v16 = vcombine.high %v15194_v37, %v1326_v1  ;;  %v15205_v17 = vld [vmem:[%s14248_s9 + $0x260] sm:$0xff]  ;;  %v15215_v25 = vld [vmem:[%s14248_s9 + $0x268] sm:$0xff] }
 0x5bc   : > { %13195 = vmatmul.mubr.msk.bf16.vlgmr.msra.gmra.mrb[144].mxu0 %vm634_vm2, %v14282_v8  ;;  %13196 = vmatmul.mubr.msk.bf16.vlgmr.msra.gmra.mrb[144].mxu1 %vm634_vm2, %v14282_v8  ;;  %v4166_v22 = vrot.slane %v15199_v3, %v14653_v55  ;;  %v15212_v24 = vld [vmem:[%s14248_s9 + $0x660] sm:$0xff]  ;;  %v1072_v27 = vld [vmem:[%s14248_s9 + $0x668] sm:$0xff]  ;;  %v13019_v31 = vcombine.low %v15194_v37, %v1326_v1  ;;  %v4170_v6 = vrot.slane %v15199_v3, %v14664_v60 }
 0x5bd   : > { %12393 = vst [vmem:[%s14847_s24 + $0x18] sm:$0xff] %v10985_v34  ;;  %v15175_v47 = vrot.slane %v10986_v36, %v14701_v19  ;;  %v15178_v48 = vrot.slane %v10987_v38, %v14701_v19  ;;  %8239 = vmatpush1.bf16.msra.mxu0 %v12757_v11  ;;  %8280 = vmatpush1.bf16.msra.mxu1 %v12759_v23  ;;  %v15235_v34 = vld [vmem:[%s14248_s9 + $0xa60] sm:$0xff] }
 0x5be   : > { %8240 = vmatprep.subr.bf16.mxu0 %v13014_v10  ;;  %8281 = vmatprep.subr.bf16.mxu1 %v13016_v28  ;;  %v12763_v11 = vcombine.low %v942_v42, %v1070_v43  ;;  %v4174_v23 = vrot.slane %v15199_v3, %v14656_v56  ;;  %v4178_v10 = vrot.slane %v15199_v3, %v14667_v62  ;;  %v15242_v42 = vld [vmem:[%s14248_s9 + $0xe60] sm:$0xff]  ;;  %v15245_v43 = vld [vmem:[%s14248_s9 + $0xa68] sm:$0xff] }
 0x5bf   : > { %v11018_v53 = vcombine.low %v15175_v47, %v15178_v48  ;;  %v6058_v54 = vpop.f32.mrb[40].mxu0  ;;  %v6099_v58 = vpop.f32.mrb[40].mxu1  ;;  %8270 = vmatprep.mubr.bf16.mxu0 %v13829_v61  ;;  %8311 = vmatprep.mubr.bf16.mxu1 %v13829_v61  ;;  %v12766_v28 = vcombine.high %v15205_v17, %v15212_v24  ;;  %v12768_v33 = vcombine.high %v15215_v25, %v1072_v27 }
 0x5c0   : > { %v6059_v40 = vadd.f32 %v6058_v54, %v4150_v32  ;;  %v6100_v57 = vadd.f32 %v6099_v58, %v4158_v39  ;;  %v6060_v2 = vpop.f32.mrb[41].mxu0  ;;  %v6101_v63 = vpop.f32.mrb[41].mxu1  ;;  %v12765_v41 = vcombine.low %v15205_v17, %v15212_v24  ;;  %v4182_v1 = vrot.slane %v15199_v3, %v14695_v15 }
 0x5c1   : > { %v6061_v4 = vadd.f32 %v6060_v2, %v4154_v46  ;;  %v6102_v5 = vadd.f32 %v6101_v63, %v4162_v49  ;;  %8241 = vmatpush1.bf16.msra.mxu0 %v13013_v44  ;;  %8282 = vmatpush1.bf16.msra.mxu1 %v13015_v45  ;;  %v6062_v7 = vpop.f32.mrb[42].mxu0  ;;  %v6103_v9 = vpop.f32.mrb[42].mxu1  ;;  %v1328_v44 = vld [vmem:[%s14248_s9 + $0xe68] sm:$0xff]  ;;  %v11026_v45 = vrot.slane %v11018_v53, %v14701_v19  ;;  %v15257_v2 = vld [vmem:[%s14248_s9 + $0x270] sm:$0xff] }
 0x5c2   : > { %v6063_v12 = vpop.f32.mrb[43].mxu0  ;;  %v6104_v13 = vpop.f32.mrb[43].mxu1  ;;  %8320 = vmatprep.subr.bf16.mxu0 %v12762_v50  ;;  %8361 = vmatprep.subr.bf16.mxu1 %v12764_v51  ;;  %v12767_v50 = vcombine.low %v15215_v25, %v1072_v27  ;;  %v1073_v7 = vld [vmem:[%s14248_s9 + $0x670] sm:$0xff]  ;;  %v946_v9 = vld [vmem:[%s14248_s9 + $0x278] sm:$0xff] }
 0x5c3   : > { %v10988_v18 = vcombine.low %v6059_v40, %v6061_v4  ;;  %v10989_v21 = vcombine.low %v6100_v57, %v6102_v5  ;;  %v13022_v40 = vcombine.high %v15235_v34, %v15242_v42  ;;  %v13024_v57 = vcombine.high %v15245_v43, %v1328_v44 }
 0x5c4   : > { %13197 = vmatmul.mubr.msk.bf16.vlgmr.msra.gmra.mrb[148].mxu0 %vm634_vm2, %v14282_v8  ;;  %13198 = vmatmul.mubr.msk.bf16.vlgmr.msra.gmra.mrb[148].mxu1 %vm634_vm2, %v14282_v8  ;;  %v4190_v5 = vrot.slane %v15199_v3, %v14706_v20  ;;  %v13021_v12 = vcombine.low %v15235_v34, %v15242_v42  ;;  %v13023_v13 = vcombine.low %v15245_v43, %v1328_v44 }
 0x5c5   : > { %v11010_v26 = vrot.slane %v10988_v18, %v14701_v19  ;;  %v11017_v32 = vrot.slane %v10989_v21, %v14701_v19  ;;  %8321 = vmatpush1.bf16.msra.mxu0 %v12761_v59  ;;  %8362 = vmatpush1.bf16.msra.mxu1 %v12763_v11  ;;  %v1074_v11 = vld [vmem:[%s14248_s9 + $0x678] sm:$0xff]  ;;  %v4194_v18 = vrot.slane %v15199_v3, %v14722_v35 }
 0x5c6   : > { %8322 = vmatprep.subr.bf16.mxu0 %v13018_v14  ;;  %8363 = vmatprep.subr.bf16.mxu1 %v13020_v16  ;;  %v4186_v14 = vrot.slane %v15199_v3, %v14718_v29  ;;  %v12770_v21 = vcombine.high %v15257_v2, %v1073_v7  ;;  %v15294_v3 = vld [vmem:[%s14248_s9 + $0xa78] sm:$0xff] }
 0x5c7   : > { %v11019_v36 = vcombine.low %v11010_v26, %v11017_v32  ;;  %v6140_v38 = vpop.f32.mrb[44].mxu0  ;;  %v6181_v39 = vpop.f32.mrb[44].mxu1  ;;  %8352 = vmatprep.mubr.bf16.mxu0 %v13829_v61  ;;  %8393 = vmatprep.mubr.bf16.mxu1 %v13829_v61 }
 0x5c8   : > { %v6141_v46 = vadd.f32 %v6140_v38, %v4166_v22  ;;  %v6182_v47 = vadd.f32 %v6181_v39, %v4174_v23  ;;  %v6142_v48 = vpop.f32.mrb[45].mxu0  ;;  %v6183_v49 = vpop.f32.mrb[45].mxu1  ;;  %v12772_v22 = vcombine.high %v946_v9, %v1074_v11  ;;  %v15284_v23 = vld [vmem:[%s14248_s9 + $0xa70] sm:$0xff] }
 0x5c9   : > { %v11033_v51 = vrot.slane %v11019_v36, %v14701_v19  ;;  %v6143_v52 = vadd.f32 %v6142_v48, %v4170_v6  ;;  %v6184_v54 = vadd.f32 %v6183_v49, %v4178_v10  ;;  %8323 = vmatpush1.bf16.msra.mxu0 %v13017_v30  ;;  %8364 = vmatpush1.bf16.msra.mxu1 %v13019_v31  ;;  %v6144_v58 = vpop.f32.mrb[46].mxu0  ;;  %v6185_v0 = vpop.f32.mrb[46].mxu1  ;;  %v15291_v30 = vld [vmem:[%s14248_s9 + $0xe70] sm:$0xff]  ;;  %v1330_v31 = vld [vmem:[%s14248_s9 + $0xe78] sm:$0xff] }
 0x5ca   : > { %v6145_v37 = vpop.f32.mrb[47].mxu0  ;;  %v6186_v53 = vpop.f32.mrb[47].mxu1  ;;  %8402 = vmatprep.subr.bf16.mxu0 %v12766_v28  ;;  %8443 = vmatprep.subr.bf16.mxu1 %v12768_v33  ;;  %v12769_v28 = vcombine.low %v15257_v2, %v1073_v7  ;;  %v15299_v33 = vld [vmem:[%s14658_s11 + $0x30] sm:$0xff]  ;;  %v13026_v44 = vcombine.high %v15284_v23, %v15291_v30  ;;  %v13025_v58 = vcombine.low %v15284_v23, %v15291_v30 }
 0x5cb   : > { %v11034_v63 = vcombine.low %v11026_v45, %v11033_v51  ;;  %v11035_v59 = vcombine.low %v6141_v46, %v6143_v52  ;;  %v11036_v4 = vcombine.low %v6182_v47, %v6184_v54  ;;  %v13028_v45 = vcombine.high %v15294_v3, %v1330_v31  ;;  %v15305_v46 = vld [vmem:[%s14248_s9 + $0x280] sm:$0xff]  ;;  %v15315_v52 = vld [vmem:[%s14248_s9 + $0x288] sm:$0xff] }
 0x5cc   : > { %13199 = vmatmul.mubr.msk.bf16.vlgmr.msra.gmra.mrb[152].mxu0 %vm634_vm2, %v14282_v8  ;;  %13200 = vmatmul.mubr.msk.bf16.vlgmr.msra.gmra.mrb[152].mxu1 %vm634_vm2, %v14282_v8  ;;  %v4198_v49 = vrot.slane %v15299_v33, %v14653_v55  ;;  %v15312_v51 = vld [vmem:[%s14248_s9 + $0x680] sm:$0xff]  ;;  %v1076_v54 = vld [vmem:[%s14248_s9 + $0x688] sm:$0xff]  ;;  %v13027_v0 = vcombine.low %v15294_v3, %v1330_v31  ;;  %v4202_v37 = vrot.slane %v15299_v33, %v14664_v60 }
 0x5cd   : > { %12394 = vst [vmem:[%s14847_s24 + $0x20] sm:$0xff] %v11034_v63  ;;  %v15275_v16 = vrot.slane %v11035_v59, %v14701_v19  ;;  %v15278_v17 = vrot.slane %v11036_v4, %v14701_v19  ;;  %8403 = vmatpush1.bf16.msra.mxu0 %v12765_v41  ;;  %8444 = vmatpush1.bf16.msra.mxu1 %v12767_v50  ;;  %v15335_v63 = vld [vmem:[%s14248_s9 + $0xa80] sm:$0xff] }
 0x5ce   : > { %8404 = vmatprep.subr.bf16.mxu0 %v13022_v40  ;;  %8445 = vmatprep.subr.bf16.mxu1 %v13024_v57  ;;  %v12771_v41 = vcombine.low %v946_v9, %v1074_v11  ;;  %v4206_v50 = vrot.slane %v15299_v33, %v14656_v56  ;;  %v4210_v40 = vrot.slane %v15299_v33, %v14667_v62  ;;  %v15342_v9 = vld [vmem:[%s14248_s9 + $0xe80] sm:$0xff]  ;;  %v15345_v11 = vld [vmem:[%s14248_s9 + $0xa88] sm:$0xff] }
 0x5cf   : > { %v11067_v24 = vcombine.low %v15275_v16, %v15278_v17  ;;  %v6222_v25 = vpop.f32.mrb[48].mxu0  ;;  %v6263_v27 = vpop.f32.mrb[48].mxu1  ;;  %8434 = vmatprep.mubr.bf16.mxu0 %v13829_v61  ;;  %8475 = vmatprep.mubr.bf16.mxu1 %v13829_v61  ;;  %v12774_v57 = vcombine.high %v15305_v46, %v15312_v51  ;;  %v12776_v2 = vcombine.high %v15315_v52, %v1076_v54 }
 0x5d0   : > { %v6223_v6 = vadd.f32 %v6222_v25, %v4182_v1  ;;  %v6264_v26 = vadd.f32 %v6263_v27, %v4190_v5  ;;  %v6224_v32 = vpop.f32.mrb[49].mxu0  ;;  %v6265_v10 = vpop.f32.mrb[49].mxu1  ;;  %v12773_v7 = vcombine.low %v15305_v46, %v15312_v51  ;;  %v4214_v31 = vrot.slane %v15299_v33, %v14695_v15 }
 0x5d1   : > { %v6225_v34 = vadd.f32 %v6224_v32, %v4186_v14  ;;  %v6266_v36 = vadd.f32 %v6265_v10, %v4194_v18  ;;  %8405 = vmatpush1.bf16.msra.mxu0 %v13021_v12  ;;  %8446 = vmatpush1.bf16.msra.mxu1 %v13023_v13  ;;  %v6226_v38 = vpop.f32.mrb[50].mxu0  ;;  %v6267_v39 = vpop.f32.mrb[50].mxu1  ;;  %v1332_v12 = vld [vmem:[%s14248_s9 + $0xe88] sm:$0xff]  ;;  %v11075_v13 = vrot.slane %v11067_v24, %v14701_v19  ;;  %v15357_v32 = vld [vmem:[%s14248_s9 + $0x290] sm:$0xff] }
 0x5d2   : > { %v6227_v42 = vpop.f32.mrb[51].mxu0  ;;  %v6268_v43 = vpop.f32.mrb[51].mxu1  ;;  %8484 = vmatprep.subr.bf16.mxu0 %v12770_v21  ;;  %8525 = vmatprep.subr.bf16.mxu1 %v12772_v22  ;;  %v12775_v21 = vcombine.low %v15315_v52, %v1076_v54  ;;  %v1077_v38 = vld [vmem:[%s14248_s9 + $0x690] sm:$0xff]  ;;  %v950_v39 = vld [vmem:[%s14248_s9 + $0x298] sm:$0xff] }
 0x5d3   : > { %v11037_v47 = vcombine.low %v6223_v6, %v6225_v34  ;;  %v11038_v48 = vcombine.low %v6264_v26, %v6266_v36  ;;  %v13030_v6 = vcombine.high %v15335_v63, %v15342_v9  ;;  %v13032_v26 = vcombine.high %v15345_v11, %v1332_v12 }
 0x5d4   : > { %13201 = vmatmul.mubr.msk.bf16.vlgmr.msra.gmra.mrb[156].mxu0 %vm634_vm2, %v14282_v8  ;;  %13202 = vmatmul.mubr.msk.bf16.vlgmr.msra.gmra.mrb[156].mxu1 %vm634_vm2, %v14282_v8  ;;  %v4222_v36 = vrot.slane %v15299_v33, %v14706_v20  ;;  %v13029_v42 = vcombine.low %v15335_v63, %v15342_v9  ;;  %v13031_v43 = vcombine.low %v15345_v11, %v1332_v12 }
 0x5d5   : > { %v11059_v53 = vrot.slane %v11037_v47, %v14701_v19  ;;  %v11066_v1 = vrot.slane %v11038_v48, %v14701_v19  ;;  %8485 = vmatpush1.bf16.msra.mxu0 %v12769_v28  ;;  %8526 = vmatpush1.bf16.msra.mxu1 %v12771_v41  ;;  %v1078_v41 = vld [vmem:[%s14248_s9 + $0x698] sm:$0xff]  ;;  %v4226_v47 = vrot.slane %v15299_v33, %v14722_v35 }
 0x5d6   : > { %8486 = vmatprep.subr.bf16.mxu0 %v13026_v44  ;;  %8527 = vmatprep.subr.bf16.mxu1 %v13028_v45  ;;  %v4218_v44 = vrot.slane %v15299_v33, %v14718_v29  ;;  %v12778_v48 = vcombine.high %v15357_v32, %v1077_v38  ;;  %v15394_v33 = vld [vmem:[%s14248_s9 + $0xa98] sm:$0xff] }
 0x5d7   : > { %v11068_v59 = vcombine.low %v11059_v53, %v11066_v1  ;;  %v6304_v4 = vpop.f32.mrb[52].mxu0  ;;  %v6345_v5 = vpop.f32.mrb[52].mxu1  ;;  %8516 = vmatprep.mubr.bf16.mxu0 %v13829_v61  ;;  %8557 = vmatprep.mubr.bf16.mxu1 %v13829_v61 }
 0x5d8   : > { %v6305_v14 = vadd.f32 %v6304_v4, %v4198_v49  ;;  %v6346_v16 = vadd.f32 %v6345_v5, %v4206_v50  ;;  %v6306_v17 = vpop.f32.mrb[53].mxu0  ;;  %v6347_v18 = vpop.f32.mrb[53].mxu1  ;;  %v12780_v49 = vcombine.high %v950_v39, %v1078_v41  ;;  %v15384_v50 = vld [vmem:[%s14248_s9 + $0xa90] sm:$0xff] }
 0x5d9   : > { %v11082_v22 = vrot.slane %v11068_v59, %v14701_v19  ;;  %v6307_v23 = vadd.f32 %v6306_v17, %v4202_v37  ;;  %v6348_v25 = vadd.f32 %v6347_v18, %v4210_v40  ;;  %8487 = vmatpush1.bf16.msra.mxu0 %v13025_v58  ;;  %8528 = vmatpush1.bf16.msra.mxu1 %v13027_v0  ;;  %v6308_v27 = vpop.f32.mrb[54].mxu0  ;;  %v6349_v30 = vpop.f32.mrb[54].mxu1  ;;  %v15391_v58 = vld [vmem:[%s14248_s9 + $0xe90] sm:$0xff]  ;;  %v1334_v0 = vld [vmem:[%s14248_s9 + $0xe98] sm:$0xff] }
 0x5da   : > { %v6309_v3 = vpop.f32.mrb[55].mxu0  ;;  %v6350_v24 = vpop.f32.mrb[55].mxu1  ;;  %8566 = vmatprep.subr.bf16.mxu0 %v12774_v57  ;;  %8607 = vmatprep.subr.bf16.mxu1 %v12776_v2  ;;  %v12777_v57 = vcombine.low %v15357_v32, %v1077_v38  ;;  %v15399_v2 = vld [vmem:[%s14658_s11 + $0x38] sm:$0xff]  ;;  %v13034_v12 = vcombine.high %v15384_v50, %v15391_v58  ;;  %v13033_v27 = vcombine.low %v15384_v50, %v15391_v58 }
 0x5db   : > { %v11083_v10 = vcombine.low %v11075_v13, %v11082_v22  ;;  %v11084_v28 = vcombine.low %v6305_v14, %v6307_v23  ;;  %v11085_v34 = vcombine.low %v6346_v16, %v6348_v25  ;;  %v13036_v13 = vcombine.high %v15394_v33, %v1334_v0  ;;  %v15405_v14 = vld [vmem:[%s14248_s9 + $0x2a0] sm:$0xff]  ;;  %v15415_v23 = vld [vmem:[%s14248_s9 + $0x2a8] sm:$0xff] }
 0x5dc   : > { %13203 = vmatmul.mubr.msk.bf16.vlgmr.msra.gmra.mrb[160].mxu0 %vm634_vm2, %v14282_v8  ;;  %13204 = vmatmul.mubr.msk.bf16.vlgmr.msra.gmra.mrb[160].mxu1 %vm634_vm2, %v14282_v8  ;;  %v4230_v18 = vrot.slane %v15399_v2, %v14653_v55  ;;  %v15412_v22 = vld [vmem:[%s14248_s9 + $0x6a0] sm:$0xff]  ;;  %v1080_v25 = vld [vmem:[%s14248_s9 + $0x6a8] sm:$0xff]  ;;  %v13035_v30 = vcombine.low %v15394_v33, %v1334_v0  ;;  %v4234_v3 = vrot.slane %v15399_v2, %v14664_v60 }
 0x5dd   : > { %12395 = vst [vmem:[%s14847_s24 + $0x28] sm:$0xff] %v11083_v10  ;;  %v15375_v45 = vrot.slane %v11084_v28, %v14701_v19  ;;  %v15378_v46 = vrot.slane %v11085_v34, %v14701_v19  ;;  %8567 = vmatpush1.bf16.msra.mxu0 %v12773_v7  ;;  %8608 = vmatpush1.bf16.msra.mxu1 %v12775_v21  ;;  %v15435_v10 = vld [vmem:[%s14248_s9 + $0xaa0] sm:$0xff] }
 0x5de   : > { %8568 = vmatprep.subr.bf16.mxu0 %v13030_v6  ;;  %8609 = vmatprep.subr.bf16.mxu1 %v13032_v26  ;;  %v12779_v7 = vcombine.low %v950_v39, %v1078_v41  ;;  %v4238_v21 = vrot.slane %v15399_v2, %v14656_v56  ;;  %v4242_v6 = vrot.slane %v15399_v2, %v14667_v62  ;;  %v15442_v39 = vld [vmem:[%s14248_s9 + $0xea0] sm:$0xff]  ;;  %v15445_v41 = vld [vmem:[%s14248_s9 + $0xaa8] sm:$0xff] }
 0x5df   : > { %v11116_v51 = vcombine.low %v15375_v45, %v15378_v46  ;;  %v6386_v52 = vpop.f32.mrb[56].mxu0  ;;  %v6427_v54 = vpop.f32.mrb[56].mxu1  ;;  %8598 = vmatprep.mubr.bf16.mxu0 %v13829_v61  ;;  %8639 = vmatprep.mubr.bf16.mxu1 %v13829_v61  ;;  %v12782_v26 = vcombine.high %v15405_v14, %v15412_v22  ;;  %v12784_v32 = vcombine.high %v15415_v23, %v1080_v25 }
 0x5e0   : > { %v6387_v37 = vadd.f32 %v6386_v52, %v4214_v31  ;;  %v6428_v53 = vadd.f32 %v6427_v54, %v4222_v36  ;;  %v6388_v1 = vpop.f32.mrb[57].mxu0  ;;  %v6429_v40 = vpop.f32.mrb[57].mxu1  ;;  %v12781_v38 = vcombine.low %v15405_v14, %v15412_v22  ;;  %v4246_v0 = vrot.slane %v15399_v2, %v14695_v15 }
 0x5e1   : > { %v6389_v63 = vadd.f32 %v6388_v1, %v4218_v44  ;;  %v6430_v59 = vadd.f32 %v6429_v40, %v4226_v47  ;;  %8569 = vmatpush1.bf16.msra.mxu0 %v13029_v42  ;;  %8610 = vmatpush1.bf16.msra.mxu1 %v13031_v43  ;;  %v6390_v4 = vpop.f32.mrb[58].mxu0  ;;  %v6431_v5 = vpop.f32.mrb[58].mxu1  ;;  %v1336_v42 = vld [vmem:[%s14248_s9 + $0xea8] sm:$0xff]  ;;  %v11124_v43 = vrot.slane %v11116_v51, %v14701_v19  ;;  %v15457_v1 = vld [vmem:[%s14248_s9 + $0x2b0] sm:$0xff] }
 0x5e2   : > { %v6391_v9 = vpop.f32.mrb[59].mxu0  ;;  %v6432_v11 = vpop.f32.mrb[59].mxu1  ;;  %8648 = vmatprep.subr.bf16.mxu0 %v12778_v48  ;;  %8689 = vmatprep.subr.bf16.mxu1 %v12780_v49  ;;  %v12783_v48 = vcombine.low %v15415_v23, %v1080_v25  ;;  %v1081_v4 = vld [vmem:[%s14248_s9 + $0x6b0] sm:$0xff]  ;;  %v954_v5 = vld [vmem:[%s14248_s9 + $0x2b8] sm:$0xff] }
 0x5e3   : > { %v11086_v16 = vcombine.low %v6387_v37, %v6389_v63  ;;  %v11087_v17 = vcombine.low %v6428_v53, %v6430_v59  ;;  %v13038_v37 = vcombine.high %v15435_v10, %v15442_v39  ;;  %v13040_v53 = vcombine.high %v15445_v41, %v1336_v42 }
 0x5e4   : > { %13205 = vmatmul.mubr.msk.bf16.vlgmr.msra.gmra.mrb[164].mxu0 %vm634_vm2, %v14282_v8  ;;  %13206 = vmatmul.mubr.msk.bf16.vlgmr.msra.gmra.mrb[164].mxu1 %vm634_vm2, %v14282_v8  ;;  %v4254_v59 = vrot.slane %v15399_v2, %v14706_v20  ;;  %v13037_v9 = vcombine.low %v15435_v10, %v15442_v39  ;;  %v13039_v11 = vcombine.low %v15445_v41, %v1336_v42 }
 0x5e5   : > { %v11108_v24 = vrot.slane %v11086_v16, %v14701_v19  ;;  %v11115_v31 = vrot.slane %v11087_v17, %v14701_v19  ;;  %8649 = vmatpush1.bf16.msra.mxu0 %v12777_v57  ;;  %8690 = vmatpush1.bf16.msra.mxu1 %v12779_v7  ;;  %v1082_v7 = vld [vmem:[%s14248_s9 + $0x6b8] sm:$0xff]  ;;  %v4258_v16 = vrot.slane %v15399_v2, %v14722_v35 }
 0x5e6   : > { %8650 = vmatprep.subr.bf16.mxu0 %v13034_v12  ;;  %8691 = vmatprep.subr.bf16.mxu1 %v13036_v13  ;;  %v4250_v12 = vrot.slane %v15399_v2, %v14718_v29  ;;  %v12786_v17 = vcombine.high %v15457_v1, %v1081_v4  ;;  %v15494_v2 = vld [vmem:[%s14248_s9 + $0xab8] sm:$0xff] }
 0x5e7   : > { %v11117_v28 = vcombine.low %v11108_v24, %v11115_v31  ;;  %v6468_v34 = vpop.f32.mrb[60].mxu0  ;;  %v6509_v36 = vpop.f32.mrb[60].mxu1  ;;  %8680 = vmatprep.mubr.bf16.mxu0 %v13829_v61  ;;  %8721 = vmatprep.mubr.bf16.mxu1 %v13829_v61 }
 0x5e8   : > { %v6469_v44 = vadd.f32 %v6468_v34, %v4230_v18  ;;  %v6510_v45 = vadd.f32 %v6509_v36, %v4238_v21  ;;  %v6470_v46 = vpop.f32.mrb[61].mxu0  ;;  %v6511_v47 = vpop.f32.mrb[61].mxu1  ;;  %v12788_v18 = vcombine.high %v954_v5, %v1082_v7  ;;  %v15484_v21 = vld [vmem:[%s14248_s9 + $0xab0] sm:$0xff] }
 0x5e9   : > { %v11131_v49 = vrot.slane %v11117_v28, %v14701_v19  ;;  %v6471_v50 = vadd.f32 %v6470_v46, %v4234_v3  ;;  %v6512_v52 = vadd.f32 %v6511_v47, %v4242_v6  ;;  %8651 = vmatpush1.bf16.msra.mxu0 %v13033_v27  ;;  %8692 = vmatpush1.bf16.msra.mxu1 %v13035_v30  ;;  %v6472_v54 = vpop.f32.mrb[62].mxu0  ;;  %v6513_v58 = vpop.f32.mrb[62].mxu1  ;;  %v15491_v27 = vld [vmem:[%s14248_s9 + $0xeb0] sm:$0xff]  ;;  %v1338_v30 = vld [vmem:[%s14248_s9 + $0xeb8] sm:$0xff] }
 0x5ea   : > { %v6473_v33 = vpop.f32.mrb[63].mxu0  ;;  %v6514_v51 = vpop.f32.mrb[63].mxu1  ;;  %8730 = vmatprep.subr.bf16.mxu0 %v12782_v26  ;;  %8771 = vmatprep.subr.bf16.mxu1 %v12784_v32  ;;  %v12785_v26 = vcombine.low %v15457_v1, %v1081_v4  ;;  %v15499_v32 = vld [vmem:[%s14658_s11 + $0x40] sm:$0xff]  ;;  %v13042_v42 = vcombine.high %v15484_v21, %v15491_v27  ;;  %v13041_v54 = vcombine.low %v15484_v21, %v15491_v27 }
 0x5eb   : > { %v11132_v40 = vcombine.low %v11124_v43, %v11131_v49  ;;  %v11133_v57 = vcombine.low %v6469_v44, %v6471_v50  ;;  %v11134_v63 = vcombine.low %v6510_v45, %v6512_v52  ;;  %v13044_v43 = vcombine.high %v15494_v2, %v1338_v30  ;;  %v15505_v44 = vld [vmem:[%s14248_s9 + $0x2c0] sm:$0xff]  ;;  %v15515_v50 = vld [vmem:[%s14248_s9 + $0x2c8] sm:$0xff] }
 0x5ec   : > { %13207 = vmatmul.mubr.msk.bf16.vlgmr.msra.gmra.mrb[168].mxu0 %vm634_vm2, %v14282_v8  ;;  %13208 = vmatmul.mubr.msk.bf16.vlgmr.msra.gmra.mrb[168].mxu1 %vm634_vm2, %v14282_v8  ;;  %v4262_v47 = vrot.slane %v15499_v32, %v14653_v55  ;;  %v15512_v49 = vld [vmem:[%s14248_s9 + $0x6c0] sm:$0xff]  ;;  %v1084_v52 = vld [vmem:[%s14248_s9 + $0x6c8] sm:$0xff]  ;;  %v13043_v58 = vcombine.low %v15494_v2, %v1338_v30  ;;  %v4266_v33 = vrot.slane %v15499_v32, %v14664_v60 }
 0x5ed   : > { %12396 = vst [vmem:[%s14847_s24 + $0x30] sm:$0xff] %v11132_v40  ;;  %v15475_v13 = vrot.slane %v11133_v57, %v14701_v19  ;;  %v15478_v14 = vrot.slane %v11134_v63, %v14701_v19  ;;  %8731 = vmatpush1.bf16.msra.mxu0 %v12781_v38  ;;  %8772 = vmatpush1.bf16.msra.mxu1 %v12783_v48  ;;  %v15535_v40 = vld [vmem:[%s14248_s9 + $0xac0] sm:$0xff] }
 0x5ee   : > { %8732 = vmatprep.subr.bf16.mxu0 %v13038_v37  ;;  %8773 = vmatprep.subr.bf16.mxu1 %v13040_v53  ;;  %v12787_v38 = vcombine.low %v954_v5, %v1082_v7  ;;  %v4270_v48 = vrot.slane %v15499_v32, %v14656_v56  ;;  %v4274_v37 = vrot.slane %v15499_v32, %v14667_v62  ;;  %v15542_v5 = vld [vmem:[%s14248_s9 + $0xec0] sm:$0xff]  ;;  %v15545_v7 = vld [vmem:[%s14248_s9 + $0xac8] sm:$0xff] }
 0x5ef   : > { %v11165_v22 = vcombine.low %v15475_v13, %v15478_v14  ;;  %v6550_v23 = vpop.f32.mrb[64].mxu0  ;;  %v6591_v25 = vpop.f32.mrb[64].mxu1  ;;  %8762 = vmatprep.mubr.bf16.mxu0 %v13829_v61  ;;  %8803 = vmatprep.mubr.bf16.mxu1 %v13829_v61  ;;  %v12790_v53 = vcombine.high %v15505_v44, %v15512_v49  ;;  %v12792_v1 = vcombine.high %v15515_v50, %v1084_v52 }
 0x5f0   : > { %v6551_v3 = vadd.f32 %v6550_v23, %v4246_v0  ;;  %v6592_v24 = vadd.f32 %v6591_v25, %v4254_v59  ;;  %v6552_v31 = vpop.f32.mrb[65].mxu0  ;;  %v6593_v6 = vpop.f32.mrb[65].mxu1  ;;  %v12789_v4 = vcombine.low %v15505_v44, %v15512_v49  ;;  %v4278_v30 = vrot.slane %v15499_v32, %v14695_v15 }
 0x5f1   : > { %v6553_v10 = vadd.f32 %v6552_v31, %v4250_v12  ;;  %v6594_v28 = vadd.f32 %v6593_v6, %v4258_v16  ;;  %8733 = vmatpush1.bf16.msra.mxu0 %v13037_v9  ;;  %8774 = vmatpush1.bf16.msra.mxu1 %v13039_v11  ;;  %v6554_v34 = vpop.f32.mrb[66].mxu0  ;;  %v6595_v36 = vpop.f32.mrb[66].mxu1  ;;  %v1340_v9 = vld [vmem:[%s14248_s9 + $0xec8] sm:$0xff]  ;;  %v11173_v11 = vrot.slane %v11165_v22, %v14701_v19  ;;  %v15557_v31 = vld [vmem:[%s14248_s9 + $0x2d0] sm:$0xff] }
 0x5f2   : > { %v6555_v39 = vpop.f32.mrb[67].mxu0  ;;  %v6596_v41 = vpop.f32.mrb[67].mxu1  ;;  %8812 = vmatprep.subr.bf16.mxu0 %v12786_v17  ;;  %8853 = vmatprep.subr.bf16.mxu1 %v12788_v18  ;;  %v12791_v17 = vcombine.low %v15515_v50, %v1084_v52  ;;  %v1085_v34 = vld [vmem:[%s14248_s9 + $0x6d0] sm:$0xff]  ;;  %v958_v36 = vld [vmem:[%s14248_s9 + $0x2d8] sm:$0xff] }
 0x5f3   : > { %v11135_v45 = vcombine.low %v6551_v3, %v6553_v10  ;;  %v11136_v46 = vcombine.low %v6592_v24, %v6594_v28  ;;  %v13046_v3 = vcombine.high %v15535_v40, %v15542_v5  ;;  %v13048_v24 = vcombine.high %v15545_v7, %v1340_v9 }
 0x5f4   : > { %13209 = vmatmul.mubr.msk.bf16.vlgmr.msra.gmra.mrb[172].mxu0 %vm634_vm2, %v14282_v8  ;;  %13210 = vmatmul.mubr.msk.bf16.vlgmr.msra.gmra.mrb[172].mxu1 %vm634_vm2, %v14282_v8  ;;  %v4286_v28 = vrot.slane %v15499_v32, %v14706_v20  ;;  %v13045_v39 = vcombine.low %v15535_v40, %v15542_v5  ;;  %v13047_v41 = vcombine.low %v15545_v7, %v1340_v9 }
 0x5f5   : > { %v11157_v51 = vrot.slane %v11135_v45, %v14701_v19  ;;  %v11164_v0 = vrot.slane %v11136_v46, %v14701_v19  ;;  %8813 = vmatpush1.bf16.msra.mxu0 %v12785_v26  ;;  %8854 = vmatpush1.bf16.msra.mxu1 %v12787_v38  ;;  %v1086_v38 = vld [vmem:[%s14248_s9 + $0x6d8] sm:$0xff]  ;;  %v4290_v45 = vrot.slane %v15499_v32, %v14722_v35 }
 0x5f6   : > { %8814 = vmatprep.subr.bf16.mxu0 %v13042_v42  ;;  %8855 = vmatprep.subr.bf16.mxu1 %v13044_v43  ;;  %v4282_v42 = vrot.slane %v15499_v32, %v14718_v29  ;;  %v12794_v46 = vcombine.high %v15557_v31, %v1085_v34  ;;  %v15594_v32 = vld [vmem:[%s14248_s9 + $0xad8] sm:$0xff] }
 0x5f7   : > { %v11166_v57 = vcombine.low %v11157_v51, %v11164_v0  ;;  %v6632_v63 = vpop.f32.mrb[68].mxu0  ;;  %v6673_v59 = vpop.f32.mrb[68].mxu1  ;;  %8844 = vmatprep.mubr.bf16.mxu0 %v13829_v61  ;;  %8885 = vmatprep.mubr.bf16.mxu1 %v13829_v61 }
 0x5f8   : > { %v6633_v12 = vadd.f32 %v6632_v63, %v4262_v47  ;;  %v6674_v13 = vadd.f32 %v6673_v59, %v4270_v48  ;;  %v6634_v14 = vpop.f32.mrb[69].mxu0  ;;  %v6675_v16 = vpop.f32.mrb[69].mxu1  ;;  %v12796_v47 = vcombine.high %v958_v36, %v1086_v38  ;;  %v15584_v48 = vld [vmem:[%s14248_s9 + $0xad0] sm:$0xff] }
 0x5f9   : > { %v11180_v18 = vrot.slane %v11166_v57, %v14701_v19  ;;  %v6635_v21 = vadd.f32 %v6634_v14, %v4266_v33  ;;  %v6676_v23 = vadd.f32 %v6675_v16, %v4274_v37  ;;  %8815 = vmatpush1.bf16.msra.mxu0 %v13041_v54  ;;  %8856 = vmatpush1.bf16.msra.mxu1 %v13043_v58  ;;  %v6636_v25 = vpop.f32.mrb[70].mxu0  ;;  %v6677_v27 = vpop.f32.mrb[70].mxu1  ;;  %v15591_v54 = vld [vmem:[%s14248_s9 + $0xed0] sm:$0xff]  ;;  %v1342_v58 = vld [vmem:[%s14248_s9 + $0xed8] sm:$0xff] }
 0x5fa   : > { %v6637_v2 = vpop.f32.mrb[71].mxu0  ;;  %v6678_v22 = vpop.f32.mrb[71].mxu1  ;;  %8894 = vmatprep.subr.bf16.mxu0 %v12790_v53  ;;  %8935 = vmatprep.subr.bf16.mxu1 %v12792_v1  ;;  %v12793_v53 = vcombine.low %v15557_v31, %v1085_v34  ;;  %v15599_v1 = vld [vmem:[%s14658_s11 + $0x48] sm:$0xff]  ;;  %v13050_v9 = vcombine.high %v15584_v48, %v15591_v54  ;;  %v13049_v25 = vcombine.low %v15584_v48, %v15591_v54 }
 0x5fb   : > { %v11181_v6 = vcombine.low %v11173_v11, %v11180_v18  ;;  %v11182_v26 = vcombine.low %v6633_v12, %v6635_v21  ;;  %v11183_v10 = vcombine.low %v6674_v13, %v6676_v23  ;;  %v13052_v11 = vcombine.high %v15594_v32, %v1342_v58  ;;  %v15605_v12 = vld [vmem:[%s14248_s9 + $0x2e0] sm:$0xff]  ;;  %v15615_v21 = vld [vmem:[%s14248_s9 + $0x2e8] sm:$0xff] }
 0x5fc   : > { %13211 = vmatmul.mubr.msk.bf16.vlgmr.msra.gmra.mrb[176].mxu0 %vm634_vm2, %v14282_v8  ;;  %13212 = vmatmul.mubr.msk.bf16.vlgmr.msra.gmra.mrb[176].mxu1 %vm634_vm2, %v14282_v8  ;;  %v4294_v16 = vrot.slane %v15599_v1, %v14653_v55  ;;  %v15612_v18 = vld [vmem:[%s14248_s9 + $0x6e0] sm:$0xff]  ;;  %v1088_v23 = vld [vmem:[%s14248_s9 + $0x6e8] sm:$0xff]  ;;  %v13051_v27 = vcombine.low %v15594_v32, %v1342_v58  ;;  %v4298_v2 = vrot.slane %v15599_v1, %v14664_v60 }
 0x5fd   : > { %12397 = vst [vmem:[%s14847_s24 + $0x38] sm:$0xff] %v11181_v6  ;;  %v15575_v43 = vrot.slane %v11182_v26, %v14701_v19  ;;  %v15578_v44 = vrot.slane %v11183_v10, %v14701_v19  ;;  %8895 = vmatpush1.bf16.msra.mxu0 %v12789_v4  ;;  %8936 = vmatpush1.bf16.msra.mxu1 %v12791_v17  ;;  %v15635_v6 = vld [vmem:[%s14248_s9 + $0xae0] sm:$0xff] }
 0x5fe   : > { %8896 = vmatprep.subr.bf16.mxu0 %v13046_v3  ;;  %8937 = vmatprep.subr.bf16.mxu1 %v13048_v24  ;;  %v12795_v4 = vcombine.low %v958_v36, %v1086_v38  ;;  %v4302_v17 = vrot.slane %v15599_v1, %v14656_v56  ;;  %v4306_v3 = vrot.slane %v15599_v1, %v14667_v62  ;;  %v15642_v36 = vld [vmem:[%s14248_s9 + $0xee0] sm:$0xff]  ;;  %v15645_v38 = vld [vmem:[%s14248_s9 + $0xae8] sm:$0xff] }
 0x5ff   : > { %v11214_v49 = vcombine.low %v15575_v43, %v15578_v44  ;;  %v6714_v50 = vpop.f32.mrb[72].mxu0  ;;  %v6755_v52 = vpop.f32.mrb[72].mxu1  ;;  %8926 = vmatprep.mubr.bf16.mxu0 %v13829_v61  ;;  %8967 = vmatprep.mubr.bf16.mxu1 %v13829_v61  ;;  %v12798_v24 = vcombine.high %v15605_v12, %v15612_v18  ;;  %v12800_v31 = vcombine.high %v15615_v21, %v1088_v23 }
 0x600   : > { %v6715_v33 = vadd.f32 %v6714_v50, %v4278_v30  ;;  %v6756_v51 = vadd.f32 %v6755_v52, %v4286_v28  ;;  %v6716_v0 = vpop.f32.mrb[73].mxu0  ;;  %v6757_v37 = vpop.f32.mrb[73].mxu1  ;;  %v12797_v34 = vcombine.low %v15605_v12, %v15612_v18  ;;  %v4310_v58 = vrot.slane %v15599_v1, %v14695_v15 }
 0x601   : > { %v6717_v40 = vadd.f32 %v6716_v0, %v4282_v42  ;;  %v6758_v57 = vadd.f32 %v6757_v37, %v4290_v45  ;;  %8897 = vmatpush1.bf16.msra.mxu0 %v13045_v39  ;;  %8938 = vmatpush1.bf16.msra.mxu1 %v13047_v41  ;;  %v6718_v63 = vpop.f32.mrb[74].mxu0  ;;  %v6759_v59 = vpop.f32.mrb[74].mxu1  ;;  %v1344_v39 = vld [vmem:[%s14248_s9 + $0xee8] sm:$0xff]  ;;  %v11222_v41 = vrot.slane %v11214_v49, %v14701_v19  ;;  %v15657_v0 = vld [vmem:[%s14248_s9 + $0x2f0] sm:$0xff] }
 0x602   : > { %v6719_v5 = vpop.f32.mrb[75].mxu0  ;;  %v6760_v7 = vpop.f32.mrb[75].mxu1  ;;  %8976 = vmatprep.subr.bf16.mxu0 %v12794_v46  ;;  %9017 = vmatprep.subr.bf16.mxu1 %v12796_v47  ;;  %v12799_v46 = vcombine.low %v15615_v21, %v1088_v23  ;;  %v1089_v63 = vld [vmem:[%s14248_s9 + $0x6f0] sm:$0xff]  ;;  %v962_v59 = vld [vmem:[%s14248_s9 + $0x2f8] sm:$0xff] }
 0x603   : > { %v11184_v13 = vcombine.low %v6715_v33, %v6717_v40  ;;  %v11185_v14 = vcombine.low %v6756_v51, %v6758_v57  ;;  %v13054_v33 = vcombine.high %v15635_v6, %v15642_v36  ;;  %v13056_v51 = vcombine.high %v15645_v38, %v1344_v39 }
 0x604   : > { %13213 = vmatmul.mubr.msk.bf16.vlgmr.msra.gmra.mrb[180].mxu0 %vm634_vm2, %v14282_v8  ;;  %13214 = vmatmul.mubr.msk.bf16.vlgmr.msra.gmra.mrb[180].mxu1 %vm634_vm2, %v14282_v8  ;;  %v4318_v57 = vrot.slane %v15599_v1, %v14706_v20  ;;  %v13053_v5 = vcombine.low %v15635_v6, %v15642_v36  ;;  %v13055_v7 = vcombine.low %v15645_v38, %v1344_v39 }
 0x605   : > { %v11206_v22 = vrot.slane %v11184_v13, %v14701_v19  ;;  %v11213_v30 = vrot.slane %v11185_v14, %v14701_v19  ;;  %8977 = vmatpush1.bf16.msra.mxu0 %v12793_v53  ;;  %9018 = vmatpush1.bf16.msra.mxu1 %v12795_v4  ;;  %v1090_v4 = vld [vmem:[%s14248_s9 + $0x6f8] sm:$0xff]  ;;  %v4322_v13 = vrot.slane %v15599_v1, %v14722_v35 }
 0x606   : > { %8978 = vmatprep.subr.bf16.mxu0 %v13050_v9  ;;  %9019 = vmatprep.subr.bf16.mxu1 %v13052_v11  ;;  %v4314_v9 = vrot.slane %v15599_v1, %v14718_v29  ;;  %v12802_v14 = vcombine.high %v15657_v0, %v1089_v63  ;;  %v15694_v1 = vld [vmem:[%s14248_s9 + $0xaf8] sm:$0xff] }
 0x607   : > { %v11215_v26 = vcombine.low %v11206_v22, %v11213_v30  ;;  %v6796_v10 = vpop.f32.mrb[76].mxu0  ;;  %v6837_v28 = vpop.f32.mrb[76].mxu1  ;;  %9008 = vmatprep.mubr.bf16.mxu0 %v13829_v61  ;;  %9049 = vmatprep.mubr.bf16.mxu1 %v13829_v61 }
 0x608   : > { %v6797_v42 = vadd.f32 %v6796_v10, %v4294_v16  ;;  %v6838_v43 = vadd.f32 %v6837_v28, %v4302_v17  ;;  %v6798_v44 = vpop.f32.mrb[77].mxu0  ;;  %v6839_v45 = vpop.f32.mrb[77].mxu1  ;;  %v12804_v16 = vcombine.high %v962_v59, %v1090_v4  ;;  %v15684_v17 = vld [vmem:[%s14248_s9 + $0xaf0] sm:$0xff] }
 0x609   : > { %v11229_v47 = vrot.slane %v11215_v26, %v14701_v19  ;;  %v6799_v48 = vadd.f32 %v6798_v44, %v4298_v2  ;;  %v6840_v50 = vadd.f32 %v6839_v45, %v4306_v3  ;;  %8979 = vmatpush1.bf16.msra.mxu0 %v13049_v25  ;;  %9020 = vmatpush1.bf16.msra.mxu1 %v13051_v27  ;;  %v6800_v52 = vpop.f32.mrb[78].mxu0  ;;  %v6841_v54 = vpop.f32.mrb[78].mxu1  ;;  %v15691_v25 = vld [vmem:[%s14248_s9 + $0xef0] sm:$0xff]  ;;  %v1346_v27 = vld [vmem:[%s14248_s9 + $0xef8] sm:$0xff] }
 0x60a   : > { %v6801_v32 = vpop.f32.mrb[79].mxu0  ;;  %v6842_v49 = vpop.f32.mrb[79].mxu1  ;;  %9058 = vmatprep.subr.bf16.mxu0 %v12798_v24  ;;  %9099 = vmatprep.subr.bf16.mxu1 %v12800_v31  ;;  %v12801_v24 = vcombine.low %v15657_v0, %v1089_v63  ;;  %v15699_v31 = vld [vmem:[%s14658_s11 + $0x50] sm:$0xff]  ;;  %v13058_v39 = vcombine.high %v15684_v17, %v15691_v25  ;;  %v13057_v52 = vcombine.low %v15684_v17, %v15691_v25 }
 0x60b   : > { %v11230_v37 = vcombine.low %v11222_v41, %v11229_v47  ;;  %v11231_v53 = vcombine.low %v6797_v42, %v6799_v48  ;;  %v11232_v40 = vcombine.low %v6838_v43, %v6840_v50  ;;  %v13060_v41 = vcombine.high %v15694_v1, %v1346_v27  ;;  %v15705_v42 = vld [vmem:[%s14248_s9 + $0x300] sm:$0xff]  ;;  %v15715_v48 = vld [vmem:[%s14248_s9 + $0x308] sm:$0xff] }
 0x60c   : > { %13215 = vmatmul.mubr.msk.bf16.vlgmr.msra.gmra.mrb[184].mxu0 %vm634_vm2, %v14282_v8  ;;  %13216 = vmatmul.mubr.msk.bf16.vlgmr.msra.gmra.mrb[184].mxu1 %vm634_vm2, %v14282_v8  ;;  %v4326_v45 = vrot.slane %v15699_v31, %v14653_v55  ;;  %v15712_v47 = vld [vmem:[%s14248_s9 + $0x700] sm:$0xff]  ;;  %v1092_v50 = vld [vmem:[%s14248_s9 + $0x708] sm:$0xff]  ;;  %v13059_v54 = vcombine.low %v15694_v1, %v1346_v27  ;;  %v4330_v32 = vrot.slane %v15699_v31, %v14664_v60 }
 0x60d   : > { %12398 = vst [vmem:[%s14847_s24 + $0x40] sm:$0xff] %v11230_v37  ;;  %v15675_v11 = vrot.slane %v11231_v53, %v14701_v19  ;;  %v15678_v12 = vrot.slane %v11232_v40, %v14701_v19  ;;  %9059 = vmatpush1.bf16.msra.mxu0 %v12797_v34  ;;  %9100 = vmatpush1.bf16.msra.mxu1 %v12799_v46  ;;  %v15735_v37 = vld [vmem:[%s14248_s9 + $0xb00] sm:$0xff] }
 0x60e   : > { %9060 = vmatprep.subr.bf16.mxu0 %v13054_v33  ;;  %9101 = vmatprep.subr.bf16.mxu1 %v13056_v51  ;;  %v12803_v34 = vcombine.low %v962_v59, %v1090_v4  ;;  %v4334_v46 = vrot.slane %v15699_v31, %v14656_v56  ;;  %v4338_v33 = vrot.slane %v15699_v31, %v14667_v62  ;;  %v15742_v59 = vld [vmem:[%s14248_s9 + $0xf00] sm:$0xff]  ;;  %v15745_v4 = vld [vmem:[%s14248_s9 + $0xb08] sm:$0xff] }
 0x60f   : > { %v11263_v18 = vcombine.low %v15675_v11, %v15678_v12  ;;  %v6878_v21 = vpop.f32.mrb[80].mxu0  ;;  %v6919_v23 = vpop.f32.mrb[80].mxu1  ;;  %9090 = vmatprep.mubr.bf16.mxu0 %v13829_v61  ;;  %9131 = vmatprep.mubr.bf16.mxu1 %v13829_v61  ;;  %v12806_v51 = vcombine.high %v15705_v42, %v15712_v47  ;;  %v12808_v0 = vcombine.high %v15715_v48, %v1092_v50 }
 0x610   : > { %v6879_v2 = vadd.f32 %v6878_v21, %v4310_v58  ;;  %v6920_v22 = vadd.f32 %v6919_v23, %v4318_v57  ;;  %v6880_v30 = vpop.f32.mrb[81].mxu0  ;;  %v6921_v3 = vpop.f32.mrb[81].mxu1  ;;  %v12805_v63 = vcombine.low %v15705_v42, %v15712_v47  ;;  %v4342_v27 = vrot.slane %v15699_v31, %v14695_v15 }
 0x611   : > { %v6881_v6 = vadd.f32 %v6880_v30, %v4314_v9  ;;  %v6922_v26 = vadd.f32 %v6921_v3, %v4322_v13  ;;  %9061 = vmatpush1.bf16.msra.mxu0 %v13053_v5  ;;  %9102 = vmatpush1.bf16.msra.mxu1 %v13055_v7  ;;  %v6882_v10 = vpop.f32.mrb[82].mxu0  ;;  %v6923_v28 = vpop.f32.mrb[82].mxu1  ;;  %v1348_v5 = vld [vmem:[%s14248_s9 + $0xf08] sm:$0xff]  ;;  %v11271_v7 = vrot.slane %v11263_v18, %v14701_v19  ;;  %v15757_v30 = vld [vmem:[%s14248_s9 + $0x310] sm:$0xff] }
 0x612   : > { %v6883_v36 = vpop.f32.mrb[83].mxu0  ;;  %v6924_v38 = vpop.f32.mrb[83].mxu1  ;;  %9140 = vmatprep.subr.bf16.mxu0 %v12802_v14  ;;  %9181 = vmatprep.subr.bf16.mxu1 %v12804_v16  ;;  %v12807_v14 = vcombine.low %v15715_v48, %v1092_v50  ;;  %v1093_v10 = vld [vmem:[%s14248_s9 + $0x710] sm:$0xff]  ;;  %v966_v28 = vld [vmem:[%s14248_s9 + $0x318] sm:$0xff] }
 0x613   : > { %v11233_v43 = vcombine.low %v6879_v2, %v6881_v6  ;;  %v11234_v44 = vcombine.low %v6920_v22, %v6922_v26  ;;  %v13062_v2 = vcombine.high %v15735_v37, %v15742_v59  ;;  %v13064_v22 = vcombine.high %v15745_v4, %v1348_v5 }
 0x614   : > { %13217 = vmatmul.mubr.msk.bf16.vlgmr.msra.gmra.mrb[188].mxu0 %vm634_vm2, %v14282_v8  ;;  %13218 = vmatmul.mubr.msk.bf16.vlgmr.msra.gmra.mrb[188].mxu1 %vm634_vm2, %v14282_v8  ;;  %v4350_v26 = vrot.slane %v15699_v31, %v14706_v20  ;;  %v13061_v36 = vcombine.low %v15735_v37, %v15742_v59  ;;  %v13063_v38 = vcombine.low %v15745_v4, %v1348_v5 }
 0x615   : > { %v11255_v49 = vrot.slane %v11233_v43, %v14701_v19  ;;  %v11262_v58 = vrot.slane %v11234_v44, %v14701_v19  ;;  %9141 = vmatpush1.bf16.msra.mxu0 %v12801_v24  ;;  %9182 = vmatpush1.bf16.msra.mxu1 %v12803_v34  ;;  %v1094_v34 = vld [vmem:[%s14248_s9 + $0x718] sm:$0xff]  ;;  %v4354_v43 = vrot.slane %v15699_v31, %v14722_v35 }
 0x616   : > { %9142 = vmatprep.subr.bf16.mxu0 %v13058_v39  ;;  %9183 = vmatprep.subr.bf16.mxu1 %v13060_v41  ;;  %v4346_v39 = vrot.slane %v15699_v31, %v14718_v29  ;;  %v12810_v44 = vcombine.high %v15757_v30, %v1093_v10  ;;  %v15794_v31 = vld [vmem:[%s14248_s9 + $0xb18] sm:$0xff] }
 0x617   : > { %v11264_v53 = vcombine.low %v11255_v49, %v11262_v58  ;;  %v6960_v40 = vpop.f32.mrb[84].mxu0  ;;  %v7001_v57 = vpop.f32.mrb[84].mxu1  ;;  %9172 = vmatprep.mubr.bf16.mxu0 %v13829_v61  ;;  %9213 = vmatprep.mubr.bf16.mxu1 %v13829_v61 }
 0x618   : > { %v6961_v9 = vadd.f32 %v6960_v40, %v4326_v45  ;;  %v7002_v11 = vadd.f32 %v7001_v57, %v4334_v46  ;;  %v6962_v12 = vpop.f32.mrb[85].mxu0  ;;  %v7003_v13 = vpop.f32.mrb[85].mxu1  ;;  %v12812_v45 = vcombine.high %v966_v28, %v1094_v34  ;;  %v15784_v46 = vld [vmem:[%s14248_s9 + $0xb10] sm:$0xff] }
 0x619   : > { %v11278_v16 = vrot.slane %v11264_v53, %v14701_v19  ;;  %v6963_v17 = vadd.f32 %v6962_v12, %v4330_v32  ;;  %v7004_v21 = vadd.f32 %v7003_v13, %v4338_v33  ;;  %9143 = vmatpush1.bf16.msra.mxu0 %v13057_v52  ;;  %9184 = vmatpush1.bf16.msra.mxu1 %v13059_v54  ;;  %v6964_v23 = vpop.f32.mrb[86].mxu0  ;;  %v7005_v25 = vpop.f32.mrb[86].mxu1  ;;  %v15791_v52 = vld [vmem:[%s14248_s9 + $0xf10] sm:$0xff]  ;;  %v1350_v54 = vld [vmem:[%s14248_s9 + $0xf18] sm:$0xff] }
 0x61a   : > { %v6965_v1 = vpop.f32.mrb[87].mxu0  ;;  %v7006_v18 = vpop.f32.mrb[87].mxu1  ;;  %9222 = vmatprep.subr.bf16.mxu0 %v12806_v51  ;;  %9263 = vmatprep.subr.bf16.mxu1 %v12808_v0  ;;  %v12809_v51 = vcombine.low %v15757_v30, %v1093_v10  ;;  %v15799_v0 = vld [vmem:[%s14658_s11 + $0x58] sm:$0xff]  ;;  %v13066_v5 = vcombine.high %v15784_v46, %v15791_v52  ;;  %v13065_v23 = vcombine.low %v15784_v46, %v15791_v52 }
 0x61b   : > { %v11279_v3 = vcombine.low %v11271_v7, %v11278_v16  ;;  %v11280_v24 = vcombine.low %v6961_v9, %v6963_v17  ;;  %v11281_v6 = vcombine.low %v7002_v11, %v7004_v21  ;;  %v13068_v7 = vcombine.high %v15794_v31, %v1350_v54  ;;  %v15805_v9 = vld [vmem:[%s14248_s9 + $0x320] sm:$0xff]  ;;  %v15815_v17 = vld [vmem:[%s14248_s9 + $0x328] sm:$0xff] }
 0x61c   : > { %13219 = vmatmul.mubr.msk.bf16.vlgmr.msra.gmra.mrb[192].mxu0 %vm634_vm2, %v14282_v8  ;;  %13220 = vmatmul.mubr.msk.bf16.vlgmr.msra.gmra.mrb[192].mxu1 %vm634_vm2, %v14282_v8  ;;  %v4358_v13 = vrot.slane %v15799_v0, %v14653_v55  ;;  %v15812_v16 = vld [vmem:[%s14248_s9 + $0x720] sm:$0xff]  ;;  %v1096_v21 = vld [vmem:[%s14248_s9 + $0x728] sm:$0xff]  ;;  %v13067_v25 = vcombine.low %v15794_v31, %v1350_v54  ;;  %v4362_v1 = vrot.slane %v15799_v0, %v14664_v60 }
 0x61d   : > { %12399 = vst [vmem:[%s14847_s24 + $0x48] sm:$0xff] %v11279_v3  ;;  %v15775_v41 = vrot.slane %v11280_v24, %v14701_v19  ;;  %v15778_v42 = vrot.slane %v11281_v6, %v14701_v19  ;;  %9223 = vmatpush1.bf16.msra.mxu0 %v12805_v63  ;;  %9264 = vmatpush1.bf16.msra.mxu1 %v12807_v14  ;;  %v15835_v3 = vld [vmem:[%s14248_s9 + $0xb20] sm:$0xff] }
 0x61e   : > { %9224 = vmatprep.subr.bf16.mxu0 %v13062_v2  ;;  %9265 = vmatprep.subr.bf16.mxu1 %v13064_v22  ;;  %v12811_v63 = vcombine.low %v966_v28, %v1094_v34  ;;  %v4366_v14 = vrot.slane %v15799_v0, %v14656_v56  ;;  %v4370_v2 = vrot.slane %v15799_v0, %v14667_v62  ;;  %v15842_v28 = vld [vmem:[%s14248_s9 + $0xf20] sm:$0xff]  ;;  %v15845_v34 = vld [vmem:[%s14248_s9 + $0xb28] sm:$0xff] }
 0x61f   : > { %v11312_v47 = vcombine.low %v15775_v41, %v15778_v42  ;;  %v7042_v48 = vpop.f32.mrb[88].mxu0  ;;  %v7083_v50 = vpop.f32.mrb[88].mxu1  ;;  %9254 = vmatprep.mubr.bf16.mxu0 %v13829_v61  ;;  %9295 = vmatprep.mubr.bf16.mxu1 %v13829_v61  ;;  %v12814_v22 = vcombine.high %v15805_v9, %v15812_v16  ;;  %v12816_v30 = vcombine.high %v15815_v17, %v1096_v21 }
 0x620   : > { %v7043_v32 = vadd.f32 %v7042_v48, %v4342_v27  ;;  %v7084_v49 = vadd.f32 %v7083_v50, %v4350_v26  ;;  %v7044_v58 = vpop.f32.mrb[89].mxu0  ;;  %v7085_v33 = vpop.f32.mrb[89].mxu1  ;;  %v12813_v10 = vcombine.low %v15805_v9, %v15812_v16  ;;  %v4374_v54 = vrot.slane %v15799_v0, %v14695_v15 }
 0x621   : > { %v7045_v37 = vadd.f32 %v7044_v58, %v4346_v39  ;;  %v7086_v53 = vadd.f32 %v7085_v33, %v4354_v43  ;;  %9225 = vmatpush1.bf16.msra.mxu0 %v13061_v36  ;;  %9266 = vmatpush1.bf16.msra.mxu1 %v13063_v38  ;;  %v7046_v40 = vpop.f32.mrb[90].mxu0  ;;  %v7087_v57 = vpop.f32.mrb[90].mxu1  ;;  %v1352_v36 = vld [vmem:[%s14248_s9 + $0xf28] sm:$0xff]  ;;  %v11320_v38 = vrot.slane %v11312_v47, %v14701_v19  ;;  %v15857_v58 = vld [vmem:[%s14248_s9 + $0x330] sm:$0xff] }
 0x622   : > { %v7047_v59 = vpop.f32.mrb[91].mxu0  ;;  %v7088_v4 = vpop.f32.mrb[91].mxu1  ;;  %9304 = vmatprep.subr.bf16.mxu0 %v12810_v44  ;;  %9345 = vmatprep.subr.bf16.mxu1 %v12812_v45  ;;  %v12815_v44 = vcombine.low %v15815_v17, %v1096_v21  ;;  %v1097_v40 = vld [vmem:[%s14248_s9 + $0x730] sm:$0xff]  ;;  %v970_v57 = vld [vmem:[%s14248_s9 + $0x338] sm:$0xff] }
 0x623   : > { %v11282_v11 = vcombine.low %v7043_v32, %v7045_v37  ;;  %v11283_v12 = vcombine.low %v7084_v49, %v7086_v53  ;;  %v13070_v32 = vcombine.high %v15835_v3, %v15842_v28  ;;  %v13072_v49 = vcombine.high %v15845_v34, %v1352_v36 }
 0x624   : > { %13221 = vmatmul.mubr.msk.bf16.vlgmr.msra.gmra.mrb[196].mxu0 %vm634_vm2, %v14282_v8  ;;  %13222 = vmatmul.mubr.msk.bf16.vlgmr.msra.gmra.mrb[196].mxu1 %vm634_vm2, %v14282_v8  ;;  %v4382_v53 = vrot.slane %v15799_v0, %v14706_v20  ;;  %v13069_v59 = vcombine.low %v15835_v3, %v15842_v28  ;;  %v13071_v4 = vcombine.low %v15845_v34, %v1352_v36 }
 0x625   : > { %v11304_v18 = vrot.slane %v11282_v11, %v14701_v19  ;;  %v11311_v27 = vrot.slane %v11283_v12, %v14701_v19  ;;  %9305 = vmatpush1.bf16.msra.mxu0 %v12809_v51  ;;  %9346 = vmatpush1.bf16.msra.mxu1 %v12811_v63  ;;  %v1098_v63 = vld [vmem:[%s14248_s9 + $0x738] sm:$0xff]  ;;  %v4386_v11 = vrot.slane %v15799_v0, %v14722_v35 }
 0x626   : > { %9306 = vmatprep.subr.bf16.mxu0 %v13066_v5  ;;  %9347 = vmatprep.subr.bf16.mxu1 %v13068_v7  ;;  %v4378_v5 = vrot.slane %v15799_v0, %v14718_v29  ;;  %v12818_v12 = vcombine.high %v15857_v58, %v1097_v40  ;;  %v15894_v0 = vld [vmem:[%s14248_s9 + $0xb38] sm:$0xff] }
 0x627   : > { %v11313_v24 = vcombine.low %v11304_v18, %v11311_v27  ;;  %v7124_v6 = vpop.f32.mrb[92].mxu0  ;;  %v7165_v26 = vpop.f32.mrb[92].mxu1  ;;  %9336 = vmatprep.mubr.bf16.mxu0 %v13829_v61  ;;  %9377 = vmatprep.mubr.bf16.mxu1 %v13829_v61 }
 0x628   : > { %v7125_v39 = vadd.f32 %v7124_v6, %v4358_v13  ;;  %v7166_v41 = vadd.f32 %v7165_v26, %v4366_v14  ;;  %v7126_v42 = vpop.f32.mrb[93].mxu0  ;;  %v7167_v43 = vpop.f32.mrb[93].mxu1  ;;  %v12820_v13 = vcombine.high %v970_v57, %v1098_v63  ;;  %v15884_v14 = vld [vmem:[%s14248_s9 + $0xb30] sm:$0xff] }
 0x629   : > { %v11327_v45 = vrot.slane %v11313_v24, %v14701_v19  ;;  %v7127_v46 = vadd.f32 %v7126_v42, %v4362_v1  ;;  %v7168_v48 = vadd.f32 %v7167_v43, %v4370_v2  ;;  %9307 = vmatpush1.bf16.msra.mxu0 %v13065_v23  ;;  %9348 = vmatpush1.bf16.msra.mxu1 %v13067_v25  ;;  %v7128_v50 = vpop.f32.mrb[94].mxu0  ;;  %v7169_v52 = vpop.f32.mrb[94].mxu1  ;;  %v15891_v23 = vld [vmem:[%s14248_s9 + $0xf30] sm:$0xff]  ;;  %v1354_v25 = vld [vmem:[%s14248_s9 + $0xf38] sm:$0xff] }
 0x62a   : > { %v7129_v31 = vpop.f32.mrb[95].mxu0  ;;  %v7170_v47 = vpop.f32.mrb[95].mxu1  ;;  %9386 = vmatprep.subr.bf16.mxu0 %v12814_v22  ;;  %9427 = vmatprep.subr.bf16.mxu1 %v12816_v30  ;;  %v12817_v22 = vcombine.low %v15857_v58, %v1097_v40  ;;  %v15899_v30 = vld [vmem:[%s14658_s11 + $0x60] sm:$0xff]  ;;  %v13074_v36 = vcombine.high %v15884_v14, %v15891_v23  ;;  %v13073_v50 = vcombine.low %v15884_v14, %v15891_v23 }
 0x62b   : > { %v11328_v33 = vcombine.low %v11320_v38, %v11327_v45  ;;  %v11329_v51 = vcombine.low %v7125_v39, %v7127_v46  ;;  %v11330_v37 = vcombine.low %v7166_v41, %v7168_v48  ;;  %v13076_v38 = vcombine.high %v15894_v0, %v1354_v25  ;;  %v15905_v39 = vld [vmem:[%s14248_s9 + $0x340] sm:$0xff]  ;;  %v15915_v46 = vld [vmem:[%s14248_s9 + $0x348] sm:$0xff] }
 0x62c   : > { %13223 = vmatmul.mubr.msk.bf16.vlgmr.msra.gmra.mrb[200].mxu0 %vm634_vm2, %v14282_v8  ;;  %13224 = vmatmul.mubr.msk.bf16.vlgmr.msra.gmra.mrb[200].mxu1 %vm634_vm2, %v14282_v8  ;;  %v4390_v43 = vrot.slane %v15899_v30, %v14653_v55  ;;  %v15912_v45 = vld [vmem:[%s14248_s9 + $0x740] sm:$0xff]  ;;  %v1100_v48 = vld [vmem:[%s14248_s9 + $0x748] sm:$0xff]  ;;  %v13075_v52 = vcombine.low %v15894_v0, %v1354_v25  ;;  %v4394_v31 = vrot.slane %v15899_v30, %v14664_v60 }
 0x62d   : > { %12400 = vst [vmem:[%s14847_s24 + $0x50] sm:$0xff] %v11328_v33  ;;  %v15875_v7 = vrot.slane %v11329_v51, %v14701_v19  ;;  %v15878_v9 = vrot.slane %v11330_v37, %v14701_v19  ;;  %9387 = vmatpush1.bf16.msra.mxu0 %v12813_v10  ;;  %9428 = vmatpush1.bf16.msra.mxu1 %v12815_v44  ;;  %v15935_v33 = vld [vmem:[%s14248_s9 + $0xb40] sm:$0xff] }
 0x62e   : > { %9388 = vmatprep.subr.bf16.mxu0 %v13070_v32  ;;  %9429 = vmatprep.subr.bf16.mxu1 %v13072_v49  ;;  %v12819_v10 = vcombine.low %v970_v57, %v1098_v63  ;;  %v4398_v44 = vrot.slane %v15899_v30, %v14656_v56  ;;  %v4402_v32 = vrot.slane %v15899_v30, %v14667_v62  ;;  %v15942_v57 = vld [vmem:[%s14248_s9 + $0xf40] sm:$0xff]  ;;  %v15945_v63 = vld [vmem:[%s14248_s9 + $0xb48] sm:$0xff] }
 0x62f   : > { %v11361_v16 = vcombine.low %v15875_v7, %v15878_v9  ;;  %v7206_v17 = vpop.f32.mrb[96].mxu0  ;;  %v7247_v21 = vpop.f32.mrb[96].mxu1  ;;  %9418 = vmatprep.mubr.bf16.mxu0 %v13829_v61  ;;  %9459 = vmatprep.mubr.bf16.mxu1 %v13829_v61  ;;  %v12822_v49 = vcombine.high %v15905_v39, %v15912_v45  ;;  %v12824_v58 = vcombine.high %v15915_v46, %v1100_v48 }
 0x630   : > { %v7207_v1 = vadd.f32 %v7206_v17, %v4374_v54  ;;  %v7248_v18 = vadd.f32 %v7247_v21, %v4382_v53  ;;  %v7208_v27 = vpop.f32.mrb[97].mxu0  ;;  %v7249_v2 = vpop.f32.mrb[97].mxu1  ;;  %v12821_v40 = vcombine.low %v15905_v39, %v15912_v45  ;;  %v4406_v25 = vrot.slane %v15899_v30, %v14695_v15 }
 0x631   : > { %v7209_v3 = vadd.f32 %v7208_v27, %v4378_v5  ;;  %v7250_v24 = vadd.f32 %v7249_v2, %v4386_v11  ;;  %9389 = vmatpush1.bf16.msra.mxu0 %v13069_v59  ;;  %9430 = vmatpush1.bf16.msra.mxu1 %v13071_v4  ;;  %v7210_v6 = vpop.f32.mrb[98].mxu0  ;;  %v7251_v26 = vpop.f32.mrb[98].mxu1  ;;  %v1356_v59 = vld [vmem:[%s14248_s9 + $0xf48] sm:$0xff]  ;;  %v11369_v4 = vrot.slane %v11361_v16, %v14701_v19  ;;  %v15957_v27 = vld [vmem:[%s14248_s9 + $0x350] sm:$0xff] }
 0x632   : > { %v7211_v28 = vpop.f32.mrb[99].mxu0  ;;  %v7252_v34 = vpop.f32.mrb[99].mxu1  ;;  %9468 = vmatprep.subr.bf16.mxu0 %v12818_v12  ;;  %9509 = vmatprep.subr.bf16.mxu1 %v12820_v13  ;;  %v12823_v12 = vcombine.low %v15915_v46, %v1100_v48  ;;  %v1101_v6 = vld [vmem:[%s14248_s9 + $0x750] sm:$0xff]  ;;  %v974_v26 = vld [vmem:[%s14248_s9 + $0x358] sm:$0xff] }
 0x633   : > { %v11331_v41 = vcombine.low %v7207_v1, %v7209_v3  ;;  %v11332_v42 = vcombine.low %v7248_v18, %v7250_v24  ;;  %v13078_v1 = vcombine.high %v15935_v33, %v15942_v57  ;;  %v13080_v18 = vcombine.high %v15945_v63, %v1356_v59 }
 0x634   : > { %13225 = vmatmul.mubr.msk.bf16.vlgmr.msra.gmra.mrb[204].mxu0 %vm634_vm2, %v14282_v8  ;;  %13226 = vmatmul.mubr.msk.bf16.vlgmr.msra.gmra.mrb[204].mxu1 %vm634_vm2, %v14282_v8  ;;  %v4414_v24 = vrot.slane %v15899_v30, %v14706_v20  ;;  %v13077_v28 = vcombine.low %v15935_v33, %v15942_v57  ;;  %v13079_v34 = vcombine.low %v15945_v63, %v1356_v59 }
 0x635   : > { %v11353_v47 = vrot.slane %v11331_v41, %v14701_v19  ;;  %v11360_v54 = vrot.slane %v11332_v42, %v14701_v19  ;;  %9469 = vmatpush1.bf16.msra.mxu0 %v12817_v22  ;;  %9510 = vmatpush1.bf16.msra.mxu1 %v12819_v10  ;;  %v1102_v10 = vld [vmem:[%s14248_s9 + $0x758] sm:$0xff]  ;;  %v4418_v41 = vrot.slane %v15899_v30, %v14722_v35 }
 0x636   : > { %9470 = vmatprep.subr.bf16.mxu0 %v13074_v36  ;;  %9511 = vmatprep.subr.bf16.mxu1 %v13076_v38  ;;  %v4410_v36 = vrot.slane %v15899_v30, %v14718_v29  ;;  %v12826_v42 = vcombine.high %v15957_v27, %v1101_v6  ;;  %v15994_v30 = vld [vmem:[%s14248_s9 + $0xb58] sm:$0xff] }
 0x637   : > { %v11362_v51 = vcombine.low %v11353_v47, %v11360_v54  ;;  %v7288_v37 = vpop.f32.mrb[100].mxu0  ;;  %v7329_v53 = vpop.f32.mrb[100].mxu1  ;;  %9500 = vmatprep.mubr.bf16.mxu0 %v13829_v61  ;;  %9541 = vmatprep.mubr.bf16.mxu1 %v13829_v61 }
 0x638   : > { %v7289_v5 = vadd.f32 %v7288_v37, %v4390_v43  ;;  %v7330_v7 = vadd.f32 %v7329_v53, %v4398_v44  ;;  %v7290_v9 = vpop.f32.mrb[101].mxu0  ;;  %v7331_v11 = vpop.f32.mrb[101].mxu1  ;;  %v12828_v43 = vcombine.high %v974_v26, %v1102_v10  ;;  %v15984_v44 = vld [vmem:[%s14248_s9 + $0xb50] sm:$0xff] }
 0x639   : > { %v11376_v13 = vrot.slane %v11362_v51, %v14701_v19  ;;  %v7291_v14 = vadd.f32 %v7290_v9, %v4394_v31  ;;  %v7332_v17 = vadd.f32 %v7331_v11, %v4402_v32  ;;  %9471 = vmatpush1.bf16.msra.mxu0 %v13073_v50  ;;  %9512 = vmatpush1.bf16.msra.mxu1 %v13075_v52  ;;  %v7292_v21 = vpop.f32.mrb[102].mxu0  ;;  %v7333_v23 = vpop.f32.mrb[102].mxu1  ;;  %v15991_v50 = vld [vmem:[%s14248_s9 + $0xf50] sm:$0xff]  ;;  %v1358_v52 = vld [vmem:[%s14248_s9 + $0xf58] sm:$0xff] }
 0x63a   : > { %v7293_v0 = vpop.f32.mrb[103].mxu0  ;;  %v7334_v16 = vpop.f32.mrb[103].mxu1  ;;  %9550 = vmatprep.subr.bf16.mxu0 %v12822_v49  ;;  %9591 = vmatprep.subr.bf16.mxu1 %v12824_v58  ;;  %v12825_v49 = vcombine.low %v15957_v27, %v1101_v6  ;;  %v15999_v58 = vld [vmem:[%s14658_s11 + $0x68] sm:$0xff]  ;;  %v13082_v59 = vcombine.high %v15984_v44, %v15991_v50  ;;  %v13081_v21 = vcombine.low %v15984_v44, %v15991_v50 }
 0x63b   : > { %v11377_v2 = vcombine.low %v11369_v4, %v11376_v13  ;;  %v11378_v22 = vcombine.low %v7289_v5, %v7291_v14  ;;  %v11379_v3 = vcombine.low %v7330_v7, %v7332_v17  ;;  %v13084_v4 = vcombine.high %v15994_v30, %v1358_v52  ;;  %v16005_v5 = vld [vmem:[%s14248_s9 + $0x360] sm:$0xff]  ;;  %v16015_v14 = vld [vmem:[%s14248_s9 + $0x368] sm:$0xff] }
 0x63c   : > { %13227 = vmatmul.mubr.msk.bf16.vlgmr.msra.gmra.mrb[208].mxu0 %vm634_vm2, %v14282_v8  ;;  %13228 = vmatmul.mubr.msk.bf16.vlgmr.msra.gmra.mrb[208].mxu1 %vm634_vm2, %v14282_v8  ;;  %v4422_v11 = vrot.slane %v15999_v58, %v14653_v55  ;;  %v16012_v13 = vld [vmem:[%s14248_s9 + $0x760] sm:$0xff]  ;;  %v1104_v17 = vld [vmem:[%s14248_s9 + $0x768] sm:$0xff]  ;;  %v13083_v23 = vcombine.low %v15994_v30, %v1358_v52  ;;  %v4426_v0 = vrot.slane %v15999_v58, %v14664_v60 }
 0x63d   : > { %12401 = vst [vmem:[%s14847_s24 + $0x58] sm:$0xff] %v11377_v2  ;;  %v15975_v38 = vrot.slane %v11378_v22, %v14701_v19  ;;  %v15978_v39 = vrot.slane %v11379_v3, %v14701_v19  ;;  %9551 = vmatpush1.bf16.msra.mxu0 %v12821_v40  ;;  %9592 = vmatpush1.bf16.msra.mxu1 %v12823_v12  ;;  %v16035_v2 = vld [vmem:[%s14248_s9 + $0xb60] sm:$0xff] }
 0x63e   : > { %9552 = vmatprep.subr.bf16.mxu0 %v13078_v1  ;;  %9593 = vmatprep.subr.bf16.mxu1 %v13080_v18  ;;  %v12827_v40 = vcombine.low %v974_v26, %v1102_v10  ;;  %v4430_v12 = vrot.slane %v15999_v58, %v14656_v56  ;;  %v4434_v1 = vrot.slane %v15999_v58, %v14667_v62  ;;  %v16042_v26 = vld [vmem:[%s14248_s9 + $0xf60] sm:$0xff]  ;;  %v16045_v10 = vld [vmem:[%s14248_s9 + $0xb68] sm:$0xff] }
 0x63f   : > { %v11410_v45 = vcombine.low %v15975_v38, %v15978_v39  ;;  %v7370_v46 = vpop.f32.mrb[104].mxu0  ;;  %v7411_v48 = vpop.f32.mrb[104].mxu1  ;;  %9582 = vmatprep.mubr.bf16.mxu0 %v13829_v61  ;;  %9623 = vmatprep.mubr.bf16.mxu1 %v13829_v61  ;;  %v12830_v18 = vcombine.high %v16005_v5, %v16012_v13  ;;  %v12832_v27 = vcombine.high %v16015_v14, %v1104_v17 }
 0x640   : > { %v7371_v31 = vadd.f32 %v7370_v46, %v4406_v25  ;;  %v7412_v47 = vadd.f32 %v7411_v48, %v4414_v24  ;;  %v7372_v54 = vpop.f32.mrb[105].mxu0  ;;  %v7413_v32 = vpop.f32.mrb[105].mxu1  ;;  %v12829_v6 = vcombine.low %v16005_v5, %v16012_v13  ;;  %v4438_v52 = vrot.slane %v15999_v58, %v14695_v15 }
 0x641   : > { %v7373_v33 = vadd.f32 %v7372_v54, %v4410_v36  ;;  %v7414_v51 = vadd.f32 %v7413_v32, %v4418_v41  ;;  %9553 = vmatpush1.bf16.msra.mxu0 %v13077_v28  ;;  %9594 = vmatpush1.bf16.msra.mxu1 %v13079_v34  ;;  %v7374_v37 = vpop.f32.mrb[106].mxu0  ;;  %v7415_v53 = vpop.f32.mrb[106].mxu1  ;;  %v1360_v28 = vld [vmem:[%s14248_s9 + $0xf68] sm:$0xff]  ;;  %v11418_v34 = vrot.slane %v11410_v45, %v14701_v19  ;;  %v16057_v54 = vld [vmem:[%s14248_s9 + $0x370] sm:$0xff] }
 0x642   : > { %v7375_v57 = vpop.f32.mrb[107].mxu0  ;;  %v7416_v63 = vpop.f32.mrb[107].mxu1  ;;  %9632 = vmatprep.subr.bf16.mxu0 %v12826_v42  ;;  %9673 = vmatprep.subr.bf16.mxu1 %v12828_v43  ;;  %v12831_v42 = vcombine.low %v16015_v14, %v1104_v17  ;;  %v1105_v37 = vld [vmem:[%s14248_s9 + $0x770] sm:$0xff]  ;;  %v978_v53 = vld [vmem:[%s14248_s9 + $0x378] sm:$0xff] }
 0x643   : > { %v11380_v7 = vcombine.low %v7371_v31, %v7373_v33  ;;  %v11381_v9 = vcombine.low %v7412_v47, %v7414_v51  ;;  %v13086_v31 = vcombine.high %v16035_v2, %v16042_v26  ;;  %v13088_v47 = vcombine.high %v16045_v10, %v1360_v28 }
 0x644   : > { %13229 = vmatmul.mubr.msk.bf16.vlgmr.msra.gmra.mrb[212].mxu0 %vm634_vm2, %v14282_v8  ;;  %13230 = vmatmul.mubr.msk.bf16.vlgmr.msra.gmra.mrb[212].mxu1 %vm634_vm2, %v14282_v8  ;;  %v4446_v51 = vrot.slane %v15999_v58, %v14706_v20  ;;  %v13085_v57 = vcombine.low %v16035_v2, %v16042_v26  ;;  %v13087_v63 = vcombine.low %v16045_v10, %v1360_v28 }
 0x645   : > { %v11402_v16 = vrot.slane %v11380_v7, %v14701_v19  ;;  %v11409_v25 = vrot.slane %v11381_v9, %v14701_v19  ;;  %9633 = vmatpush1.bf16.msra.mxu0 %v12825_v49  ;;  %9674 = vmatpush1.bf16.msra.mxu1 %v12827_v40  ;;  %v1106_v40 = vld [vmem:[%s14248_s9 + $0x778] sm:$0xff]  ;;  %v4450_v7 = vrot.slane %v15999_v58, %v14722_v35 }
 0x646   : > { %9634 = vmatprep.subr.bf16.mxu0 %v13082_v59  ;;  %9675 = vmatprep.subr.bf16.mxu1 %v13084_v4  ;;  %v4442_v59 = vrot.slane %v15999_v58, %v14718_v29  ;;  %v12834_v9 = vcombine.high %v16057_v54, %v1105_v37  ;;  %v16094_v58 = vld [vmem:[%s14248_s9 + $0xb78] sm:$0xff] }
 0x647   : > { %v11411_v22 = vcombine.low %v11402_v16, %v11409_v25  ;;  %v7452_v3 = vpop.f32.mrb[108].mxu0  ;;  %v7493_v24 = vpop.f32.mrb[108].mxu1  ;;  %9664 = vmatprep.mubr.bf16.mxu0 %v13829_v61  ;;  %9705 = vmatprep.mubr.bf16.mxu1 %v13829_v61 }
 0x648   : > { %v7453_v36 = vadd.f32 %v7452_v3, %v4422_v11  ;;  %v7494_v38 = vadd.f32 %v7493_v24, %v4430_v12  ;;  %v7454_v39 = vpop.f32.mrb[109].mxu0  ;;  %v7495_v41 = vpop.f32.mrb[109].mxu1  ;;  %v12836_v11 = vcombine.high %v978_v53, %v1106_v40  ;;  %v16084_v12 = vld [vmem:[%s14248_s9 + $0xb70] sm:$0xff] }
 0x649   : > { %v11425_v43 = vrot.slane %v11411_v22, %v14701_v19  ;;  %v7455_v44 = vadd.f32 %v7454_v39, %v4426_v0  ;;  %v7496_v46 = vadd.f32 %v7495_v41, %v4434_v1  ;;  %9635 = vmatpush1.bf16.msra.mxu0 %v13081_v21  ;;  %9676 = vmatpush1.bf16.msra.mxu1 %v13083_v23  ;;  %v7456_v48 = vpop.f32.mrb[110].mxu0  ;;  %v7497_v50 = vpop.f32.mrb[110].mxu1  ;;  %v16091_v21 = vld [vmem:[%s14248_s9 + $0xf70] sm:$0xff]  ;;  %v1362_v23 = vld [vmem:[%s14248_s9 + $0xf78] sm:$0xff] }
 0x64a   : > { %v7457_v30 = vpop.f32.mrb[111].mxu0  ;;  %v7498_v45 = vpop.f32.mrb[111].mxu1  ;;  %9714 = vmatprep.subr.bf16.mxu0 %v12830_v18  ;;  %9755 = vmatprep.subr.bf16.mxu1 %v12832_v27  ;;  %v12833_v18 = vcombine.low %v16057_v54, %v1105_v37  ;;  %v16099_v27 = vld [vmem:[%s14658_s11 + $0x70] sm:$0xff]  ;;  %v13090_v28 = vcombine.high %v16084_v12, %v16091_v21  ;;  %v13089_v48 = vcombine.low %v16084_v12, %v16091_v21 }
 0x64b   : > { %v11426_v32 = vcombine.low %v11418_v34, %v11425_v43  ;;  %v11427_v49 = vcombine.low %v7453_v36, %v7455_v44  ;;  %v11428_v33 = vcombine.low %v7494_v38, %v7496_v46  ;;  %v13092_v34 = vcombine.high %v16094_v58, %v1362_v23  ;;  %v16105_v36 = vld [vmem:[%s14248_s9 + $0x380] sm:$0xff]  ;;  %v16115_v44 = vld [vmem:[%s14248_s9 + $0x388] sm:$0xff] }
 0x64c   : > { %13231 = vmatmul.mubr.msk.bf16.vlgmr.msra.gmra.mrb[216].mxu0 %vm634_vm2, %v14282_v8  ;;  %13232 = vmatmul.mubr.msk.bf16.vlgmr.msra.gmra.mrb[216].mxu1 %vm634_vm2, %v14282_v8  ;;  %v4454_v41 = vrot.slane %v16099_v27, %v14653_v55  ;;  %v16112_v43 = vld [vmem:[%s14248_s9 + $0x780] sm:$0xff]  ;;  %v1108_v46 = vld [vmem:[%s14248_s9 + $0x788] sm:$0xff]  ;;  %v13091_v50 = vcombine.low %v16094_v58, %v1362_v23  ;;  %v4458_v30 = vrot.slane %v16099_v27, %v14664_v60 }
 0x64d   : > { %12402 = vst [vmem:[%s14847_s24 + $0x60] sm:$0xff] %v11426_v32  ;;  %v16075_v4 = vrot.slane %v11427_v49, %v14701_v19  ;;  %v16078_v5 = vrot.slane %v11428_v33, %v14701_v19  ;;  %9715 = vmatpush1.bf16.msra.mxu0 %v12829_v6  ;;  %9756 = vmatpush1.bf16.msra.mxu1 %v12831_v42  ;;  %v16135_v32 = vld [vmem:[%s14248_s9 + $0xb80] sm:$0xff] }
 0x64e   : > { %9716 = vmatprep.subr.bf16.mxu0 %v13086_v31  ;;  %9757 = vmatprep.subr.bf16.mxu1 %v13088_v47  ;;  %v12835_v6 = vcombine.low %v978_v53, %v1106_v40  ;;  %v4462_v42 = vrot.slane %v16099_v27, %v14656_v56  ;;  %v4466_v31 = vrot.slane %v16099_v27, %v14667_v62  ;;  %v16142_v53 = vld [vmem:[%s14248_s9 + $0xf80] sm:$0xff]  ;;  %v16145_v40 = vld [vmem:[%s14248_s9 + $0xb88] sm:$0xff] }
 0x64f   : > { %v11459_v13 = vcombine.low %v16075_v4, %v16078_v5  ;;  %v7534_v14 = vpop.f32.mrb[112].mxu0  ;;  %v7575_v17 = vpop.f32.mrb[112].mxu1  ;;  %9746 = vmatprep.mubr.bf16.mxu0 %v13829_v61  ;;  %9787 = vmatprep.mubr.bf16.mxu1 %v13829_v61  ;;  %v12838_v47 = vcombine.high %v16105_v36, %v16112_v43  ;;  %v12840_v54 = vcombine.high %v16115_v44, %v1108_v46 }
 0x650   : > { %v7535_v0 = vadd.f32 %v7534_v14, %v4438_v52  ;;  %v7576_v16 = vadd.f32 %v7575_v17, %v4446_v51  ;;  %v7536_v25 = vpop.f32.mrb[113].mxu0  ;;  %v7577_v1 = vpop.f32.mrb[113].mxu1  ;;  %v12837_v37 = vcombine.low %v16105_v36, %v16112_v43  ;;  %v4470_v23 = vrot.slane %v16099_v27, %v14695_v15 }
 0x651   : > { %v7537_v2 = vadd.f32 %v7536_v25, %v4442_v59  ;;  %v7578_v22 = vadd.f32 %v7577_v1, %v4450_v7  ;;  %9717 = vmatpush1.bf16.msra.mxu0 %v13085_v57  ;;  %9758 = vmatpush1.bf16.msra.mxu1 %v13087_v63  ;;  %v7538_v3 = vpop.f32.mrb[114].mxu0  ;;  %v7579_v24 = vpop.f32.mrb[114].mxu1  ;;  %v1364_v57 = vld [vmem:[%s14248_s9 + $0xf88] sm:$0xff]  ;;  %v11467_v63 = vrot.slane %v11459_v13, %v14701_v19  ;;  %v16157_v25 = vld [vmem:[%s14248_s9 + $0x390] sm:$0xff] }
 0x652   : > { %v7539_v26 = vpop.f32.mrb[115].mxu0  ;;  %v7580_v10 = vpop.f32.mrb[115].mxu1  ;;  %9796 = vmatprep.subr.bf16.mxu0 %v12834_v9  ;;  %9837 = vmatprep.subr.bf16.mxu1 %v12836_v11  ;;  %v12839_v9 = vcombine.low %v16115_v44, %v1108_v46  ;;  %v1109_v3 = vld [vmem:[%s14248_s9 + $0x790] sm:$0xff]  ;;  %v982_v24 = vld [vmem:[%s14248_s9 + $0x398] sm:$0xff] }
 0x653   : > { %v11429_v38 = vcombine.low %v7535_v0, %v7537_v2  ;;  %v11430_v39 = vcombine.low %v7576_v16, %v7578_v22  ;;  %v13094_v0 = vcombine.high %v16135_v32, %v16142_v53  ;;  %v13096_v16 = vcombine.high %v16145_v40, %v1364_v57 }
 0x654   : > { %13233 = vmatmul.mubr.msk.bf16.vlgmr.msra.gmra.mrb[220].mxu0 %vm634_vm2, %v14282_v8  ;;  %13234 = vmatmul.mubr.msk.bf16.vlgmr.msra.gmra.mrb[220].mxu1 %vm634_vm2, %v14282_v8  ;;  %v4478_v22 = vrot.slane %v16099_v27, %v14706_v20  ;;  %v13093_v26 = vcombine.low %v16135_v32, %v16142_v53  ;;  %v13095_v10 = vcombine.low %v16145_v40, %v1364_v57 }
 0x655   : > { %v11451_v45 = vrot.slane %v11429_v38, %v14701_v19  ;;  %v11458_v52 = vrot.slane %v11430_v39, %v14701_v19  ;;  %9797 = vmatpush1.bf16.msra.mxu0 %v12833_v18  ;;  %9838 = vmatpush1.bf16.msra.mxu1 %v12835_v6  ;;  %v1110_v6 = vld [vmem:[%s14248_s9 + $0x798] sm:$0xff]  ;;  %v4482_v38 = vrot.slane %v16099_v27, %v14722_v35 }
 0x656   : > { %9798 = vmatprep.subr.bf16.mxu0 %v13090_v28  ;;  %9839 = vmatprep.subr.bf16.mxu1 %v13092_v34  ;;  %v4474_v28 = vrot.slane %v16099_v27, %v14718_v29  ;;  %v12842_v39 = vcombine.high %v16157_v25, %v1109_v3  ;;  %v16194_v27 = vld [vmem:[%s14248_s9 + $0xb98] sm:$0xff] }
 0x657   : > { %v11460_v49 = vcombine.low %v11451_v45, %v11458_v52  ;;  %v7616_v33 = vpop.f32.mrb[116].mxu0  ;;  %v7657_v51 = vpop.f32.mrb[116].mxu1  ;;  %9828 = vmatprep.mubr.bf16.mxu0 %v13829_v61  ;;  %9869 = vmatprep.mubr.bf16.mxu1 %v13829_v61 }
 0x658   : > { %v7617_v59 = vadd.f32 %v7616_v33, %v4454_v41  ;;  %v7658_v4 = vadd.f32 %v7657_v51, %v4462_v42  ;;  %v7618_v5 = vpop.f32.mrb[117].mxu0  ;;  %v7659_v7 = vpop.f32.mrb[117].mxu1  ;;  %v12844_v41 = vcombine.high %v982_v24, %v1110_v6  ;;  %v16184_v42 = vld [vmem:[%s14248_s9 + $0xb90] sm:$0xff] }
 0x659   : > { %v11474_v11 = vrot.slane %v11460_v49, %v14701_v19  ;;  %v7619_v12 = vadd.f32 %v7618_v5, %v4458_v30  ;;  %v7660_v14 = vadd.f32 %v7659_v7, %v4466_v31  ;;  %9799 = vmatpush1.bf16.msra.mxu0 %v13089_v48  ;;  %9840 = vmatpush1.bf16.msra.mxu1 %v13091_v50  ;;  %v7620_v17 = vpop.f32.mrb[118].mxu0  ;;  %v7661_v21 = vpop.f32.mrb[118].mxu1  ;;  %v16191_v48 = vld [vmem:[%s14248_s9 + $0xf90] sm:$0xff]  ;;  %v1366_v50 = vld [vmem:[%s14248_s9 + $0xf98] sm:$0xff] }
 0x65a   : > { %v7621_v58 = vpop.f32.mrb[119].mxu0  ;;  %v7662_v13 = vpop.f32.mrb[119].mxu1  ;;  %9878 = vmatprep.subr.bf16.mxu0 %v12838_v47  ;;  %9919 = vmatprep.subr.bf16.mxu1 %v12840_v54  ;;  %v12841_v47 = vcombine.low %v16157_v25, %v1109_v3  ;;  %v16199_v54 = vld [vmem:[%s14658_s11 + $0x78] sm:$0xff]  ;;  %v13098_v57 = vcombine.high %v16184_v42, %v16191_v48  ;;  %v13097_v17 = vcombine.low %v16184_v42, %v16191_v48 }
 0x65b   : > { %v11475_v1 = vcombine.low %v11467_v63, %v11474_v11  ;;  %v11476_v18 = vcombine.low %v7617_v59, %v7619_v12  ;;  %v11477_v2 = vcombine.low %v7658_v4, %v7660_v14  ;;  %v13100_v63 = vcombine.high %v16194_v27, %v1366_v50  ;;  %v16205_v59 = vld [vmem:[%s14248_s9 + $0x3a0] sm:$0xff]  ;;  %v16215_v12 = vld [vmem:[%s14248_s9 + $0x3a8] sm:$0xff] }
 0x65c   : > { %13235 = vmatmul.mubr.msk.bf16.vlgmr.msra.gmra.mrb[224].mxu0 %vm634_vm2, %v14282_v8  ;;  %13236 = vmatmul.mubr.msk.bf16.vlgmr.msra.gmra.mrb[224].mxu1 %vm634_vm2, %v14282_v8  ;;  %v4486_v7 = vrot.slane %v16199_v54, %v14653_v55  ;;  %v16212_v11 = vld [vmem:[%s14248_s9 + $0x7a0] sm:$0xff]  ;;  %v1112_v14 = vld [vmem:[%s14248_s9 + $0x7a8] sm:$0xff]  ;;  %v13099_v21 = vcombine.low %v16194_v27, %v1366_v50  ;;  %v4490_v58 = vrot.slane %v16199_v54, %v14664_v60 }
 0x65d   : > { %12403 = vst [vmem:[%s14847_s24 + $0x68] sm:$0xff] %v11475_v1  ;;  %v16175_v34 = vrot.slane %v11476_v18, %v14701_v19  ;;  %v16178_v36 = vrot.slane %v11477_v2, %v14701_v19  ;;  %9879 = vmatpush1.bf16.msra.mxu0 %v12837_v37  ;;  %9920 = vmatpush1.bf16.msra.mxu1 %v12839_v9  ;;  %v16235_v1 = vld [vmem:[%s14248_s9 + $0xba0] sm:$0xff] }
 0x65e   : > { %9880 = vmatprep.subr.bf16.mxu0 %v13094_v0  ;;  %9921 = vmatprep.subr.bf16.mxu1 %v13096_v16  ;;  %v12843_v37 = vcombine.low %v982_v24, %v1110_v6  ;;  %v4494_v9 = vrot.slane %v16199_v54, %v14656_v56  ;;  %v4498_v0 = vrot.slane %v16199_v54, %v14667_v62  ;;  %v16242_v24 = vld [vmem:[%s14248_s9 + $0xfa0] sm:$0xff]  ;;  %v16245_v6 = vld [vmem:[%s14248_s9 + $0xba8] sm:$0xff] }
 0x65f   : > { %v11508_v43 = vcombine.low %v16175_v34, %v16178_v36  ;;  %v7698_v44 = vpop.f32.mrb[120].mxu0  ;;  %v7739_v46 = vpop.f32.mrb[120].mxu1  ;;  %9910 = vmatprep.mubr.bf16.mxu0 %v13829_v61  ;;  %9951 = vmatprep.mubr.bf16.mxu1 %v13829_v61  ;;  %v12846_v16 = vcombine.high %v16205_v59, %v16212_v11  ;;  %v12848_v25 = vcombine.high %v16215_v12, %v1112_v14 }
 0x660   : > { %v7699_v30 = vadd.f32 %v7698_v44, %v4470_v23  ;;  %v7740_v45 = vadd.f32 %v7739_v46, %v4478_v22  ;;  %v7700_v52 = vpop.f32.mrb[121].mxu0  ;;  %v7741_v31 = vpop.f32.mrb[121].mxu1  ;;  %v12845_v3 = vcombine.low %v16205_v59, %v16212_v11  ;;  %v4502_v50 = vrot.slane %v16199_v54, %v14695_v15 }
 0x661   : > { %v7701_v32 = vadd.f32 %v7700_v52, %v4474_v28  ;;  %v7742_v49 = vadd.f32 %v7741_v31, %v4482_v38  ;;  %9881 = vmatpush1.bf16.msra.mxu0 %v13093_v26  ;;  %9922 = vmatpush1.bf16.msra.mxu1 %v13095_v10  ;;  %v7702_v33 = vpop.f32.mrb[122].mxu0  ;;  %v7743_v51 = vpop.f32.mrb[122].mxu1  ;;  %v1368_v26 = vld [vmem:[%s14248_s9 + $0xfa8] sm:$0xff]  ;;  %v11516_v10 = vrot.slane %v11508_v43, %v14701_v19  ;;  %v16257_v52 = vld [vmem:[%s14248_s9 + $0x3b0] sm:$0xff] }
 0x662   : > { %v7703_v53 = vpop.f32.mrb[123].mxu0  ;;  %v7744_v40 = vpop.f32.mrb[123].mxu1  ;;  %9960 = vmatprep.subr.bf16.mxu0 %v12842_v39  ;;  %10001 = vmatprep.subr.bf16.mxu1 %v12844_v41  ;;  %v12847_v39 = vcombine.low %v16215_v12, %v1112_v14  ;;  %v1113_v33 = vld [vmem:[%s14248_s9 + $0x7b0] sm:$0xff]  ;;  %v986_v51 = vld [vmem:[%s14248_s9 + $0x3b8] sm:$0xff] }
 0x663   : > { %v11478_v4 = vcombine.low %v7699_v30, %v7701_v32  ;;  %v11479_v5 = vcombine.low %v7740_v45, %v7742_v49  ;;  %v13102_v30 = vcombine.high %v16235_v1, %v16242_v24  ;;  %v13104_v45 = vcombine.high %v16245_v6, %v1368_v26 }
 0x664   : > { %13237 = vmatmul.mubr.msk.bf16.vlgmr.msra.gmra.mrb[228].mxu0 %vm634_vm2, %v14282_v8  ;;  %13238 = vmatmul.mubr.msk.bf16.vlgmr.msra.gmra.mrb[228].mxu1 %vm634_vm2, %v14282_v8  ;;  %v4510_v49 = vrot.slane %v16199_v54, %v14706_v20  ;;  %v13101_v53 = vcombine.low %v16235_v1, %v16242_v24  ;;  %v13103_v40 = vcombine.low %v16245_v6, %v1368_v26 }
 0x665   : > { %v11500_v13 = vrot.slane %v11478_v4, %v14701_v19  ;;  %v11507_v23 = vrot.slane %v11479_v5, %v14701_v19  ;;  %9961 = vmatpush1.bf16.msra.mxu0 %v12841_v47  ;;  %10002 = vmatpush1.bf16.msra.mxu1 %v12843_v37  ;;  %v1114_v37 = vld [vmem:[%s14248_s9 + $0x7b8] sm:$0xff]  ;;  %v4514_v4 = vrot.slane %v16199_v54, %v14722_v35 }
 0x666   : > { %9962 = vmatprep.subr.bf16.mxu0 %v13098_v57  ;;  %10003 = vmatprep.subr.bf16.mxu1 %v13100_v63  ;;  %v4506_v57 = vrot.slane %v16199_v54, %v14718_v29  ;;  %v12850_v5 = vcombine.high %v16257_v52, %v1113_v33  ;;  %v16294_v54 = vld [vmem:[%s14248_s9 + $0xbb8] sm:$0xff] }
 0x667   : > { %v11509_v18 = vcombine.low %v11500_v13, %v11507_v23  ;;  %v7780_v2 = vpop.f32.mrb[124].mxu0  ;;  %v7821_v22 = vpop.f32.mrb[124].mxu1  ;;  %9992 = vmatprep.mubr.bf16.mxu0 %v13829_v61  ;;  %10033 = vmatprep.mubr.bf16.mxu1 %v13829_v61 }
 0x668   : > { %v7781_v28 = vadd.f32 %v7780_v2, %v4486_v7  ;;  %v7822_v34 = vadd.f32 %v7821_v22, %v4494_v9  ;;  %v7782_v36 = vpop.f32.mrb[125].mxu0  ;;  %v7823_v38 = vpop.f32.mrb[125].mxu1  ;;  %v12852_v7 = vcombine.high %v986_v51, %v1114_v37  ;;  %v16284_v9 = vld [vmem:[%s14248_s9 + $0xbb0] sm:$0xff] }
 0x669   : > { %v11523_v41 = vrot.slane %v11509_v18, %v14701_v19  ;;  %v7783_v42 = vadd.f32 %v7782_v36, %v4490_v58  ;;  %v7824_v44 = vadd.f32 %v7823_v38, %v4498_v0  ;;  %9963 = vmatpush1.bf16.msra.mxu0 %v13097_v17  ;;  %10004 = vmatpush1.bf16.msra.mxu1 %v13099_v21  ;;  %v7784_v46 = vpop.f32.mrb[126].mxu0  ;;  %v7825_v48 = vpop.f32.mrb[126].mxu1  ;;  %v16291_v17 = vld [vmem:[%s14248_s9 + $0xfb0] sm:$0xff]  ;;  %v1370_v21 = vld [vmem:[%s14248_s9 + $0xfb8] sm:$0xff] }
 0x66a   : > { %v7785_v27 = vpop.f32.mrb[127].mxu0  ;;  %v7826_v43 = vpop.f32.mrb[127].mxu1  ;;  %10042 = vmatprep.subr.bf16.mxu0 %v12846_v16  ;;  %10083 = vmatprep.subr.bf16.mxu1 %v12848_v25  ;;  %v12849_v16 = vcombine.low %v16257_v52, %v1113_v33  ;;  %v16299_v25 = vld [vmem:[%s14658_s11 + $0x80] sm:$0xff]  ;;  %v13106_v26 = vcombine.high %v16284_v9, %v16291_v17  ;;  %v13105_v46 = vcombine.low %v16284_v9, %v16291_v17 }
 0x66b   : > { %v11524_v31 = vcombine.low %v11516_v10, %v11523_v41  ;;  %v11525_v47 = vcombine.low %v7781_v28, %v7783_v42  ;;  %v11526_v32 = vcombine.low %v7822_v34, %v7824_v44  ;;  %v13108_v10 = vcombine.high %v16294_v54, %v1370_v21  ;;  %v16305_v28 = vld [vmem:[%s14248_s9 + $0x3c0] sm:$0xff]  ;;  %v16315_v42 = vld [vmem:[%s14248_s9 + $0x3c8] sm:$0xff] }
 0x66c   : > { %13239 = vmatmul.mubr.msk.bf16.vlgmr.msra.gmra.mrb[232].mxu0 %vm634_vm2, %v14282_v8  ;;  %13240 = vmatmul.mubr.msk.bf16.vlgmr.msra.gmra.mrb[232].mxu1 %vm634_vm2, %v14282_v8  ;;  %v4518_v38 = vrot.slane %v16299_v25, %v14653_v55  ;;  %v16312_v41 = vld [vmem:[%s14248_s9 + $0x7c0] sm:$0xff]  ;;  %v1116_v44 = vld [vmem:[%s14248_s9 + $0x7c8] sm:$0xff]  ;;  %v13107_v48 = vcombine.low %v16294_v54, %v1370_v21  ;;  %v4522_v27 = vrot.slane %v16299_v25, %v14664_v60 }
 0x66d   : > { %12404 = vst [vmem:[%s14847_s24 + $0x70] sm:$0xff] %v11524_v31  ;;  %v16275_v63 = vrot.slane %v11525_v47, %v14701_v19  ;;  %v16278_v59 = vrot.slane %v11526_v32, %v14701_v19  ;;  %10043 = vmatpush1.bf16.msra.mxu0 %v12845_v3  ;;  %10084 = vmatpush1.bf16.msra.mxu1 %v12847_v39  ;;  %v16335_v31 = vld [vmem:[%s14248_s9 + $0xbc0] sm:$0xff] }
 0x66e   : > { %10044 = vmatprep.subr.bf16.mxu0 %v13102_v30  ;;  %10085 = vmatprep.subr.bf16.mxu1 %v13104_v45  ;;  %v12851_v3 = vcombine.low %v986_v51, %v1114_v37  ;;  %v4526_v39 = vrot.slane %v16299_v25, %v14656_v56  ;;  %v4530_v30 = vrot.slane %v16299_v25, %v14667_v62  ;;  %v16342_v51 = vld [vmem:[%s14248_s9 + $0xfc0] sm:$0xff]  ;;  %v16345_v37 = vld [vmem:[%s14248_s9 + $0xbc8] sm:$0xff] }
 0x66f   : > { %v11557_v11 = vcombine.low %v16275_v63, %v16278_v59  ;;  %v7862_v12 = vpop.f32.mrb[128].mxu0  ;;  %v7903_v14 = vpop.f32.mrb[128].mxu1  ;;  %10074 = vmatprep.mubr.bf16.mxu0 %v13829_v61  ;;  %10115 = vmatprep.mubr.bf16.mxu1 %v13829_v61  ;;  %v12854_v45 = vcombine.high %v16305_v28, %v16312_v41  ;;  %v12856_v52 = vcombine.high %v16315_v42, %v1116_v44 }
 0x670   : > { %v7863_v58 = vadd.f32 %v7862_v12, %v4502_v50  ;;  %v7904_v13 = vadd.f32 %v7903_v14, %v4510_v49  ;;  %v7864_v23 = vpop.f32.mrb[129].mxu0  ;;  %v7905_v0 = vpop.f32.mrb[129].mxu1  ;;  %v12853_v33 = vcombine.low %v16305_v28, %v16312_v41  ;;  %v4534_v21 = vrot.slane %v16299_v25, %v14695_v15 }
 0x671   : > { %v7865_v1 = vadd.f32 %v7864_v23, %v4506_v57  ;;  %v7906_v18 = vadd.f32 %v7905_v0, %v4514_v4  ;;  %10045 = vmatpush1.bf16.msra.mxu0 %v13101_v53  ;;  %10086 = vmatpush1.bf16.msra.mxu1 %v13103_v40  ;;  %v7866_v2 = vpop.f32.mrb[130].mxu0  ;;  %v7907_v22 = vpop.f32.mrb[130].mxu1  ;;  %v1372_v53 = vld [vmem:[%s14248_s9 + $0xfc8] sm:$0xff]  ;;  %v11565_v40 = vrot.slane %v11557_v11, %v14701_v19  ;;  %v16357_v23 = vld [vmem:[%s14248_s9 + $0x3d0] sm:$0xff] }
 0x672   : > { %v7867_v24 = vpop.f32.mrb[131].mxu0  ;;  %v7908_v6 = vpop.f32.mrb[131].mxu1  ;;  %10124 = vmatprep.subr.bf16.mxu0 %v12850_v5  ;;  %10165 = vmatprep.subr.bf16.mxu1 %v12852_v7  ;;  %v12855_v5 = vcombine.low %v16315_v42, %v1116_v44  ;;  %v1117_v2 = vld [vmem:[%s14248_s9 + $0x7d0] sm:$0xff]  ;;  %v990_v22 = vld [vmem:[%s14248_s9 + $0x3d8] sm:$0xff] }
 0x673   : > { %v11527_v34 = vcombine.low %v7863_v58, %v7865_v1  ;;  %v11528_v36 = vcombine.low %v7904_v13, %v7906_v18  ;;  %v13110_v58 = vcombine.high %v16335_v31, %v16342_v51  ;;  %v13112_v13 = vcombine.high %v16345_v37, %v1372_v53 }
 0x674   : > { %13241 = vmatmul.mubr.msk.bf16.vlgmr.msra.gmra.mrb[236].mxu0 %vm634_vm2, %v14282_v8  ;;  %13242 = vmatmul.mubr.msk.bf16.vlgmr.msra.gmra.mrb[236].mxu1 %vm634_vm2, %v14282_v8  ;;  %v4542_v18 = vrot.slane %v16299_v25, %v14706_v20  ;;  %v13109_v24 = vcombine.low %v16335_v31, %v16342_v51  ;;  %v13111_v6 = vcombine.low %v16345_v37, %v1372_v53 }
 0x675   : > { %v11549_v43 = vrot.slane %v11527_v34, %v14701_v19  ;;  %v11556_v50 = vrot.slane %v11528_v36, %v14701_v19  ;;  %10125 = vmatpush1.bf16.msra.mxu0 %v12849_v16  ;;  %10166 = vmatpush1.bf16.msra.mxu1 %v12851_v3  ;;  %v1118_v3 = vld [vmem:[%s14248_s9 + $0x7d8] sm:$0xff]  ;;  %v4546_v34 = vrot.slane %v16299_v25, %v14722_v35 }
 0x676   : > { %10126 = vmatprep.subr.bf16.mxu0 %v13106_v26  ;;  %10167 = vmatprep.subr.bf16.mxu1 %v13108_v10  ;;  %v4538_v26 = vrot.slane %v16299_v25, %v14718_v29  ;;  %v12858_v36 = vcombine.high %v16357_v23, %v1117_v2  ;;  %v16394_v25 = vld [vmem:[%s14248_s9 + $0xbd8] sm:$0xff] }
 0x677   : > { %v11558_v47 = vcombine.low %v11549_v43, %v11556_v50  ;;  %v7944_v32 = vpop.f32.mrb[132].mxu0  ;;  %v7985_v49 = vpop.f32.mrb[132].mxu1  ;;  %10156 = vmatprep.mubr.bf16.mxu0 %v13829_v61  ;;  %10197 = vmatprep.mubr.bf16.mxu1 %v13829_v61 }
 0x678   : > { %v7945_v57 = vadd.f32 %v7944_v32, %v4518_v38  ;;  %v7986_v63 = vadd.f32 %v7985_v49, %v4526_v39  ;;  %v7946_v59 = vpop.f32.mrb[133].mxu0  ;;  %v7987_v4 = vpop.f32.mrb[133].mxu1  ;;  %v12860_v38 = vcombine.high %v990_v22, %v1118_v3  ;;  %v16384_v39 = vld [vmem:[%s14248_s9 + $0xbd0] sm:$0xff] }
 0x679   : > { %v11572_v7 = vrot.slane %v11558_v47, %v14701_v19  ;;  %v7947_v9 = vadd.f32 %v7946_v59, %v4522_v27  ;;  %v7988_v12 = vadd.f32 %v7987_v4, %v4530_v30  ;;  %10127 = vmatpush1.bf16.msra.mxu0 %v13105_v46  ;;  %10168 = vmatpush1.bf16.msra.mxu1 %v13107_v48  ;;  %v7948_v14 = vpop.f32.mrb[134].mxu0  ;;  %v7989_v17 = vpop.f32.mrb[134].mxu1  ;;  %v16391_v46 = vld [vmem:[%s14248_s9 + $0xfd0] sm:$0xff]  ;;  %v1374_v48 = vld [vmem:[%s14248_s9 + $0xfd8] sm:$0xff] }
 0x67a   : > { %v7949_v54 = vpop.f32.mrb[135].mxu0  ;;  %v7990_v11 = vpop.f32.mrb[135].mxu1  ;;  %10206 = vmatprep.subr.bf16.mxu0 %v12854_v45  ;;  %10247 = vmatprep.subr.bf16.mxu1 %v12856_v52  ;;  %v12857_v45 = vcombine.low %v16357_v23, %v1117_v2  ;;  %v16399_v52 = vld [vmem:[%s14658_s11 + $0x88] sm:$0xff]  ;;  %v13114_v53 = vcombine.high %v16384_v39, %v16391_v46  ;;  %v13113_v14 = vcombine.low %v16384_v39, %v16391_v46 }
 0x67b   : > { %v11573_v0 = vcombine.low %v11565_v40, %v11572_v7  ;;  %v11574_v16 = vcombine.low %v7945_v57, %v7947_v9  ;;  %v11575_v1 = vcombine.low %v7986_v63, %v7988_v12  ;;  %v13116_v40 = vcombine.high %v16394_v25, %v1374_v48  ;;  %v16405_v57 = vld [vmem:[%s14248_s9 + $0x3e0] sm:$0xff]  ;;  %v16415_v9 = vld [vmem:[%s14248_s9 + $0x3e8] sm:$0xff] }
 0x67c   : > { %13243 = vmatmul.mubr.msk.bf16.vlgmr.msra.gmra.mrb[240].mxu0 %vm634_vm2, %v14282_v8  ;;  %13244 = vmatmul.mubr.msk.bf16.vlgmr.msra.gmra.mrb[240].mxu1 %vm634_vm2, %v14282_v8  ;;  %v4550_v4 = vrot.slane %v16399_v52, %v14653_v55  ;;  %v16412_v7 = vld [vmem:[%s14248_s9 + $0x7e0] sm:$0xff]  ;;  %v1120_v12 = vld [vmem:[%s14248_s9 + $0x7e8] sm:$0xff]  ;;  %v13115_v17 = vcombine.low %v16394_v25, %v1374_v48  ;;  %v4554_v54 = vrot.slane %v16399_v52, %v14664_v60 }
 0x67d   : > { %12405 = vst [vmem:[%s14847_s24 + $0x78] sm:$0xff] %v11573_v0  ;;  %v16375_v10 = vrot.slane %v11574_v16, %v14701_v19  ;;  %v16378_v28 = vrot.slane %v11575_v1, %v14701_v19  ;;  %10207 = vmatpush1.bf16.msra.mxu0 %v12853_v33  ;;  %10248 = vmatpush1.bf16.msra.mxu1 %v12855_v5  ;;  %v16435_v0 = vld [vmem:[%s14248_s9 + $0xbe0] sm:$0xff] }
 0x67e   : > { %10208 = vmatprep.subr.bf16.mxu0 %v13110_v58  ;;  %10249 = vmatprep.subr.bf16.mxu1 %v13112_v13  ;;  %v12859_v33 = vcombine.low %v990_v22, %v1118_v3  ;;  %v4558_v5 = vrot.slane %v16399_v52, %v14656_v56  ;;  %v4562_v58 = vrot.slane %v16399_v52, %v14667_v62  ;;  %v16442_v22 = vld [vmem:[%s14248_s9 + $0xfe0] sm:$0xff]  ;;  %v16445_v3 = vld [vmem:[%s14248_s9 + $0xbe8] sm:$0xff] }
 0x67f   : > { %v11606_v41 = vcombine.low %v16375_v10, %v16378_v28  ;;  %v8026_v42 = vpop.f32.mrb[136].mxu0  ;;  %v8067_v44 = vpop.f32.mrb[136].mxu1  ;;  %10238 = vmatprep.mubr.bf16.mxu0 %v13829_v61  ;;  %10279 = vmatprep.mubr.bf16.mxu1 %v13829_v61  ;;  %v12862_v13 = vcombine.high %v16405_v57, %v16412_v7  ;;  %v12864_v23 = vcombine.high %v16415_v9, %v1120_v12 }
 0x680   : > { %v8027_v27 = vadd.f32 %v8026_v42, %v4534_v21  ;;  %v8068_v43 = vadd.f32 %v8067_v44, %v4542_v18  ;;  %v8028_v50 = vpop.f32.mrb[137].mxu0  ;;  %v8069_v30 = vpop.f32.mrb[137].mxu1  ;;  %v12861_v2 = vcombine.low %v16405_v57, %v16412_v7  ;;  %v4566_v48 = vrot.slane %v16399_v52, %v14695_v15 }
 0x681   : > { %v8029_v31 = vadd.f32 %v8028_v50, %v4538_v26  ;;  %v8070_v47 = vadd.f32 %v8069_v30, %v4546_v34  ;;  %10209 = vmatpush1.bf16.msra.mxu0 %v13109_v24  ;;  %10250 = vmatpush1.bf16.msra.mxu1 %v13111_v6  ;;  %v8030_v32 = vpop.f32.mrb[138].mxu0  ;;  %v8071_v49 = vpop.f32.mrb[138].mxu1  ;;  %v1376_v24 = vld [vmem:[%s14248_s9 + $0xfe8] sm:$0xff]  ;;  %v11614_v6 = vrot.slane %v11606_v41, %v14701_v19  ;;  %v993_v50 = vld [vmem:[%s14248_s9 + $0x3f0] sm:$0xff] }
 0x682   : > { %v8031_v51 = vpop.f32.mrb[139].mxu0  ;;  %v8072_v37 = vpop.f32.mrb[139].mxu1  ;;  %10288 = vmatprep.subr.bf16.mxu0 %v12858_v36  ;;  %10329 = vmatprep.subr.bf16.mxu1 %v12860_v38  ;;  %v12863_v36 = vcombine.low %v16415_v9, %v1120_v12  ;;  %v1121_v32 = vld [vmem:[%s14248_s9 + $0x7f0] sm:$0xff]  ;;  %v994_v49 = vld [vmem:[%s14248_s9 + $0x3f8] sm:$0xff] }
 0x683   : > { %v11576_v63 = vcombine.low %v8027_v27, %v8029_v31  ;;  %v11577_v59 = vcombine.low %v8068_v43, %v8070_v47  ;;  %v13118_v27 = vcombine.high %v16435_v0, %v16442_v22  ;;  %v13120_v43 = vcombine.high %v16445_v3, %v1376_v24 }
 0x684   : > { %13245 = vmatmul.mubr.msk.bf16.vlgmr.msra.gmra.mrb[244].mxu0 %vm634_vm2, %v14282_v8  ;;  %13246 = vmatmul.mubr.msk.bf16.vlgmr.msra.gmra.mrb[244].mxu1 %vm634_vm2, %v14282_v8  ;;  %v4574_v47 = vrot.slane %v16399_v52, %v14706_v20  ;;  %v13117_v51 = vcombine.low %v16435_v0, %v16442_v22  ;;  %v13119_v37 = vcombine.low %v16445_v3, %v1376_v24 }
 0x685   : > { %v11598_v11 = vrot.slane %v11576_v63, %v14701_v19  ;;  %v11605_v21 = vrot.slane %v11577_v59, %v14701_v19  ;;  %10289 = vmatpush1.bf16.msra.mxu0 %v12857_v45  ;;  %10330 = vmatpush1.bf16.msra.mxu1 %v12859_v33  ;;  %v1122_v33 = vld [vmem:[%s14248_s9 + $0x7f8] sm:$0xff]  ;;  %v4578_v63 = vrot.slane %v16399_v52, %v14722_v35 }
 0x686   : > { %10290 = vmatprep.subr.bf16.mxu0 %v13114_v53  ;;  %10331 = vmatprep.subr.bf16.mxu1 %v13116_v40  ;;  %v4570_v53 = vrot.slane %v16399_v52, %v14718_v29  ;;  %v12866_v59 = vcombine.high %v993_v50, %v1121_v32 }
 0x687   : > { %v11607_v16 = vcombine.low %v11598_v11, %v11605_v21  ;;  %v8108_v1 = vpop.f32.mrb[140].mxu0  ;;  %v8149_v18 = vpop.f32.mrb[140].mxu1  ;;  %10320 = vmatprep.mubr.bf16.mxu0 %v13829_v61  ;;  %10361 = vmatprep.mubr.bf16.mxu1 %v13829_v61 }
 0x688   : > { %v8109_v26 = vadd.f32 %v8108_v1, %v4550_v4  ;;  %v8150_v10 = vadd.f32 %v8149_v18, %v4558_v5  ;;  %v8110_v28 = vpop.f32.mrb[141].mxu0  ;;  %v8151_v34 = vpop.f32.mrb[141].mxu1  ;;  %v12868_v4 = vcombine.high %v994_v49, %v1122_v33  ;;  %v1249_v5 = vld [vmem:[%s14248_s9 + $0xbf0] sm:$0xff] }
 0x689   : > { %v11621_v38 = vrot.slane %v11607_v16, %v14701_v19  ;;  %v8111_v39 = vadd.f32 %v8110_v28, %v4554_v54  ;;  %v8152_v42 = vadd.f32 %v8151_v34, %v4562_v58  ;;  %10291 = vmatpush1.bf16.msra.mxu0 %v13113_v14  ;;  %10332 = vmatpush1.bf16.msra.mxu1 %v13115_v17  ;;  %v8112_v44 = vpop.f32.mrb[142].mxu0  ;;  %v8153_v46 = vpop.f32.mrb[142].mxu1  ;;  %v1377_v14 = vld [vmem:[%s14248_s9 + $0xff0] sm:$0xff]  ;;  %v1250_v17 = vld [vmem:[%s14248_s9 + $0xbf8] sm:$0xff] }
 0x68a   : > { %v8113_v25 = vpop.f32.mrb[143].mxu0  ;;  %v8154_v41 = vpop.f32.mrb[143].mxu1  ;;  %10370 = vmatprep.subr.bf16.mxu0 %v12862_v13  ;;  %10411 = vmatprep.subr.bf16.mxu1 %v12864_v23  ;;  %v1378_v54 = vld [vmem:[%s14248_s9 + $0xff8] sm:$0xff]  ;;  %v12865_v13 = vcombine.low %v993_v50, %v1121_v32  ;;  %v16483_v23 = vld [vmem:[%s14658_s11 + $0x90] sm:$0xff]  ;;  %v13122_v24 = vcombine.high %v1249_v5, %v1377_v14 }
 0x68b   : > { %v11622_v30 = vcombine.low %v11614_v6, %v11621_v38  ;;  %v11623_v45 = vcombine.low %v8109_v26, %v8111_v39  ;;  %v11624_v31 = vcombine.low %v8150_v10, %v8152_v42  ;;  %v13124_v6 = vcombine.high %v1250_v17, %v1378_v54 }
 0x68c   : > { %13247 = vmatmul.mubr.msk.bf16.vlgmr.msra.gmra.mrb[248].mxu0 %vm634_vm2, %v14282_v8  ;;  %13248 = vmatmul.mubr.msk.bf16.vlgmr.msra.gmra.mrb[248].mxu1 %vm634_vm2, %v14282_v8  ;;  %v4582_v28 = vrot.slane %v16483_v23, %v14653_v55  ;;  %v4590_v34 = vrot.slane %v16483_v23, %v14656_v56  ;;  %v13123_v38 = vcombine.low %v1250_v17, %v1378_v54 }
 0x68d   : > { %12406 = vst [vmem:[%s14847_s24 + $0x80] sm:$0xff] %v11622_v30  ;;  %v11633_v40 = vrot.slane %v11623_v45, %v14701_v19  ;;  %v11640_v57 = vrot.slane %v11624_v31, %v14701_v19  ;;  %10371 = vmatpush1.bf16.msra.mxu0 %v12861_v2  ;;  %10412 = vmatpush1.bf16.msra.mxu1 %v12863_v36 }
 0x68e   : > { %10372 = vmatprep.subr.bf16.mxu0 %v13118_v27  ;;  %10413 = vmatprep.subr.bf16.mxu1 %v13120_v43  ;;  %v12867_v2 = vcombine.low %v994_v49, %v1122_v33  ;;  %v13121_v36 = vcombine.low %v1249_v5, %v1377_v14  ;;  %v4586_v39 = vrot.slane %v16483_v23, %v14664_v60 }
 0x68f   : > { %v11655_v7 = vcombine.low %v11633_v40, %v11640_v57  ;;  %v8190_v9 = vpop.f32.mrb[144].mxu0  ;;  %v8231_v12 = vpop.f32.mrb[144].mxu1  ;;  %10402 = vmatprep.mubr.bf16.mxu0 %v13829_v61  ;;  %10443 = vmatprep.mubr.bf16.mxu1 %v13829_v61  ;;  %v4594_v46 = vrot.slane %v16483_v23, %v14667_v62  ;;  %v4598_v57 = vrot.slane %v16483_v23, %v14695_v15 }
 0x690   : > { %v8191_v11 = vadd.f32 %v8190_v9, %v4566_v48  ;;  %v8232_v21 = vadd.f32 %v8231_v12, %v4574_v47  ;;  %v8192_v58 = vpop.f32.mrb[145].mxu0  ;;  %v8233_v52 = vpop.f32.mrb[145].mxu1  ;;  %v4602_v5 = vrot.slane %v16483_v23, %v14718_v29 }
 0x691   : > { %v8193_v0 = vadd.f32 %v8192_v58, %v4570_v53  ;;  %v8234_v16 = vadd.f32 %v8233_v52, %v4578_v63  ;;  %10373 = vmatpush1.bf16.msra.mxu0 %v13117_v51  ;;  %10414 = vmatpush1.bf16.msra.mxu1 %v13119_v37  ;;  %v8194_v1 = vpop.f32.mrb[146].mxu0  ;;  %v8235_v18 = vpop.f32.mrb[146].mxu1  ;;  %v11663_v27 = vrot.slane %v11655_v7, %v14701_v19 }
 0x692   : > { %v8195_v22 = vpop.f32.mrb[147].mxu0  ;;  %v8236_v3 = vpop.f32.mrb[147].mxu1  ;;  %10452 = vmatprep.subr.bf16.mxu0 %v12866_v59  ;;  %10493 = vmatprep.subr.bf16.mxu1 %v12868_v4  ;;  %v4606_v63 = vrot.slane %v16483_v23, %v14706_v20  ;;  %v4610_v7 = vrot.slane %v16483_v23, %v14722_v35 }
 0x693   : > { %v11625_v26 = vcombine.low %v8191_v11, %v8193_v0  ;;  %v11626_v10 = vcombine.low %v8232_v21, %v8234_v16  ;;  %v1398_v0 = vld [vmem:[%s14658_s11 + $0x98] sm:$0xff] }
 0x694   : > { %13249 = vmatmul.mubr.msk.bf16.vlgmr.msra.gmra.mrb[252].mxu0 %vm634_vm2, %v14282_v8  ;;  %13250 = vmatmul.mubr.msk.bf16.vlgmr.msra.gmra.mrb[252].mxu1 %vm634_vm2, %v14282_v8  ;;  %v4614_v22 = vrot.slane %v1398_v0, %v14653_v55  ;;  %v4622_v23 = vrot.slane %v1398_v0, %v14656_v56 }
 0x695   : > { %v11647_v42 = vrot.slane %v11625_v26, %v14701_v19  ;;  %v11654_v44 = vrot.slane %v11626_v10, %v14701_v19  ;;  %10453 = vmatpush1.bf16.msra.mxu0 %v12865_v13  ;;  %10494 = vmatpush1.bf16.msra.mxu1 %v12867_v2  ;;  %v4626_v26 = vrot.slane %v1398_v0, %v14667_v62 }
 0x696   : > { %10454 = vmatprep.subr.bf16.mxu0 %v13122_v24  ;;  %10495 = vmatprep.subr.bf16.mxu1 %v13124_v6  ;;  %v4618_v6 = vrot.slane %v1398_v0, %v14664_v60 }
 0x697   : > { %v11656_v25 = vcombine.low %v11647_v42, %v11654_v44  ;;  %v8272_v41 = vpop.f32.mrb[148].mxu0  ;;  %v8313_v48 = vpop.f32.mrb[148].mxu1  ;;  %10484 = vmatprep.mubr.bf16.mxu0 %v13829_v61  ;;  %10525 = vmatprep.mubr.bf16.mxu1 %v13829_v61 }
 0x698   : > { %v8273_v43 = vadd.f32 %v8272_v41, %v4582_v28  ;;  %v8314_v50 = vadd.f32 %v8313_v48, %v4590_v34  ;;  %v8274_v30 = vpop.f32.mrb[149].mxu0  ;;  %v8315_v45 = vpop.f32.mrb[149].mxu1 }
 0x699   : > { %v11670_v31 = vrot.slane %v11656_v25, %v14701_v19  ;;  %v8275_v47 = vadd.f32 %v8274_v30, %v4586_v39  ;;  %v8316_v32 = vadd.f32 %v8315_v45, %v4594_v46  ;;  %10455 = vmatpush1.bf16.msra.mxu0 %v13121_v36  ;;  %10496 = vmatpush1.bf16.msra.mxu1 %v13123_v38  ;;  %v8276_v49 = vpop.f32.mrb[150].mxu0  ;;  %v8317_v33 = vpop.f32.mrb[150].mxu1 }
 0x69a   : > { %v8277_v51 = vpop.f32.mrb[151].mxu0  ;;  %v8318_v37 = vpop.f32.mrb[151].mxu1 }
 0x69b   : > { %v11671_v53 = vcombine.low %v11663_v27, %v11670_v31  ;;  %v11672_v40 = vcombine.low %v8273_v43, %v8275_v47  ;;  %v11673_v61 = vcombine.low %v8314_v50, %v8316_v32  ;;  %v4630_v47 = vrot.slane %v1398_v0, %v14695_v15 }
 0x69c   : > { %13251 = vmatmul.mubr.msk.bf16.vlgmr.msra.gmra.mrb[0].mxu0 %vm634_vm2, %v14282_v8  ;;  %13252 = vmatmul.mubr.msk.bf16.vlgmr.msra.gmra.mrb[0].mxu1 %vm634_vm2, %v14282_v8  ;;  %v4638_v32 = vrot.slane %v1398_v0, %v14706_v20  ;;  %v4634_v51 = vrot.slane %v1398_v0, %v14718_v29  ;;  %v4642_v37 = vrot.slane %v1398_v0, %v14722_v35 }
 0x69d   : > { %12407 = vst [vmem:[%s14847_s24 + $0x88] sm:$0xff] %v11671_v53  ;;  %v11682_v59 = vrot.slane %v11672_v40, %v14701_v19  ;;  %v11689_v4 = vrot.slane %v11673_v61, %v14701_v19 }
 0x69f   : > { %v11704_v9 = vcombine.low %v11682_v59, %v11689_v4  ;;  %v8354_v8 = vpop.f32.mrb[152].mxu0  ;;  %v8395_v12 = vpop.f32.mrb[152].mxu1 }
 0x6a0   : > { %v8355_v14 = vadd.f32 %v8354_v8, %v4598_v57  ;;  %v8396_v17 = vadd.f32 %v8395_v12, %v4606_v63  ;;  %v8356_v54 = vpop.f32.mrb[153].mxu0  ;;  %v8397_v11 = vpop.f32.mrb[153].mxu1  ;;  %v1399_v12 = vld [vmem:[%s14658_s11 + $0xa0] sm:$0xff] }
 0x6a1   : > { %v8357_v21 = vadd.f32 %v8356_v54, %v4602_v5  ;;  %v8398_v58 = vadd.f32 %v8397_v11, %v4610_v7  ;;  %v8358_v52 = vpop.f32.mrb[154].mxu0  ;;  %v8399_v13 = vpop.f32.mrb[154].mxu1  ;;  %v11712_v44 = vrot.slane %v11704_v9, %v14701_v19  ;;  %v4650_v0 = vrot.slane %v1399_v12, %v14664_v60 }
 0x6a2   : > { %v8359_v16 = vpop.f32.mrb[155].mxu0  ;;  %v8400_v1 = vpop.f32.mrb[155].mxu1 }
 0x6a3   : > { %v11674_v18 = vcombine.low %v8355_v14, %v8357_v21  ;;  %v11675_v2 = vcombine.low %v8396_v17, %v8398_v58  ;;  %v4646_v21 = vrot.slane %v1399_v12, %v14653_v55  ;;  %v4654_v58 = vrot.slane %v1399_v12, %v14656_v56 }
 0x6a4   : > { %v4658_v16 = vrot.slane %v1399_v12, %v14667_v62 }
 0x6a5   : > { %v11696_v3 = vrot.slane %v11674_v18, %v14701_v19  ;;  %v11703_v24 = vrot.slane %v11675_v2, %v14701_v19 }
 0x6a7   : > { %v11705_v10 = vcombine.low %v11696_v3, %v11703_v24  ;;  %v8436_v28 = vpop.f32.mrb[156].mxu0  ;;  %v8477_v34 = vpop.f32.mrb[156].mxu1 }
 0x6a8   : > { %v8437_v36 = vadd.f32 %v8436_v28, %v4614_v22  ;;  %v8478_v38 = vadd.f32 %v8477_v34, %v4622_v23  ;;  %v8438_v39 = vpop.f32.mrb[157].mxu0  ;;  %v8479_v42 = vpop.f32.mrb[157].mxu1 }
 0x6a9   : > { %v11719_v46 = vrot.slane %v11705_v10, %v14701_v19  ;;  %v8439_v25 = vadd.f32 %v8438_v39, %v4618_v6  ;;  %v8480_v41 = vadd.f32 %v8479_v42, %v4626_v26  ;;  %v8440_v48 = vpop.f32.mrb[158].mxu0  ;;  %v8481_v27 = vpop.f32.mrb[158].mxu1 }
 0x6aa   : > { %v8441_v43 = vpop.f32.mrb[159].mxu0  ;;  %v8482_v50 = vpop.f32.mrb[159].mxu1 }
 0x6ab   : > { %v11720_v30 = vcombine.low %v11712_v44, %v11719_v46  ;;  %v11721_v45 = vcombine.low %v8437_v36, %v8439_v25  ;;  %v11722_v31 = vcombine.low %v8478_v38, %v8480_v41  ;;  %v4662_v25 = vrot.slane %v1399_v12, %v14695_v15 }
 0x6ac   : > { %v4670_v41 = vrot.slane %v1399_v12, %v14706_v20  ;;  %v4666_v43 = vrot.slane %v1399_v12, %v14718_v29  ;;  %v4674_v50 = vrot.slane %v1399_v12, %v14722_v35 }
 0x6ad   : > { %12408 = vst [vmem:[%s14847_s24 + $0x90] sm:$0xff] %v11720_v30  ;;  %v11731_v49 = vrot.slane %v11721_v45, %v14701_v19  ;;  %v11738_v33 = vrot.slane %v11722_v31, %v14701_v19 }
 0x6af   : > { %v11753_v53 = vcombine.low %v11731_v49, %v11738_v33  ;;  %v8518_v40 = vpop.f32.mrb[160].mxu0  ;;  %v8559_v61 = vpop.f32.mrb[160].mxu1 }
 0x6b0   : > { %v8519_v57 = vadd.f32 %v8518_v40, %v4630_v47  ;;  %v8560_v63 = vadd.f32 %v8559_v61, %v4638_v32  ;;  %v8520_v59 = vpop.f32.mrb[161].mxu0  ;;  %v8561_v4 = vpop.f32.mrb[161].mxu1  ;;  %v1400_v61 = vld [vmem:[%s14658_s11 + $0xa8] sm:$0xff] }
 0x6b1   : > { %v8521_v5 = vadd.f32 %v8520_v59, %v4634_v51  ;;  %v8562_v7 = vadd.f32 %v8561_v4, %v4642_v37  ;;  %v8522_v9 = vpop.f32.mrb[162].mxu0  ;;  %v8563_v8 = vpop.f32.mrb[162].mxu1  ;;  %v11761_v6 = vrot.slane %v11753_v53, %v14701_v19  ;;  %v4682_v12 = vrot.slane %v1400_v61, %v14664_v60 }
 0x6b2   : > { %v8523_v14 = vpop.f32.mrb[163].mxu0  ;;  %v8564_v17 = vpop.f32.mrb[163].mxu1 }
 0x6b3   : > { %v11723_v54 = vcombine.low %v8519_v57, %v8521_v5  ;;  %v11724_v11 = vcombine.low %v8560_v63, %v8562_v7  ;;  %v4678_v5 = vrot.slane %v1400_v61, %v14653_v55  ;;  %v4686_v7 = vrot.slane %v1400_v61, %v14656_v56 }
 0x6b4   : > { %v4690_v14 = vrot.slane %v1400_v61, %v14667_v62 }
 0x6b5   : > { %v11745_v52 = vrot.slane %v11723_v54, %v14701_v19  ;;  %v11752_v13 = vrot.slane %v11724_v11, %v14701_v19 }
 0x6b7   : > { %v11754_v1 = vcombine.low %v11745_v52, %v11752_v13  ;;  %v8600_v18 = vpop.f32.mrb[164].mxu0  ;;  %v8641_v2 = vpop.f32.mrb[164].mxu1 }
 0x6b8   : > { %v8601_v22 = vadd.f32 %v8600_v18, %v4646_v21  ;;  %v8642_v23 = vadd.f32 %v8641_v2, %v4654_v58  ;;  %v8602_v3 = vpop.f32.mrb[165].mxu0  ;;  %v8643_v24 = vpop.f32.mrb[165].mxu1 }
 0x6b9   : > { %v11768_v26 = vrot.slane %v11754_v1, %v14701_v19  ;;  %v8603_v10 = vadd.f32 %v8602_v3, %v4650_v0  ;;  %v8644_v28 = vadd.f32 %v8643_v24, %v4658_v16  ;;  %v8604_v34 = vpop.f32.mrb[166].mxu0  ;;  %v8645_v36 = vpop.f32.mrb[166].mxu1 }
 0x6ba   : > { %v8605_v38 = vpop.f32.mrb[167].mxu0  ;;  %v8646_v39 = vpop.f32.mrb[167].mxu1 }
 0x6bb   : > { %v11769_v42 = vcombine.low %v11761_v6, %v11768_v26  ;;  %v11770_v44 = vcombine.low %v8601_v22, %v8603_v10  ;;  %v11771_v46 = vcombine.low %v8642_v23, %v8644_v28  ;;  %v4694_v10 = vrot.slane %v1400_v61, %v14695_v15 }
 0x6bc   : > { %v4702_v28 = vrot.slane %v1400_v61, %v14706_v20  ;;  %v4698_v38 = vrot.slane %v1400_v61, %v14718_v29  ;;  %v4706_v39 = vrot.slane %v1400_v61, %v14722_v35 }
 0x6bd   : > { %12409 = vst [vmem:[%s14847_s24 + $0x98] sm:$0xff] %v11769_v42  ;;  %v11780_v48 = vrot.slane %v11770_v44, %v14701_v19  ;;  %v11787_v27 = vrot.slane %v11771_v46, %v14701_v19 }
 0x6bf   : > { %v11802_v30 = vcombine.low %v11780_v48, %v11787_v27  ;;  %v8682_v45 = vpop.f32.mrb[168].mxu0  ;;  %v8723_v31 = vpop.f32.mrb[168].mxu1 }
 0x6c0   : > { %v8683_v47 = vadd.f32 %v8682_v45, %v4662_v25  ;;  %v8724_v32 = vadd.f32 %v8723_v31, %v4670_v41  ;;  %v8684_v49 = vpop.f32.mrb[169].mxu0  ;;  %v8725_v33 = vpop.f32.mrb[169].mxu1  ;;  %v1401_v31 = vld [vmem:[%s14658_s11 + $0xb0] sm:$0xff] }
 0x6c1   : > { %v8685_v51 = vadd.f32 %v8684_v49, %v4666_v43  ;;  %v8726_v37 = vadd.f32 %v8725_v33, %v4674_v50  ;;  %v8686_v53 = vpop.f32.mrb[170].mxu0  ;;  %v8727_v40 = vpop.f32.mrb[170].mxu1  ;;  %v11810_v0 = vrot.slane %v11802_v30, %v14701_v19  ;;  %v4714_v61 = vrot.slane %v1401_v31, %v14664_v60 }
 0x6c2   : > { %v8687_v57 = vpop.f32.mrb[171].mxu0  ;;  %v8728_v63 = vpop.f32.mrb[171].mxu1 }
 0x6c3   : > { %v11772_v59 = vcombine.low %v8683_v47, %v8685_v51  ;;  %v11773_v4 = vcombine.low %v8724_v32, %v8726_v37  ;;  %v4710_v51 = vrot.slane %v1401_v31, %v14653_v55  ;;  %v4718_v37 = vrot.slane %v1401_v31, %v14656_v56 }
 0x6c4   : > { %v4722_v57 = vrot.slane %v1401_v31, %v14667_v62 }
 0x6c5   : > { %v11794_v9 = vrot.slane %v11772_v59, %v14701_v19  ;;  %v11801_v8 = vrot.slane %v11773_v4, %v14701_v19 }
 0x6c7   : > { %v11803_v17 = vcombine.low %v11794_v9, %v11801_v8  ;;  %v8764_v54 = vpop.f32.mrb[172].mxu0  ;;  %v8805_v11 = vpop.f32.mrb[172].mxu1 }
 0x6c8   : > { %v8765_v21 = vadd.f32 %v8764_v54, %v4678_v5  ;;  %v8806_v58 = vadd.f32 %v8805_v11, %v4686_v7  ;;  %v8766_v52 = vpop.f32.mrb[173].mxu0  ;;  %v8807_v13 = vpop.f32.mrb[173].mxu1 }
 0x6c9   : > { %v11817_v16 = vrot.slane %v11803_v17, %v14701_v19  ;;  %v8767_v1 = vadd.f32 %v8766_v52, %v4682_v12  ;;  %v8808_v18 = vadd.f32 %v8807_v13, %v4690_v14  ;;  %v8768_v2 = vpop.f32.mrb[174].mxu0  ;;  %v8809_v22 = vpop.f32.mrb[174].mxu1 }
 0x6ca   : > { %v8769_v23 = vpop.f32.mrb[175].mxu0  ;;  %v8810_v3 = vpop.f32.mrb[175].mxu1 }
 0x6cb   : > { %v11818_v24 = vcombine.low %v11810_v0, %v11817_v16  ;;  %v11819_v6 = vcombine.low %v8765_v21, %v8767_v1  ;;  %v11820_v26 = vcombine.low %v8806_v58, %v8808_v18  ;;  %v4726_v1 = vrot.slane %v1401_v31, %v14695_v15 }
 0x6cc   : > { %v4734_v18 = vrot.slane %v1401_v31, %v14706_v20  ;;  %v4730_v23 = vrot.slane %v1401_v31, %v14718_v29  ;;  %v4738_v3 = vrot.slane %v1401_v31, %v14722_v35 }
 0x6cd   : > { %12410 = vst [vmem:[%s14847_s24 + $0xa0] sm:$0xff] %v11818_v24  ;;  %v11829_v34 = vrot.slane %v11819_v6, %v14701_v19  ;;  %v11836_v36 = vrot.slane %v11820_v26, %v14701_v19 }
 0x6cf   : > { %v11851_v42 = vcombine.low %v11829_v34, %v11836_v36  ;;  %v8846_v44 = vpop.f32.mrb[176].mxu0  ;;  %v8887_v46 = vpop.f32.mrb[176].mxu1 }
 0x6d0   : > { %v8847_v25 = vadd.f32 %v8846_v44, %v4694_v10  ;;  %v8888_v41 = vadd.f32 %v8887_v46, %v4702_v28  ;;  %v8848_v48 = vpop.f32.mrb[177].mxu0  ;;  %v8889_v27 = vpop.f32.mrb[177].mxu1  ;;  %v1402_v46 = vld [vmem:[%s14658_s11 + $0xb8] sm:$0xff] }
 0x6d1   : > { %v8849_v43 = vadd.f32 %v8848_v48, %v4698_v38  ;;  %v8890_v50 = vadd.f32 %v8889_v27, %v4706_v39  ;;  %v8850_v30 = vpop.f32.mrb[178].mxu0  ;;  %v8891_v45 = vpop.f32.mrb[178].mxu1  ;;  %v11859_v12 = vrot.slane %v11851_v42, %v14701_v19  ;;  %v4746_v31 = vrot.slane %v1402_v46, %v14664_v60 }
 0x6d2   : > { %v8851_v47 = vpop.f32.mrb[179].mxu0  ;;  %v8892_v32 = vpop.f32.mrb[179].mxu1 }
 0x6d3   : > { %v11821_v49 = vcombine.low %v8847_v25, %v8849_v43  ;;  %v11822_v33 = vcombine.low %v8888_v41, %v8890_v50  ;;  %v4742_v43 = vrot.slane %v1402_v46, %v14653_v55  ;;  %v4750_v50 = vrot.slane %v1402_v46, %v14656_v56 }
 0x6d4   : > { %v4754_v47 = vrot.slane %v1402_v46, %v14667_v62 }
 0x6d5   : > { %v11843_v53 = vrot.slane %v11821_v49, %v14701_v19  ;;  %v11850_v40 = vrot.slane %v11822_v33, %v14701_v19 }
 0x6d7   : > { %v11852_v63 = vcombine.low %v11843_v53, %v11850_v40  ;;  %v8928_v59 = vpop.f32.mrb[180].mxu0  ;;  %v8969_v4 = vpop.f32.mrb[180].mxu1 }
 0x6d8   : > { %v8929_v5 = vadd.f32 %v8928_v59, %v4710_v51  ;;  %v8970_v7 = vadd.f32 %v8969_v4, %v4718_v37  ;;  %v8930_v9 = vpop.f32.mrb[181].mxu0  ;;  %v8971_v8 = vpop.f32.mrb[181].mxu1 }
 0x6d9   : > { %v11866_v14 = vrot.slane %v11852_v63, %v14701_v19  ;;  %v8931_v17 = vadd.f32 %v8930_v9, %v4714_v61  ;;  %v8972_v54 = vadd.f32 %v8971_v8, %v4722_v57  ;;  %v8932_v11 = vpop.f32.mrb[182].mxu0  ;;  %v8973_v21 = vpop.f32.mrb[182].mxu1 }
 0x6da   : > { %v8933_v58 = vpop.f32.mrb[183].mxu0  ;;  %v8974_v52 = vpop.f32.mrb[183].mxu1 }
 0x6db   : > { %v11867_v13 = vcombine.low %v11859_v12, %v11866_v14  ;;  %v11868_v0 = vcombine.low %v8929_v5, %v8931_v17  ;;  %v11869_v16 = vcombine.low %v8970_v7, %v8972_v54  ;;  %v4758_v17 = vrot.slane %v1402_v46, %v14695_v15 }
 0x6dc   : > { %v4766_v54 = vrot.slane %v1402_v46, %v14706_v20  ;;  %v4762_v58 = vrot.slane %v1402_v46, %v14718_v29  ;;  %v4770_v52 = vrot.slane %v1402_v46, %v14722_v35 }
 0x6dd   : > { %12411 = vst [vmem:[%s14847_s24 + $0xa8] sm:$0xff] %v11867_v13  ;;  %v11878_v2 = vrot.slane %v11868_v0, %v14701_v19  ;;  %v11885_v22 = vrot.slane %v11869_v16, %v14701_v19 }
 0x6df   : > { %v11900_v24 = vcombine.low %v11878_v2, %v11885_v22  ;;  %v9010_v6 = vpop.f32.mrb[184].mxu0  ;;  %v9051_v26 = vpop.f32.mrb[184].mxu1 }
 0x6e0   : > { %v9011_v10 = vadd.f32 %v9010_v6, %v4726_v1  ;;  %v9052_v28 = vadd.f32 %v9051_v26, %v4734_v18  ;;  %v9012_v34 = vpop.f32.mrb[185].mxu0  ;;  %v9053_v36 = vpop.f32.mrb[185].mxu1  ;;  %v1403_v26 = vld [vmem:[%s14658_s11 + $0xc0] sm:$0xff] }
 0x6e1   : > { %v9013_v38 = vadd.f32 %v9012_v34, %v4730_v23  ;;  %v9054_v39 = vadd.f32 %v9053_v36, %v4738_v3  ;;  %v9014_v42 = vpop.f32.mrb[186].mxu0  ;;  %v9055_v44 = vpop.f32.mrb[186].mxu1  ;;  %v11908_v61 = vrot.slane %v11900_v24, %v14701_v19  ;;  %v4778_v46 = vrot.slane %v1403_v26, %v14664_v60 }
 0x6e2   : > { %v9015_v25 = vpop.f32.mrb[187].mxu0  ;;  %v9056_v41 = vpop.f32.mrb[187].mxu1 }
 0x6e3   : > { %v11870_v48 = vcombine.low %v9011_v10, %v9013_v38  ;;  %v11871_v27 = vcombine.low %v9052_v28, %v9054_v39  ;;  %v4774_v38 = vrot.slane %v1403_v26, %v14653_v55  ;;  %v4782_v39 = vrot.slane %v1403_v26, %v14656_v56 }
 0x6e4   : > { %v4786_v25 = vrot.slane %v1403_v26, %v14667_v62 }
 0x6e5   : > { %v11892_v30 = vrot.slane %v11870_v48, %v14701_v19  ;;  %v11899_v45 = vrot.slane %v11871_v27, %v14701_v19 }
 0x6e7   : > { %v11901_v32 = vcombine.low %v11892_v30, %v11899_v45  ;;  %v9092_v49 = vpop.f32.mrb[188].mxu0  ;;  %v9133_v33 = vpop.f32.mrb[188].mxu1 }
 0x6e8   : > { %v9093_v51 = vadd.f32 %v9092_v49, %v4742_v43  ;;  %v9134_v37 = vadd.f32 %v9133_v33, %v4750_v50  ;;  %v9094_v53 = vpop.f32.mrb[189].mxu0  ;;  %v9135_v40 = vpop.f32.mrb[189].mxu1 }
 0x6e9   : > { %v11915_v57 = vrot.slane %v11901_v32, %v14701_v19  ;;  %v9095_v63 = vadd.f32 %v9094_v53, %v4746_v31  ;;  %v9136_v59 = vadd.f32 %v9135_v40, %v4754_v47  ;;  %v9096_v4 = vpop.f32.mrb[190].mxu0  ;;  %v9137_v5 = vpop.f32.mrb[190].mxu1 }
 0x6ea   : > { %v9097_v7 = vpop.f32.mrb[191].mxu0  ;;  %v9138_v9 = vpop.f32.mrb[191].mxu1 }
 0x6eb   : > { %v11916_v8 = vcombine.low %v11908_v61, %v11915_v57  ;;  %v11917_v12 = vcombine.low %v9093_v51, %v9095_v63  ;;  %v11918_v14 = vcombine.low %v9134_v37, %v9136_v59  ;;  %v4790_v63 = vrot.slane %v1403_v26, %v14695_v15 }
 0x6ec   : > { %v4798_v59 = vrot.slane %v1403_v26, %v14706_v20  ;;  %v4794_v7 = vrot.slane %v1403_v26, %v14718_v29  ;;  %v4802_v9 = vrot.slane %v1403_v26, %v14722_v35 }
 0x6ed   : > { %12412 = vst [vmem:[%s14847_s24 + $0xb0] sm:$0xff] %v11916_v8  ;;  %v11927_v11 = vrot.slane %v11917_v12, %v14701_v19  ;;  %v11934_v21 = vrot.slane %v11918_v14, %v14701_v19 }
 0x6ef   : > { %v11949_v13 = vcombine.low %v11927_v11, %v11934_v21  ;;  %v9174_v0 = vpop.f32.mrb[192].mxu0  ;;  %v9215_v16 = vpop.f32.mrb[192].mxu1 }
 0x6f0   : > { %v9175_v1 = vadd.f32 %v9174_v0, %v4758_v17  ;;  %v9216_v18 = vadd.f32 %v9215_v16, %v4766_v54  ;;  %v9176_v2 = vpop.f32.mrb[193].mxu0  ;;  %v9217_v22 = vpop.f32.mrb[193].mxu1  ;;  %v1404_v16 = vld [vmem:[%s14658_s11 + $0xc8] sm:$0xff] }
 0x6f1   : > { %v9177_v23 = vadd.f32 %v9176_v2, %v4762_v58  ;;  %v9218_v3 = vadd.f32 %v9217_v22, %v4770_v52  ;;  %v9178_v24 = vpop.f32.mrb[194].mxu0  ;;  %v9219_v6 = vpop.f32.mrb[194].mxu1  ;;  %v11957_v31 = vrot.slane %v11949_v13, %v14701_v19  ;;  %v4810_v26 = vrot.slane %v1404_v16, %v14664_v60 }
 0x6f2   : > { %v9179_v10 = vpop.f32.mrb[195].mxu0  ;;  %v9220_v28 = vpop.f32.mrb[195].mxu1 }
 0x6f3   : > { %v11919_v34 = vcombine.low %v9175_v1, %v9177_v23  ;;  %v11920_v36 = vcombine.low %v9216_v18, %v9218_v3  ;;  %v4806_v23 = vrot.slane %v1404_v16, %v14653_v55  ;;  %v4814_v3 = vrot.slane %v1404_v16, %v14656_v56 }
 0x6f4   : > { %v4818_v10 = vrot.slane %v1404_v16, %v14667_v62 }
 0x6f5   : > { %v11941_v42 = vrot.slane %v11919_v34, %v14701_v19  ;;  %v11948_v44 = vrot.slane %v11920_v36, %v14701_v19 }
 0x6f7   : > { %v11950_v41 = vcombine.low %v11941_v42, %v11948_v44  ;;  %v9256_v48 = vpop.f32.mrb[196].mxu0  ;;  %v9297_v27 = vpop.f32.mrb[196].mxu1 }
 0x6f8   : > { %v9257_v43 = vadd.f32 %v9256_v48, %v4774_v38  ;;  %v9298_v50 = vadd.f32 %v9297_v27, %v4782_v39  ;;  %v9258_v30 = vpop.f32.mrb[197].mxu0  ;;  %v9299_v45 = vpop.f32.mrb[197].mxu1 }
 0x6f9   : > { %v11964_v47 = vrot.slane %v11950_v41, %v14701_v19  ;;  %v9259_v32 = vadd.f32 %v9258_v30, %v4778_v46  ;;  %v9300_v49 = vadd.f32 %v9299_v45, %v4786_v25  ;;  %v9260_v33 = vpop.f32.mrb[198].mxu0  ;;  %v9301_v51 = vpop.f32.mrb[198].mxu1 }
 0x6fa   : > { %v9261_v37 = vpop.f32.mrb[199].mxu0  ;;  %v9302_v53 = vpop.f32.mrb[199].mxu1 }
 0x6fb   : > { %v11965_v40 = vcombine.low %v11957_v31, %v11964_v47  ;;  %v11966_v61 = vcombine.low %v9257_v43, %v9259_v32  ;;  %v11967_v57 = vcombine.low %v9298_v50, %v9300_v49  ;;  %v4822_v32 = vrot.slane %v1404_v16, %v14695_v15 }
 0x6fc   : > { %v4830_v49 = vrot.slane %v1404_v16, %v14706_v20  ;;  %v4826_v37 = vrot.slane %v1404_v16, %v14718_v29  ;;  %v4834_v53 = vrot.slane %v1404_v16, %v14722_v35 }
 0x6fd   : > { %12413 = vst [vmem:[%s14847_s24 + $0xb8] sm:$0xff] %v11965_v40  ;;  %v11976_v4 = vrot.slane %v11966_v61, %v14701_v19  ;;  %v11983_v5 = vrot.slane %v11967_v57, %v14701_v19 }
 0x6ff   : > { %v11998_v8 = vcombine.low %v11976_v4, %v11983_v5  ;;  %v9338_v12 = vpop.f32.mrb[200].mxu0  ;;  %v9379_v14 = vpop.f32.mrb[200].mxu1 }
 0x700   : > { %v9339_v17 = vadd.f32 %v9338_v12, %v4790_v63  ;;  %v9380_v54 = vadd.f32 %v9379_v14, %v4798_v59  ;;  %v9340_v11 = vpop.f32.mrb[201].mxu0  ;;  %v9381_v21 = vpop.f32.mrb[201].mxu1  ;;  %v1405_v14 = vld [vmem:[%s14658_s11 + $0xd0] sm:$0xff] }
 0x701   : > { %v9341_v58 = vadd.f32 %v9340_v11, %v4794_v7  ;;  %v9382_v52 = vadd.f32 %v9381_v21, %v4802_v9  ;;  %v9342_v13 = vpop.f32.mrb[202].mxu0  ;;  %v9383_v0 = vpop.f32.mrb[202].mxu1  ;;  %v12006_v46 = vrot.slane %v11998_v8, %v14701_v19  ;;  %v4842_v16 = vrot.slane %v1405_v14, %v14664_v60 }
 0x702   : > { %v9343_v1 = vpop.f32.mrb[203].mxu0  ;;  %v9384_v18 = vpop.f32.mrb[203].mxu1 }
 0x703   : > { %v11968_v2 = vcombine.low %v9339_v17, %v9341_v58  ;;  %v11969_v22 = vcombine.low %v9380_v54, %v9382_v52  ;;  %v4838_v58 = vrot.slane %v1405_v14, %v14653_v55  ;;  %v4846_v52 = vrot.slane %v1405_v14, %v14656_v56 }
 0x704   : > { %v4850_v1 = vrot.slane %v1405_v14, %v14667_v62 }
 0x705   : > { %v11990_v24 = vrot.slane %v11968_v2, %v14701_v19  ;;  %v11997_v6 = vrot.slane %v11969_v22, %v14701_v19 }
 0x707   : > { %v11999_v28 = vcombine.low %v11990_v24, %v11997_v6  ;;  %v9420_v34 = vpop.f32.mrb[204].mxu0  ;;  %v9461_v36 = vpop.f32.mrb[204].mxu1 }
 0x708   : > { %v9421_v38 = vadd.f32 %v9420_v34, %v4806_v23  ;;  %v9462_v39 = vadd.f32 %v9461_v36, %v4814_v3  ;;  %v9422_v42 = vpop.f32.mrb[205].mxu0  ;;  %v9463_v44 = vpop.f32.mrb[205].mxu1 }
 0x709   : > { %v12013_v25 = vrot.slane %v11999_v28, %v14701_v19  ;;  %v9423_v41 = vadd.f32 %v9422_v42, %v4810_v26  ;;  %v9464_v48 = vadd.f32 %v9463_v44, %v4818_v10  ;;  %v9424_v27 = vpop.f32.mrb[206].mxu0  ;;  %v9465_v43 = vpop.f32.mrb[206].mxu1 }
 0x70a   : > { %v9425_v50 = vpop.f32.mrb[207].mxu0  ;;  %v9466_v30 = vpop.f32.mrb[207].mxu1 }
 0x70b   : > { %v12014_v45 = vcombine.low %v12006_v46, %v12013_v25  ;;  %v12015_v31 = vcombine.low %v9421_v38, %v9423_v41  ;;  %v12016_v47 = vcombine.low %v9462_v39, %v9464_v48  ;;  %v4854_v41 = vrot.slane %v1405_v14, %v14695_v15 }
 0x70c   : > { %v4862_v48 = vrot.slane %v1405_v14, %v14706_v20  ;;  %v4858_v50 = vrot.slane %v1405_v14, %v14718_v29  ;;  %v4866_v30 = vrot.slane %v1405_v14, %v14722_v35 }
 0x70d   : > { %12414 = vst [vmem:[%s14847_s24 + $0xc0] sm:$0xff] %v12014_v45  ;;  %v12025_v33 = vrot.slane %v12015_v31, %v14701_v19  ;;  %v12032_v51 = vrot.slane %v12016_v47, %v14701_v19 }
 0x70f   : > { %v12047_v40 = vcombine.low %v12025_v33, %v12032_v51  ;;  %v9502_v61 = vpop.f32.mrb[208].mxu0  ;;  %v9543_v57 = vpop.f32.mrb[208].mxu1 }
 0x710   : > { %v9503_v63 = vadd.f32 %v9502_v61, %v4822_v32  ;;  %v9544_v59 = vadd.f32 %v9543_v57, %v4830_v49  ;;  %v9504_v4 = vpop.f32.mrb[209].mxu0  ;;  %v9545_v5 = vpop.f32.mrb[209].mxu1  ;;  %v1406_v57 = vld [vmem:[%s14658_s11 + $0xd8] sm:$0xff] }
 0x711   : > { %v9505_v7 = vadd.f32 %v9504_v4, %v4826_v37  ;;  %v9546_v9 = vadd.f32 %v9545_v5, %v4834_v53  ;;  %v9506_v8 = vpop.f32.mrb[210].mxu0  ;;  %v9547_v12 = vpop.f32.mrb[210].mxu1  ;;  %v12055_v26 = vrot.slane %v12047_v40, %v14701_v19  ;;  %v4874_v14 = vrot.slane %v1406_v57, %v14664_v60 }
 0x712   : > { %v9507_v17 = vpop.f32.mrb[211].mxu0  ;;  %v9548_v54 = vpop.f32.mrb[211].mxu1 }
 0x713   : > { %v12017_v11 = vcombine.low %v9503_v63, %v9505_v7  ;;  %v12018_v21 = vcombine.low %v9544_v59, %v9546_v9  ;;  %v4870_v7 = vrot.slane %v1406_v57, %v14653_v55  ;;  %v4878_v9 = vrot.slane %v1406_v57, %v14656_v56 }
 0x714   : > { %v4882_v17 = vrot.slane %v1406_v57, %v14667_v62 }
 0x715   : > { %v12039_v13 = vrot.slane %v12017_v11, %v14701_v19  ;;  %v12046_v0 = vrot.slane %v12018_v21, %v14701_v19 }
 0x717   : > { %v12048_v18 = vcombine.low %v12039_v13, %v12046_v0  ;;  %v9584_v2 = vpop.f32.mrb[212].mxu0  ;;  %v9625_v22 = vpop.f32.mrb[212].mxu1 }
 0x718   : > { %v9585_v23 = vadd.f32 %v9584_v2, %v4838_v58  ;;  %v9626_v3 = vadd.f32 %v9625_v22, %v4846_v52  ;;  %v9586_v24 = vpop.f32.mrb[213].mxu0  ;;  %v9627_v6 = vpop.f32.mrb[213].mxu1 }
 0x719   : > { %v12062_v10 = vrot.slane %v12048_v18, %v14701_v19  ;;  %v9587_v28 = vadd.f32 %v9586_v24, %v4842_v16  ;;  %v9628_v34 = vadd.f32 %v9627_v6, %v4850_v1  ;;  %v9588_v36 = vpop.f32.mrb[214].mxu0  ;;  %v9629_v38 = vpop.f32.mrb[214].mxu1 }
 0x71a   : > { %v9589_v39 = vpop.f32.mrb[215].mxu0  ;;  %v9630_v42 = vpop.f32.mrb[215].mxu1 }
 0x71b   : > { %v12063_v44 = vcombine.low %v12055_v26, %v12062_v10  ;;  %v12064_v46 = vcombine.low %v9585_v23, %v9587_v28  ;;  %v12065_v25 = vcombine.low %v9626_v3, %v9628_v34  ;;  %v4886_v28 = vrot.slane %v1406_v57, %v14695_v15 }
 0x71c   : > { %v4894_v34 = vrot.slane %v1406_v57, %v14706_v20  ;;  %v4890_v39 = vrot.slane %v1406_v57, %v14718_v29  ;;  %v4898_v42 = vrot.slane %v1406_v57, %v14722_v35 }
 0x71d   : > { %12415 = vst [vmem:[%s14847_s24 + $0xc8] sm:$0xff] %v12063_v44  ;;  %v12074_v27 = vrot.slane %v12064_v46, %v14701_v19  ;;  %v12081_v43 = vrot.slane %v12065_v25, %v14701_v19 }
 0x71f   : > { %v12096_v45 = vcombine.low %v12074_v27, %v12081_v43  ;;  %v9666_v31 = vpop.f32.mrb[216].mxu0  ;;  %v9707_v47 = vpop.f32.mrb[216].mxu1 }
 0x720   : > { %v9667_v32 = vadd.f32 %v9666_v31, %v4854_v41  ;;  %v9708_v49 = vadd.f32 %v9707_v47, %v4862_v48  ;;  %v9668_v33 = vpop.f32.mrb[217].mxu0  ;;  %v9709_v51 = vpop.f32.mrb[217].mxu1  ;;  %v1407_v47 = vld [vmem:[%s14658_s11 + $0xe0] sm:$0xff] }
 0x721   : > { %v9669_v37 = vadd.f32 %v9668_v33, %v4858_v50  ;;  %v9710_v53 = vadd.f32 %v9709_v51, %v4866_v30  ;;  %v9670_v40 = vpop.f32.mrb[218].mxu0  ;;  %v9711_v61 = vpop.f32.mrb[218].mxu1  ;;  %v12104_v16 = vrot.slane %v12096_v45, %v14701_v19  ;;  %v4906_v57 = vrot.slane %v1407_v47, %v14664_v60 }
 0x722   : > { %v9671_v63 = vpop.f32.mrb[219].mxu0  ;;  %v9712_v59 = vpop.f32.mrb[219].mxu1 }
 0x723   : > { %v12066_v4 = vcombine.low %v9667_v32, %v9669_v37  ;;  %v12067_v5 = vcombine.low %v9708_v49, %v9710_v53  ;;  %v4902_v37 = vrot.slane %v1407_v47, %v14653_v55  ;;  %v4910_v53 = vrot.slane %v1407_v47, %v14656_v56 }
 0x724   : > { %v4914_v63 = vrot.slane %v1407_v47, %v14667_v62 }
 0x725   : > { %v12088_v8 = vrot.slane %v12066_v4, %v14701_v19  ;;  %v12095_v12 = vrot.slane %v12067_v5, %v14701_v19 }
 0x727   : > { %v12097_v54 = vcombine.low %v12088_v8, %v12095_v12  ;;  %v9748_v11 = vpop.f32.mrb[220].mxu0  ;;  %v9789_v21 = vpop.f32.mrb[220].mxu1 }
 0x728   : > { %v9749_v58 = vadd.f32 %v9748_v11, %v4870_v7  ;;  %v9790_v52 = vadd.f32 %v9789_v21, %v4878_v9  ;;  %v9750_v13 = vpop.f32.mrb[221].mxu0  ;;  %v9791_v0 = vpop.f32.mrb[221].mxu1 }
 0x729   : > { %v12111_v1 = vrot.slane %v12097_v54, %v14701_v19  ;;  %v9751_v18 = vadd.f32 %v9750_v13, %v4874_v14  ;;  %v9792_v2 = vadd.f32 %v9791_v0, %v4882_v17  ;;  %v9752_v22 = vpop.f32.mrb[222].mxu0  ;;  %v9793_v23 = vpop.f32.mrb[222].mxu1 }
 0x72a   : > { %v9753_v3 = vpop.f32.mrb[223].mxu0  ;;  %v9794_v24 = vpop.f32.mrb[223].mxu1 }
 0x72b   : > { %v12112_v6 = vcombine.low %v12104_v16, %v12111_v1  ;;  %v12113_v26 = vcombine.low %v9749_v58, %v9751_v18  ;;  %v12114_v10 = vcombine.low %v9790_v52, %v9792_v2  ;;  %v4918_v18 = vrot.slane %v1407_v47, %v14695_v15 }
 0x72c   : > { %v4926_v2 = vrot.slane %v1407_v47, %v14706_v20  ;;  %v4922_v3 = vrot.slane %v1407_v47, %v14718_v29  ;;  %v4930_v24 = vrot.slane %v1407_v47, %v14722_v35 }
 0x72d   : > { %12416 = vst [vmem:[%s14847_s24 + $0xd0] sm:$0xff] %v12112_v6  ;;  %v12123_v36 = vrot.slane %v12113_v26, %v14701_v19  ;;  %v12130_v38 = vrot.slane %v12114_v10, %v14701_v19 }
 0x72f   : > { %v12145_v44 = vcombine.low %v12123_v36, %v12130_v38  ;;  %v9830_v46 = vpop.f32.mrb[224].mxu0  ;;  %v9871_v25 = vpop.f32.mrb[224].mxu1 }
 0x730   : > { %v9831_v41 = vadd.f32 %v9830_v46, %v4886_v28  ;;  %v9872_v48 = vadd.f32 %v9871_v25, %v4894_v34  ;;  %v9832_v27 = vpop.f32.mrb[225].mxu0  ;;  %v9873_v43 = vpop.f32.mrb[225].mxu1  ;;  %v1408_v25 = vld [vmem:[%s14658_s11 + $0xe8] sm:$0xff] }
 0x731   : > { %v9833_v50 = vadd.f32 %v9832_v27, %v4890_v39  ;;  %v9874_v30 = vadd.f32 %v9873_v43, %v4898_v42  ;;  %v9834_v45 = vpop.f32.mrb[226].mxu0  ;;  %v9875_v31 = vpop.f32.mrb[226].mxu1  ;;  %v12153_v14 = vrot.slane %v12145_v44, %v14701_v19  ;;  %v4938_v47 = vrot.slane %v1408_v25, %v14664_v60 }
 0x732   : > { %v9835_v32 = vpop.f32.mrb[227].mxu0  ;;  %v9876_v49 = vpop.f32.mrb[227].mxu1 }
 0x733   : > { %v12115_v33 = vcombine.low %v9831_v41, %v9833_v50  ;;  %v12116_v51 = vcombine.low %v9872_v48, %v9874_v30  ;;  %v4934_v50 = vrot.slane %v1408_v25, %v14653_v55  ;;  %v4942_v30 = vrot.slane %v1408_v25, %v14656_v56 }
 0x734   : > { %v4946_v32 = vrot.slane %v1408_v25, %v14667_v62 }
 0x735   : > { %v12137_v40 = vrot.slane %v12115_v33, %v14701_v19  ;;  %v12144_v61 = vrot.slane %v12116_v51, %v14701_v19 }
 0x737   : > { %v12146_v59 = vcombine.low %v12137_v40, %v12144_v61  ;;  %v9912_v4 = vpop.f32.mrb[228].mxu0  ;;  %v9953_v5 = vpop.f32.mrb[228].mxu1 }
 0x738   : > { %v9913_v7 = vadd.f32 %v9912_v4, %v4902_v37  ;;  %v9954_v9 = vadd.f32 %v9953_v5, %v4910_v53  ;;  %v9914_v8 = vpop.f32.mrb[229].mxu0  ;;  %v9955_v12 = vpop.f32.mrb[229].mxu1 }
 0x739   : > { %v12160_v17 = vrot.slane %v12146_v59, %v14701_v19  ;;  %v9915_v54 = vadd.f32 %v9914_v8, %v4906_v57  ;;  %v9956_v11 = vadd.f32 %v9955_v12, %v4914_v63  ;;  %v9916_v21 = vpop.f32.mrb[230].mxu0  ;;  %v9957_v58 = vpop.f32.mrb[230].mxu1 }
 0x73a   : > { %v9917_v52 = vpop.f32.mrb[231].mxu0  ;;  %v9958_v13 = vpop.f32.mrb[231].mxu1 }
 0x73b   : > { %v12161_v0 = vcombine.low %v12153_v14, %v12160_v17  ;;  %v12162_v16 = vcombine.low %v9913_v7, %v9915_v54  ;;  %v12163_v1 = vcombine.low %v9954_v9, %v9956_v11  ;;  %v4950_v54 = vrot.slane %v1408_v25, %v14695_v15 }
 0x73c   : > { %v4958_v11 = vrot.slane %v1408_v25, %v14706_v20  ;;  %v4954_v52 = vrot.slane %v1408_v25, %v14718_v29  ;;  %v4962_v13 = vrot.slane %v1408_v25, %v14722_v35 }
 0x73d   : > { %12417 = vst [vmem:[%s14847_s24 + $0xd8] sm:$0xff] %v12161_v0  ;;  %v12172_v22 = vrot.slane %v12162_v16, %v14701_v19  ;;  %v12179_v23 = vrot.slane %v12163_v1, %v14701_v19 }
 0x73f   : > { %v12194_v6 = vcombine.low %v12172_v22, %v12179_v23  ;;  %v9994_v26 = vpop.f32.mrb[232].mxu0  ;;  %v10035_v10 = vpop.f32.mrb[232].mxu1 }
 0x740   : > { %v9995_v28 = vadd.f32 %v9994_v26, %v4918_v18  ;;  %v10036_v34 = vadd.f32 %v10035_v10, %v4926_v2  ;;  %v9996_v36 = vpop.f32.mrb[233].mxu0  ;;  %v10037_v38 = vpop.f32.mrb[233].mxu1  ;;  %v1409_v10 = vld [vmem:[%s14658_s11 + $0xf0] sm:$0xff] }
 0x741   : > { %v9997_v39 = vadd.f32 %v9996_v36, %v4922_v3  ;;  %v10038_v42 = vadd.f32 %v10037_v38, %v4930_v24  ;;  %v9998_v44 = vpop.f32.mrb[234].mxu0  ;;  %v10039_v46 = vpop.f32.mrb[234].mxu1  ;;  %v12202_v57 = vrot.slane %v12194_v6, %v14701_v19  ;;  %v4970_v25 = vrot.slane %v1409_v10, %v14664_v60 }
 0x742   : > { %v9999_v41 = vpop.f32.mrb[235].mxu0  ;;  %v10040_v48 = vpop.f32.mrb[235].mxu1 }
 0x743   : > { %v12164_v27 = vcombine.low %v9995_v28, %v9997_v39  ;;  %v12165_v43 = vcombine.low %v10036_v34, %v10038_v42  ;;  %v4966_v39 = vrot.slane %v1409_v10, %v14653_v55  ;;  %v4974_v42 = vrot.slane %v1409_v10, %v14656_v56 }
 0x744   : > { %v4978_v41 = vrot.slane %v1409_v10, %v14667_v62 }
 0x745   : > { %v12186_v45 = vrot.slane %v12164_v27, %v14701_v19  ;;  %v12193_v31 = vrot.slane %v12165_v43, %v14701_v19 }
 0x747   : > { %v12195_v49 = vcombine.low %v12186_v45, %v12193_v31  ;;  %v10076_v33 = vpop.f32.mrb[236].mxu0  ;;  %v10117_v51 = vpop.f32.mrb[236].mxu1 }
 0x748   : > { %v10077_v37 = vadd.f32 %v10076_v33, %v4934_v50  ;;  %v10118_v53 = vadd.f32 %v10117_v51, %v4942_v30  ;;  %v10078_v40 = vpop.f32.mrb[237].mxu0  ;;  %v10119_v61 = vpop.f32.mrb[237].mxu1 }
 0x749   : > { %v12209_v63 = vrot.slane %v12195_v49, %v14701_v19  ;;  %v10079_v59 = vadd.f32 %v10078_v40, %v4938_v47  ;;  %v10120_v4 = vadd.f32 %v10119_v61, %v4946_v32  ;;  %v10080_v5 = vpop.f32.mrb[238].mxu0  ;;  %v10121_v7 = vpop.f32.mrb[238].mxu1 }
 0x74a   : > { %v10081_v9 = vpop.f32.mrb[239].mxu0  ;;  %v10122_v8 = vpop.f32.mrb[239].mxu1 }
 0x74b   : > { %v12210_v12 = vcombine.low %v12202_v57, %v12209_v63  ;;  %v12211_v14 = vcombine.low %v10077_v37, %v10079_v59  ;;  %v12212_v17 = vcombine.low %v10118_v53, %v10120_v4  ;;  %v4982_v59 = vrot.slane %v1409_v10, %v14695_v15 }
 0x74c   : > { %v4990_v4 = vrot.slane %v1409_v10, %v14706_v20  ;;  %v4986_v9 = vrot.slane %v1409_v10, %v14718_v29  ;;  %v4994_v8 = vrot.slane %v1409_v10, %v14722_v35 }
 0x74d   : > { %12418 = vst [vmem:[%s14847_s24 + $0xe0] sm:$0xff] %v12210_v12  ;;  %v12221_v21 = vrot.slane %v12211_v14, %v14701_v19  ;;  %v12228_v58 = vrot.slane %v12212_v17, %v14701_v19 }
 0x74f   : > { %v12243_v0 = vcombine.low %v12221_v21, %v12228_v58  ;;  %v10158_v16 = vpop.f32.mrb[240].mxu0  ;;  %v10199_v1 = vpop.f32.mrb[240].mxu1 }
 0x750   : > { %v10159_v18 = vadd.f32 %v10158_v16, %v4950_v54  ;;  %v10200_v2 = vadd.f32 %v10199_v1, %v4958_v11  ;;  %v10160_v22 = vpop.f32.mrb[241].mxu0  ;;  %v10201_v23 = vpop.f32.mrb[241].mxu1  ;;  %v1410_v1 = vld [vmem:[%s14658_s11 + $0xf8] sm:$0xff] }
 0x751   : > { %v10161_v3 = vadd.f32 %v10160_v22, %v4954_v52  ;;  %v10202_v24 = vadd.f32 %v10201_v23, %v4962_v13  ;;  %v10162_v6 = vpop.f32.mrb[242].mxu0  ;;  %v10203_v26 = vpop.f32.mrb[242].mxu1  ;;  %v12251_v47 = vrot.slane %v12243_v0, %v14701_v19  ;;  %v5002_v10 = vrot.slane %v1410_v1, %v14664_v60 }
 0x752   : > { %v10163_v28 = vpop.f32.mrb[243].mxu0  ;;  %v10204_v34 = vpop.f32.mrb[243].mxu1 }
 0x753   : > { %v12213_v36 = vcombine.low %v10159_v18, %v10161_v3  ;;  %v12214_v38 = vcombine.low %v10200_v2, %v10202_v24  ;;  %v4998_v3 = vrot.slane %v1410_v1, %v14653_v55  ;;  %v5006_v24 = vrot.slane %v1410_v1, %v14656_v56 }
 0x754   : > { %v5010_v28 = vrot.slane %v1410_v1, %v14667_v62 }
 0x755   : > { %v12235_v44 = vrot.slane %v12213_v36, %v14701_v19  ;;  %v12242_v46 = vrot.slane %v12214_v38, %v14701_v19 }
 0x757   : > { %v12244_v48 = vcombine.low %v12235_v44, %v12242_v46  ;;  %v10240_v27 = vpop.f32.mrb[244].mxu0  ;;  %v10281_v43 = vpop.f32.mrb[244].mxu1 }
 0x758   : > { %v10241_v50 = vadd.f32 %v10240_v27, %v4966_v39  ;;  %v10282_v30 = vadd.f32 %v10281_v43, %v4974_v42  ;;  %v10242_v45 = vpop.f32.mrb[245].mxu0  ;;  %v10283_v31 = vpop.f32.mrb[245].mxu1 }
 0x759   : > { %v12258_v32 = vrot.slane %v12244_v48, %v14701_v19  ;;  %v10243_v49 = vadd.f32 %v10242_v45, %v4970_v25  ;;  %v10284_v33 = vadd.f32 %v10283_v31, %v4978_v41  ;;  %v10244_v51 = vpop.f32.mrb[246].mxu0  ;;  %v10285_v37 = vpop.f32.mrb[246].mxu1  ;;  %v5014_v45 = vrot.slane %v1410_v1, %v14695_v15 }
 0x75a   : > { %v10245_v53 = vpop.f32.mrb[247].mxu0  ;;  %v10286_v40 = vpop.f32.mrb[247].mxu1  ;;  %v5022_v31 = vrot.slane %v1410_v1, %v14706_v20 }
 0x75b   : > { %v12259_v61 = vcombine.low %v12251_v47, %v12258_v32  ;;  %v12260_v57 = vcombine.low %v10241_v50, %v10243_v49  ;;  %v12261_v63 = vcombine.low %v10282_v30, %v10284_v33  ;;  %v5018_v49 = vrot.slane %v1410_v1, %v14718_v29 }
 0x75c   : > { %v5026_v33 = vrot.slane %v1410_v1, %v14722_v35 }
 0x75d   : > { %12419 = vst [vmem:[%s14847_s24 + $0xe8] sm:$0xff] %v12259_v61  ;;  %v12270_v5 = vrot.slane %v12260_v57, %v14701_v19  ;;  %v12277_v7 = vrot.slane %v12261_v63, %v14701_v19 }
 0x75f   : > { %v12292_v12 = vcombine.low %v12270_v5, %v12277_v7  ;;  %v10322_v14 = vpop.f32.mrb[248].mxu0  ;;  %v10363_v17 = vpop.f32.mrb[248].mxu1 }
 0x760   : > { %v10323_v54 = vadd.f32 %v10322_v14, %v4982_v59  ;;  %v10364_v11 = vadd.f32 %v10363_v17, %v4990_v4  ;;  %v10324_v21 = vpop.f32.mrb[249].mxu0  ;;  %v10365_v58 = vpop.f32.mrb[249].mxu1 }
 0x761   : > { %v10325_v52 = vadd.f32 %v10324_v21, %v4986_v9  ;;  %v10366_v13 = vadd.f32 %v10365_v58, %v4994_v8  ;;  %v10326_v0 = vpop.f32.mrb[250].mxu0  ;;  %v10367_v16 = vpop.f32.mrb[250].mxu1  ;;  %v12300_v55 = vrot.slane %v12292_v12, %v14701_v19 }
 0x762   : > { %v10327_v18 = vpop.f32.mrb[251].mxu0  ;;  %v10368_v2 = vpop.f32.mrb[251].mxu1 }
 0x763   : > { %v12262_v22 = vcombine.low %v10323_v54, %v10325_v52  ;;  %v12263_v23 = vcombine.low %v10364_v11, %v10366_v13 }
 0x765   : > { %v12284_v6 = vrot.slane %v12262_v22, %v14701_v19  ;;  %v12291_v26 = vrot.slane %v12263_v23, %v14701_v19 }
 0x767   : > { %v12293_v34 = vcombine.low %v12284_v6, %v12291_v26  ;;  %v10404_v36 = vpop.f32.mrb[252].mxu0  ;;  %v10445_v38 = vpop.f32.mrb[252].mxu1 }
 0x768   : > { %v10405_v39 = vadd.f32 %v10404_v36, %v4998_v3  ;;  %v10446_v42 = vadd.f32 %v10445_v38, %v5006_v24  ;;  %v10406_v44 = vpop.f32.mrb[253].mxu0  ;;  %v10447_v46 = vpop.f32.mrb[253].mxu1 }
 0x769   : > { %v12307_v56 = vrot.slane %v12293_v34, %v14701_v19  ;;  %v10407_v25 = vadd.f32 %v10406_v44, %v5002_v10  ;;  %v10448_v41 = vadd.f32 %v10447_v46, %v5010_v28  ;;  %v10408_v48 = vpop.f32.mrb[254].mxu0  ;;  %v10449_v27 = vpop.f32.mrb[254].mxu1 }
 0x76a   : > { %v10409_v43 = vpop.f32.mrb[255].mxu0  ;;  %v10450_v60 = vpop.f32.mrb[255].mxu1 }
 0x76b   : > { %v12308_v50 = vcombine.low %v12300_v55, %v12307_v56  ;;  %v12309_v62 = vcombine.low %v10405_v39, %v10407_v25  ;;  %v12310_v30 = vcombine.low %v10446_v42, %v10448_v41 }
 0x76d   : > { %12420 = vst [vmem:[%s14847_s24 + $0xf0] sm:$0xff] %v12308_v50  ;;  %v12319_v47 = vrot.slane %v12309_v62, %v14701_v19  ;;  %v12326_v32 = vrot.slane %v12310_v30, %v14701_v19 }
 0x76f   : > { %v12341_v51 = vcombine.low %v12319_v47, %v12326_v32  ;;  %v10486_v37 = vpop.f32.mrb[0].mxu0  ;;  %v10527_v53 = vpop.f32.mrb[0].mxu1 }
 0x770   : > { %v10487_v40 = vadd.f32 %v10486_v37, %v5014_v45  ;;  %v10528_v61 = vadd.f32 %v10527_v53, %v5022_v31  ;;  %v10488_v57 = vpop.f32.mrb[1].mxu0  ;;  %v10529_v63 = vpop.f32.mrb[1].mxu1 }
 0x771   : > { %v10489_v15 = vadd.f32 %v10488_v57, %v5018_v49  ;;  %v10530_v59 = vadd.f32 %v10529_v63, %v5026_v33  ;;  %v10490_v20 = vpop.f32.mrb[2].mxu0  ;;  %v10531_v4 = vpop.f32.mrb[2].mxu1  ;;  %v12349_v14 = vrot.slane %v12341_v51, %v14701_v19 }
 0x772   : > { %v10491_v5 = vpop.f32.mrb[3].mxu0  ;;  %v10532_v7 = vpop.f32.mrb[3].mxu1 }
 0x773   : > { %v12311_v9 = vcombine.low %v10487_v40, %v10489_v15  ;;  %v12312_v8 = vcombine.low %v10528_v61, %v10530_v59 }
 0x775   : > { %v12333_v29 = vrot.slane %v12311_v9, %v14701_v19  ;;  %v12340_v35 = vrot.slane %v12312_v8, %v14701_v19 }
 0x777   : > { %v12342_v12 = vcombine.low %v12333_v29, %v12340_v35 }
 0x779   : > { %v12356_v17 = vrot.slane %v12342_v12, %v14701_v19 }
 0x77b   : > { %v12357_v54 = vcombine.low %v12349_v14, %v12356_v17 }
 0x77d   : > { %12421 = vst [vmem:[%s14847_s24 + $0xf8] sm:$0xff] %v12357_v54 }
 0x77e PF: > { %p23_p4 = scmp.ge.s32.totalorder %s14034_s15, 4   ;;  %s16812_s17 = smov %s13801_s18 }
 0x77f   : > { %s16813_s18 = smov %s13805_s19  ;;  %s16814_s19 = smov %s14046_s28 }
 0x780   : > { %s16815_s20 = smov %s14034_s15  ;;  %25 = sbr.rel (!%p23_p4) target bundleno = 14 (0xe), region = 146 }
 0x787   :  { %12442 = vsyncpa [#allocation3], 1 }
 0x788   :  { %12444 = vsyncpa [#allocation3 + $0x1], 1 }
 0x789   :  { %12445 = vsyncpa [#allocation5], 1 }
 0x78a   :  { %12446 = vsyncpa [#allocation8], 1 }
 0x78b   :  { %12447 = vsyncpa [#allocation11], 1 }
 0x78c   :  { %12448 = vsyncpa [#allocation14], 1 }

</bundles_post_ra>
